<compile_context>
chip_gen: v7x
topology: tpu7x:2x2x1
jax: 0.10.0
libtpu: 0.0.40
codegen_flags: <defaults>
</compile_context>

<pallas_src>
import jax
import jax.numpy as jnp
from jax import lax
from jax.experimental import pallas as pl
from jax.experimental.pallas import tpu as pltpu


CH = 128      # lane-dense (padded) output-channel width for conv stores
C_STEM = 16   # logical stem channels
C_BLK = 32    # logical block channels
EMB = 512     # embedding width


def _round_up(x, m):
    return ((x + m - 1) // m) * m


# --------------------------------------------------------------------------
# Fused matmul kernel: y = epilogue(A @ B) on the MXU (bf16 in, f32 acc)
#   epilogue: *scale + shift [-> PReLU(alpha)] [-> *post_s + post_t]
#             [-> + residual] [-> L2 normalize along N]
# --------------------------------------------------------------------------
def _make_fused_matmul_kernel(use_prelu, has_post, has_res, l2norm, multi_k):
    def kernel(*refs):
        a_ref, b_ref, vec_ref = refs[:3]
        pos = 3
        res_ref = None
        if has_res:
            res_ref = refs[pos]; pos += 1
        o_ref = refs[pos]; pos += 1
        acc_ref = refs[pos] if multi_k else None

        def epilogue(acc):
            v = vec_ref[...]                         # (n_vec, N) f32
            y = acc * v[0:1] + v[1:2]
            idx = 2
            if use_prelu:
                y = jnp.where(y >= 0.0, y, v[idx:idx + 1] * y)
                idx += 1
            if has_post:
                y = y * v[idx:idx + 1] + v[idx + 1:idx + 2]
                idx += 2
            if has_res:
                y = y + res_ref[...].astype(jnp.float32)
            if l2norm:
                # x / max(||x||, 1e-12) == x * rsqrt(max(||x||^2, 1e-24))
                ssq = jnp.sum(y * y, axis=1, keepdims=True)
                y = y * lax.rsqrt(jnp.maximum(ssq, 1e-24))
            o_ref[...] = y.astype(o_ref.dtype)

        if multi_k:
            k = pl.program_id(1)

            @pl.when(k == 0)
            def _():
                acc_ref[...] = jnp.zeros_like(acc_ref)

            acc_ref[...] += jnp.dot(a_ref[...], b_ref[...],
                                    preferred_element_type=jnp.float32)

            @pl.when(k == pl.num_programs(1) - 1)
            def _():
                epilogue(acc_ref[...])
        else:
            epilogue(jnp.dot(a_ref[...], b_ref[...],
                             preferred_element_type=jnp.float32))

    return kernel


def fused_matmul(a, b, scale, shift, *, alpha=None, post_scale=None,
                 post_shift=None, residual=None, l2norm=False,
                 out_dtype=jnp.bfloat16):
    """(M,K)@(K,N) with fused folded-BN / PReLU / post-affine / residual / L2 epilogue."""
    M, K = a.shape
    K2, N = b.shape
    assert K == K2
    assert N % 128 == 0, "output channels must be lane-dense (multiple of 128)"

    use_prelu = alpha is not None
    has_post = post_scale is not None
    has_res = residual is not None

    # Pack all epilogue vectors into one (n_vec, N) f32 array -> single DMA.
    vec_rows = [scale, shift]
    if use_prelu:
        vec_rows.append(alpha)
    if has_post:
        vec_rows.extend([post_scale, post_shift])
    vecs = jnp.stack([jnp.asarray(v, jnp.float32).reshape(N) for v in vec_rows])
    n_vec = vecs.shape[0]

    # ---- M (row) tiling: large tiles; keep >=2 grid steps when M allows so the
    # "parallel" axis can shard across the 2 TensorCores on v7x.
    if M >= 1024:
        tm = 512
    elif M >= 512:
        tm = 256
    else:
        tm = _round_up(M, 16)          # bf16 sublane pack
    M_pad = _round_up(M, tm)
    if M_pad != M:
        a = jnp.pad(a, ((0, M_pad - M), (0, 0)))
        if has_res:
            residual = jnp.pad(residual, ((0, M_pad - M), (0, 0)))

    # ---- K tiling: single step for K <= 2048, else 128-aligned chunks.
    # TODO(synk): for the real iresnet100 FC head (K~25088) raise tk to 4096 on
    # v5e/v6e (keep 2048 under v7x's 64 MiB VMEM budget).
    MAX_TK = 2048
    if K <= MAX_TK:
        tk, K_pad = K, K
    else:
        K_pad = _round_up(K, 128)
        tk = 128
        for cand in (2048, 1024, 512, 256):
            if K_pad % cand == 0:
                tk = cand
                break
        if K_pad != K:
            a = jnp.pad(a, ((0, 0), (0, K_pad - K)))
            b = jnp.pad(b, ((0, K_pad - K), (0, 0)))
    multi_k = (K_pad // tk) > 1

    # MXU at native bf16 rate; activations already stream as bf16 (no-op cast).
    if a.dtype != jnp.bfloat16:
        a = a.astype(jnp.bfloat16)
    if b.dtype != jnp.bfloat16:
        b = b.astype(jnp.bfloat16)

    if multi_k:
        grid = (M_pad // tm, K_pad // tk)
        a_spec = pl.BlockSpec((tm, tk), lambda i, k: (i, k))
        b_spec = pl.BlockSpec((tk, N), lambda i, k: (k, 0))
        vec_spec = pl.BlockSpec((n_vec, N), lambda i, k: (0, 0))
        row_spec = pl.BlockSpec((tm, N), lambda i, k: (i, 0))
        dim_sems = ("parallel", "arbitrary")
        scratch = [pltpu.VMEM((tm, N), jnp.float32)]
    else:
        grid = (M_pad // tm,)
        a_spec = pl.BlockSpec((tm, tk), lambda i: (i, 0))
        b_spec = pl.BlockSpec((tk, N), lambda i: (0, 0))
        vec_spec = pl.BlockSpec((n_vec, N), lambda i: (0, 0))
        row_spec = pl.BlockSpec((tm, N), lambda i: (i, 0))
        dim_sems = ("parallel",)
        scratch = []

    inputs = [a, b, vecs]
    in_specs = [a_spec, b_spec, vec_spec]
    if has_res:
        inputs.append(residual.astype(jnp.bfloat16))
        in_specs.append(row_spec)

    out = pl.pallas_call(
        _make_fused_matmul_kernel(use_prelu, has_post, has_res, l2norm, multi_k),
        out_shape=jax.ShapeDtypeStruct((M_pad, N), out_dtype),
        grid_spec=pltpu.PrefetchScalarGridSpec(
            num_scalar_prefetch=0,
            grid=grid,
            in_specs=in_specs,
            out_specs=row_spec,
            scratch_shapes=scratch),
        compiler_params=pltpu.CompilerParams(
            dimension_semantics=dim_sems,
            vmem_limit_bytes=48 * 1024 * 1024),   # <= v7x's 64 MiB physical VMEM
    )(*inputs)

    if M_pad != M:
        out = out[:M]
    return out


# --------------------------------------------------------------------------
# JAX glue: im2col patch extraction (logical, unpadded channel counts)
# --------------------------------------------------------------------------
def im2col(x_nhwc, ksize, stride, pad):
    # TODO(synk): for the real 112x112 model, fold this gather into the A
    # BlockSpec index_map / in-kernel row-slab DMA to avoid the 9x HBM blow-up.
    B, H, W, C = x_nhwc.shape
    xp = jnp.pad(x_nhwc, ((0, 0), (pad, pad), (pad, pad), (0, 0)))
    Ho = (H + 2 * pad - ksize) // stride + 1
    Wo = (W + 2 * pad - ksize) // stride + 1
    cols = []
    for i in range(ksize):
        for j in range(ksize):
            cols.append(xp[:, i:i + (Ho - 1) * stride + 1:stride,
                           j:j + (Wo - 1) * stride + 1:stride, :])
    patches = jnp.concatenate(cols, axis=-1)           # (B, Ho, Wo, k*k*C)
    return patches.reshape(B * Ho * Wo, ksize * ksize * C), (B, Ho, Wo)


# --------------------------------------------------------------------------
# Synthetic parameters: a single "raw" f32 logical set, plus the folded /
# cout-padded / bf16 kernel set derived from it.
# --------------------------------------------------------------------------
def make_params(key, img_hw=(16, 16)):
    H, W = img_hw
    Ho2, Wo2 = H // 2, W // 2
    keys = iter(jax.random.split(key, 16))

    def conv_w(k, kk, cin, cout):
        return (jax.random.normal(k, (kk * cin, cout), jnp.float32)
                / jnp.sqrt(jnp.float32(kk * cin)))

    def bn(k, c):
        k1, k2, k3, k4 = jax.random.split(k, 4)
        gamma = 1.0 + 0.1 * jax.random.normal(k1, (c,), jnp.float32)
        beta = 0.1 * jax.random.normal(k2, (c,), jnp.float32)
        mean = 0.1 * jax.random.normal(k3, (c,), jnp.float32)
        var = jnp.abs(jax.random.normal(k4, (c,), jnp.float32)) + 0.5
        scale = gamma / jnp.sqrt(var + 1e-5)
        shift = beta - mean * scale
        return scale, shift

    raw = {}
    raw['stem_w'] = conv_w(next(keys), 9, 3, C_STEM)                  # (27, 16)
    raw['stem_scale'], raw['stem_shift'] = bn(next(keys), C_STEM)
    raw['stem_alpha'] = jnp.full((C_STEM,), 0.25, jnp.float32)
    raw['bn1_scale'], raw['bn1_shift'] = bn(next(keys), C_STEM)
    raw['conv1_w'] = conv_w(next(keys), 9, C_STEM, C_BLK)             # (144, 32)
    raw['bn2_scale'], raw['bn2_shift'] = bn(next(keys), C_BLK)
    raw['blk_alpha'] = jnp.full((C_BLK,), 0.25, jnp.float32)
    raw['conv2_w'] = conv_w(next(keys), 9, C_BLK, C_BLK)              # (288, 32)
    raw['bn3_scale'], raw['bn3_shift'] = bn(next(keys), C_BLK)
    raw['down_w'] = conv_w(next(keys), 1, C_STEM, C_BLK)              # (16, 32)
    raw['dbn_scale'], raw['dbn_shift'] = bn(next(keys), C_BLK)
    raw['fc_w'] = (jax.random.normal(next(keys), (Ho2 * Wo2 * C_BLK, EMB),
                                     jnp.float32)
                   / jnp.sqrt(jnp.float32(Ho2 * Wo2 * C_BLK)))        # (2048, 512)
    fc_b = 0.1 * jax.random.normal(next(keys), (EMB,), jnp.float32)
    bn_s, bn_t = bn(next(keys), EMB)
    raw['fc_scale'] = bn_s
    raw['fc_shift'] = bn_s * fc_b + bn_t          # FC bias folded into BN1d (exact)

    # ---- kernel params: unpadded K, cout padded to 128 (zeros), bf16 weights
    def pad_cols(w):
        return jnp.pad(w, ((0, 0), (0, CH - w.shape[1])))

    def pad_vec(v, fill):
        return jnp.pad(v, (0, CH - v.shape[0]), constant_values=fill)

    p = {}
    p['stem_w'] = pad_cols(raw['stem_w']).astype(jnp.bfloat16)        # (27, 128)
    p['stem_scale'] = pad_vec(raw['stem_scale'], 1.0)
    p['stem_shift'] = pad_vec(raw['stem_shift'], 0.0)
    p['stem_alpha'] = pad_vec(raw['stem_alpha'], 1.0)
    # block bn1 fused into the stem epilogue as a post-affine (exact: conv1's
    # zero spatial padding is applied after bn1 in the reference network).
    p['stem_post_scale'] = pad_vec(raw['bn1_scale'], 1.0)
    p['stem_post_shift'] = pad_vec(raw['bn1_shift'], 0.0)

    p['conv1_w'] = pad_cols(raw['conv1_w']).astype(jnp.bfloat16)      # (144, 128)
    p['bn2_scale'] = pad_vec(raw['bn2_scale'], 1.0)
    p['bn2_shift'] = pad_vec(raw['bn2_shift'], 0.0)
    p['blk_alpha'] = pad_vec(raw['blk_alpha'], 1.0)

    p['conv2_w'] = pad_cols(raw['conv2_w']).astype(jnp.bfloat16)      # (288, 128)
    p['bn3_scale'] = pad_vec(raw['bn3_scale'], 1.0)
    p['bn3_shift'] = pad_vec(raw['bn3_shift'], 0.0)

    # downsample consumes the pre-bn1 activation; the stem output already
    # carries bn1, so fold bn1^{-1} into the 1x1 conv weights / BN shift.
    inv_s1 = 1.0 / raw['bn1_scale']
    down_w_folded = raw['down_w'] * inv_s1[:, None]
    down_shift = raw['dbn_shift'] - raw['dbn_scale'] * (
        (raw['bn1_shift'] * inv_s1) @ raw['down_w'])
    p['down_w'] = pad_cols(down_w_folded).astype(jnp.bfloat16)        # (16, 128)
    p['down_scale'] = pad_vec(raw['dbn_scale'], 1.0)
    p['down_shift'] = pad_vec(down_shift, 0.0)

    p['fc_w'] = raw['fc_w'].astype(jnp.bfloat16)                      # (2048, 512)
    p['fc_scale'] = raw['fc_scale']
    p['fc_shift'] = raw['fc_shift']
    return p, raw


# --------------------------------------------------------------------------
# Forward pass (Pallas path)
# --------------------------------------------------------------------------
def arcface_forward(x_nchw, params):
    """x_nchw: (B, 3, H, W) float32 -> L2-normalized embeddings (B, 512) f32."""
    B = x_nchw.shape[0]
    x = jnp.transpose(x_nchw, (0, 2, 3, 1)).astype(jnp.bfloat16)      # -> NHWC bf16

    # stem conv3x3 s1 p1 + BN + PReLU, block bn1 fused as a post-affine
    patches, (_, Ho, Wo) = im2col(x, 3, 1, 1)                         # (BHW, 27)
    z = fused_matmul(patches, params['stem_w'],
                     params['stem_scale'], params['stem_shift'],
                     alpha=params['stem_alpha'],
                     post_scale=params['stem_post_scale'],
                     post_shift=params['stem_post_shift'],
                     out_dtype=jnp.bfloat16)
    z = z.reshape(B, Ho, Wo, CH)[..., :C_STEM]    # drop padded (all-zero) channels

    # residual branch: 1x1 conv s2 + BN (bn1^{-1} pre-folded into the weights)
    dpatches, (_, Ho2, Wo2) = im2col(z, 1, 2, 0)                      # (BH2W2, 16)
    ds = fused_matmul(dpatches, params['down_w'],
                      params['down_scale'], params['down_shift'],
                      out_dtype=jnp.bfloat16)

    # main branch: conv3x3 -> bn2 -> PReLU
    patches, _ = im2col(z, 3, 1, 1)                                   # (BHW, 144)
    h = fused_matmul(patches, params['conv1_w'],
                     params['bn2_scale'], params['bn2_shift'],
                     alpha=params['blk_alpha'], out_dtype=jnp.bfloat16)
    h = h.reshape(B, Ho, Wo, CH)[..., :C_BLK]

    # conv3x3 s2 -> bn3, residual add fused into the epilogue
    patches, _ = im2col(h, 3, 2, 1)                                   # (BH2W2, 288)
    out = fused_matmul(patches, params['conv2_w'],
                       params['bn3_scale'], params['bn3_shift'],
                       residual=ds, out_dtype=jnp.bfloat16)
    out = out.reshape(B, Ho2, Wo2, CH)[..., :C_BLK]

    # head: flatten -> FC(->512)+bias+BN1d (folded) -> L2 normalize, all fused
    feat = out.reshape(B, Ho2 * Wo2 * C_BLK)                          # (B, 2048)
    emb = fused_matmul(feat, params['fc_w'],
                       params['fc_scale'], params['fc_shift'],
                       l2norm=True, out_dtype=jnp.float32)
    return emb


# --------------------------------------------------------------------------
# Unfused f32 reference (mirrors IBasicBlock op order) for validation
# --------------------------------------------------------------------------
def reference_forward(x_nchw, raw):
    B = x_nchw.shape[0]
    x = jnp.transpose(x_nchw, (0, 2, 3, 1)).astype(jnp.float32)

    def prelu(v, a):
        return jnp.where(v >= 0.0, v, a * v)

    p0, (_, Ho, Wo) = im2col(x, 3, 1, 1)
    y0 = prelu((p0 @ raw['stem_w']) * raw['stem_scale'] + raw['stem_shift'],
               raw['stem_alpha'])
    y0 = y0.reshape(B, Ho, Wo, C_STEM)

    b1 = y0 * raw['bn1_scale'] + raw['bn1_shift']                     # bn1
    p1, _ = im2col(b1, 3, 1, 1)
    y1 = prelu((p1 @ raw['conv1_w']) * raw['bn2_scale'] + raw['bn2_shift'],
               raw['blk_alpha'])
    y1 = y1.reshape(B, Ho, Wo, C_BLK)
    p2, (_, Ho2, Wo2) = im2col(y1, 3, 2, 1)
    y2 = (p2 @ raw['conv2_w']) * raw['bn3_scale'] + raw['bn3_shift']

    pd, _ = im2col(y0, 1, 2, 0)                                       # pre-bn1 input
    yd = (pd @ raw['down_w']) * raw['dbn_scale'] + raw['dbn_shift']

    feat = (y2 + yd).reshape(B, Ho2 * Wo2 * C_BLK)
    emb = (feat @ raw['fc_w']) * raw['fc_scale'] + raw['fc_shift']
    nrm = jnp.sqrt(jnp.sum(emb * emb, axis=1, keepdims=True))
    return emb / jnp.maximum(nrm, 1e-12)


# --------------------------------------------------------------------------
if __name__ == "__main__":
    # Small shapes consistent with the module's forward (real model: 3x112x112,
    # spatially scaled down to 16x16 for this synthetic backbone).
    B, C, H, W = 2, 3, 16, 16
    x = jax.random.normal(jax.random.PRNGKey(0), (B, C, H, W), jnp.float32)
    params, raw = make_params(jax.random.PRNGKey(42), img_hw=(H, W))

    emb = jax.jit(arcface_forward)(x, params)
    emb = jax.block_until_ready(emb)

    assert emb.shape == (B, EMB), emb.shape
    norms = jnp.linalg.norm(emb, axis=1)
    assert bool(jnp.all(jnp.abs(norms - 1.0) < 1e-3)), norms

    # Numerical check of the fused/folded bf16 Pallas path against the unfused
    # f32 reference (loose tolerance: bf16 weights + activations).
    ref = reference_forward(x, raw)
    cos = jnp.sum(emb * ref, axis=1)
    assert bool(jnp.all(cos > 0.98)), cos
    assert bool(jnp.max(jnp.abs(emb - ref)) < 0.05), jnp.max(jnp.abs(emb - ref))

    print("KERNEL_OK")
</pallas_src>

<mosaic_0001>
module attributes {stable_mosaic.version = 11 : i64} {
  func.func @kernel(%arg0: i32, %arg1: memref<256x27xbf16, #tpu.memory_space<vmem>>, %arg2: memref<27x128xbf16, #tpu.memory_space<vmem>>, %arg3: memref<5x128xf32, #tpu.memory_space<vmem>>, %arg4: memref<256x128xbf16, #tpu.memory_space<vmem>>) attributes {dimension_semantics = [#tpu.dimension_semantics<parallel>], iteration_bounds = array<i64: 2>, scalar_prefetch = 0 : i64, scratch_operands = 0 : i64, tpu.core_type = #tpu.core_type<tc>, window_params = [{transform_indices = @transform_0, window_bounds = array<i64: 256, 27>}, {pipeline_mode = #tpu.pipeline_mode<synchronous>, transform_indices = @transform_1, window_bounds = array<i64: 27, 128>}, {pipeline_mode = #tpu.pipeline_mode<synchronous>, transform_indices = @transform_2, window_bounds = array<i64: 5, 128>}, {transform_indices = @transform_3, window_bounds = array<i64: 256, 128>}]} {
    %c0 = arith.constant 0 : index
    %c0_0 = arith.constant 0 : index
    %0 = vector.load %arg1[%c0, %c0_0] : memref<256x27xbf16, #tpu.memory_space<vmem>>, vector<256x27xbf16>
    %c0_1 = arith.constant 0 : index
    %c0_2 = arith.constant 0 : index
    %1 = vector.load %arg2[%c0_1, %c0_2] : memref<27x128xbf16, #tpu.memory_space<vmem>>, vector<27x128xbf16>
    %cst = arith.constant dense<0.000000e+00> : vector<256x128xf32>
    %2 = tpu.matmul %0, %1, %cst {dimension_numbers = #tpu.dot_dimension_numbers<[1], [0], [0], [1], [0, 0, 1, 1], [], []>} : vector<256x27xbf16>, vector<27x128xbf16>, vector<256x128xf32> -> vector<256x128xf32>
    %c0_3 = arith.constant 0 : index
    %c0_4 = arith.constant 0 : index
    %3 = vector.load %arg3[%c0_3, %c0_4] : memref<5x128xf32, #tpu.memory_space<vmem>>, vector<5x128xf32>
    %4 = vector.extract_strided_slice %3 {offsets = [0, 0], sizes = [1, 128], strides = [1, 1]} : vector<5x128xf32> to vector<1x128xf32>
    %5 = vector.broadcast %4 : vector<1x128xf32> to vector<256x128xf32>
    %6 = arith.mulf %2, %5 : vector<256x128xf32>
    %7 = vector.extract_strided_slice %3 {offsets = [1, 0], sizes = [1, 128], strides = [1, 1]} : vector<5x128xf32> to vector<1x128xf32>
    %8 = vector.broadcast %7 : vector<1x128xf32> to vector<256x128xf32>
    %9 = arith.addf %6, %8 : vector<256x128xf32>
    %cst_5 = arith.constant 0.000000e+00 : f32
    %10 = vector.broadcast %cst_5 : f32 to vector<256x128xf32>
    %11 = arith.cmpf oge, %9, %10 : vector<256x128xf32>
    %12 = vector.extract_strided_slice %3 {offsets = [2, 0], sizes = [1, 128], strides = [1, 1]} : vector<5x128xf32> to vector<1x128xf32>
    %13 = vector.broadcast %12 : vector<1x128xf32> to vector<256x128xf32>
    %14 = arith.mulf %13, %9 : vector<256x128xf32>
    %15 = arith.select %11, %9, %14 : vector<256x128xi1>, vector<256x128xf32>
    %16 = vector.extract_strided_slice %3 {offsets = [3, 0], sizes = [1, 128], strides = [1, 1]} : vector<5x128xf32> to vector<1x128xf32>
    %17 = vector.broadcast %16 : vector<1x128xf32> to vector<256x128xf32>
    %18 = arith.mulf %15, %17 : vector<256x128xf32>
    %19 = vector.extract_strided_slice %3 {offsets = [4, 0], sizes = [1, 128], strides = [1, 1]} : vector<5x128xf32> to vector<1x128xf32>
    %20 = vector.broadcast %19 : vector<1x128xf32> to vector<256x128xf32>
    %21 = arith.addf %18, %20 : vector<256x128xf32>
    %22 = arith.truncf %21 : vector<256x128xf32> to vector<256x128xbf16>
    %c0_6 = arith.constant 0 : index
    %c0_7 = arith.constant 0 : index
    %23 = vector.load %arg4[%c0_6, %c0_7] : memref<256x128xbf16, #tpu.memory_space<vmem>>, vector<256x128xbf16>
    tpu.vector_store %arg4[%c0_6, %c0_7], %22 {strides = array<i32>} : memref<256x128xbf16, #tpu.memory_space<vmem>>, vector<256x128xbf16>,
    return
  }
  func.func @transform_0(%arg0: i32) -> (i32, i32) {
    %c0_i32 = arith.constant 0 : i32
    %c0_i32_0 = arith.constant 0 : i32
    return %arg0, %c0_i32 : i32, i32
  }
  func.func @transform_1(%arg0: i32) -> (i32, i32) {
    %c0_i32 = arith.constant 0 : i32
    %c0_i32_0 = arith.constant 0 : i32
    %c0_i32_1 = arith.constant 0 : i32
    return %c0_i32, %c0_i32_0 : i32, i32
  }
  func.func @transform_2(%arg0: i32) -> (i32, i32) {
    %c0_i32 = arith.constant 0 : i32
    %c0_i32_0 = arith.constant 0 : i32
    %c0_i32_1 = arith.constant 0 : i32
    return %c0_i32, %c0_i32_0 : i32, i32
  }
  func.func @transform_3(%arg0: i32) -> (i32, i32) {
    %c0_i32 = arith.constant 0 : i32
    %c0_i32_0 = arith.constant 0 : i32
    return %arg0, %c0_i32 : i32, i32
  }
}

module attributes {stable_mosaic.version = 11 : i64} {
  func.func @kernel(%arg0: i32, %arg1: memref<256x144xbf16, #tpu.memory_space<vmem>>, %arg2: memref<144x128xbf16, #tpu.memory_space<vmem>>, %arg3: memref<3x128xf32, #tpu.memory_space<vmem>>, %arg4: memref<256x128xbf16, #tpu.memory_space<vmem>>) attributes {dimension_semantics = [#tpu.dimension_semantics<parallel>], iteration_bounds = array<i64: 2>, scalar_prefetch = 0 : i64, scratch_operands = 0 : i64, tpu.core_type = #tpu.core_type<tc>, window_params = [{transform_indices = @transform_0, window_bounds = array<i64: 256, 144>}, {pipeline_mode = #tpu.pipeline_mode<synchronous>, transform_indices = @transform_1, window_bounds = array<i64: 144, 128>}, {pipeline_mode = #tpu.pipeline_mode<synchronous>, transform_indices = @transform_2, window_bounds = array<i64: 3, 128>}, {transform_indices = @transform_3, window_bounds = array<i64: 256, 128>}]} {
    %c0 = arith.constant 0 : index
    %c0_0 = arith.constant 0 : index
    %0 = vector.load %arg1[%c0, %c0_0] : memref<256x144xbf16, #tpu.memory_space<vmem>>, vector<256x144xbf16>
    %c0_1 = arith.constant 0 : index
    %c0_2 = arith.constant 0 : index
    %1 = vector.load %arg2[%c0_1, %c0_2] : memref<144x128xbf16, #tpu.memory_space<vmem>>, vector<144x128xbf16>
    %cst = arith.constant dense<0.000000e+00> : vector<256x128xf32>
    %2 = tpu.matmul %0, %1, %cst {dimension_numbers = #tpu.dot_dimension_numbers<[1], [0], [0], [1], [0, 0, 1, 1], [], []>} : vector<256x144xbf16>, vector<144x128xbf16>, vector<256x128xf32> -> vector<256x128xf32>
    %c0_3 = arith.constant 0 : index
    %c0_4 = arith.constant 0 : index
    %3 = vector.load %arg3[%c0_3, %c0_4] : memref<3x128xf32, #tpu.memory_space<vmem>>, vector<3x128xf32>
    %4 = vector.extract_strided_slice %3 {offsets = [0, 0], sizes = [1, 128], strides = [1, 1]} : vector<3x128xf32> to vector<1x128xf32>
    %5 = vector.broadcast %4 : vector<1x128xf32> to vector<256x128xf32>
    %6 = arith.mulf %2, %5 : vector<256x128xf32>
    %7 = vector.extract_strided_slice %3 {offsets = [1, 0], sizes = [1, 128], strides = [1, 1]} : vector<3x128xf32> to vector<1x128xf32>
    %8 = vector.broadcast %7 : vector<1x128xf32> to vector<256x128xf32>
    %9 = arith.addf %6, %8 : vector<256x128xf32>
    %cst_5 = arith.constant 0.000000e+00 : f32
    %10 = vector.broadcast %cst_5 : f32 to vector<256x128xf32>
    %11 = arith.cmpf oge, %9, %10 : vector<256x128xf32>
    %12 = vector.extract_strided_slice %3 {offsets = [2, 0], sizes = [1, 128], strides = [1, 1]} : vector<3x128xf32> to vector<1x128xf32>
    %13 = vector.broadcast %12 : vector<1x128xf32> to vector<256x128xf32>
    %14 = arith.mulf %13, %9 : vector<256x128xf32>
    %15 = arith.select %11, %9, %14 : vector<256x128xi1>, vector<256x128xf32>
    %16 = arith.truncf %15 : vector<256x128xf32> to vector<256x128xbf16>
    %c0_6 = arith.constant 0 : index
    %c0_7 = arith.constant 0 : index
    %17 = vector.load %arg4[%c0_6, %c0_7] : memref<256x128xbf16, #tpu.memory_space<vmem>>, vector<256x128xbf16>
    tpu.vector_store %arg4[%c0_6, %c0_7], %16 {strides = array<i32>} : memref<256x128xbf16, #tpu.memory_space<vmem>>, vector<256x128xbf16>,
    return
  }
  func.func @transform_0(%arg0: i32) -> (i32, i32) {
    %c0_i32 = arith.constant 0 : i32
    %c0_i32_0 = arith.constant 0 : i32
    return %arg0, %c0_i32 : i32, i32
  }
  func.func @transform_1(%arg0: i32) -> (i32, i32) {
    %c0_i32 = arith.constant 0 : i32
    %c0_i32_0 = arith.constant 0 : i32
    %c0_i32_1 = arith.constant 0 : i32
    return %c0_i32, %c0_i32_0 : i32, i32
  }
  func.func @transform_2(%arg0: i32) -> (i32, i32) {
    %c0_i32 = arith.constant 0 : i32
    %c0_i32_0 = arith.constant 0 : i32
    %c0_i32_1 = arith.constant 0 : i32
    return %c0_i32, %c0_i32_0 : i32, i32
  }
  func.func @transform_3(%arg0: i32) -> (i32, i32) {
    %c0_i32 = arith.constant 0 : i32
    %c0_i32_0 = arith.constant 0 : i32
    return %arg0, %c0_i32 : i32, i32
  }
}

module attributes {stable_mosaic.version = 11 : i64} {
  func.func @kernel(%arg0: i32, %arg1: memref<128x288xbf16, #tpu.memory_space<vmem>>, %arg2: memref<288x128xbf16, #tpu.memory_space<vmem>>, %arg3: memref<2x128xf32, #tpu.memory_space<vmem>>, %arg4: memref<128x128xbf16, #tpu.memory_space<vmem>>, %arg5: memref<128x128xbf16, #tpu.memory_space<vmem>>) attributes {dimension_semantics = [#tpu.dimension_semantics<parallel>], iteration_bounds = array<i64: 1>, scalar_prefetch = 0 : i64, scratch_operands = 0 : i64, tpu.core_type = #tpu.core_type<tc>, window_params = [{transform_indices = @transform_0, window_bounds = array<i64: 128, 288>}, {pipeline_mode = #tpu.pipeline_mode<synchronous>, transform_indices = @transform_1, window_bounds = array<i64: 288, 128>}, {pipeline_mode = #tpu.pipeline_mode<synchronous>, transform_indices = @transform_2, window_bounds = array<i64: 2, 128>}, {transform_indices = @transform_3, window_bounds = array<i64: 128, 128>}, {transform_indices = @transform_4, window_bounds = array<i64: 128, 128>}]} {
    %c0 = arith.constant 0 : index
    %c0_0 = arith.constant 0 : index
    %0 = vector.load %arg1[%c0, %c0_0] : memref<128x288xbf16, #tpu.memory_space<vmem>>, vector<128x288xbf16>
    %c0_1 = arith.constant 0 : index
    %c0_2 = arith.constant 0 : index
    %1 = vector.load %arg2[%c0_1, %c0_2] : memref<288x128xbf16, #tpu.memory_space<vmem>>, vector<288x128xbf16>
    %cst = arith.constant dense<0.000000e+00> : vector<128x128xf32>
    %2 = tpu.matmul %0, %1, %cst {dimension_numbers = #tpu.dot_dimension_numbers<[1], [0], [0], [1], [0, 0, 1, 1], [], []>} : vector<128x288xbf16>, vector<288x128xbf16>, vector<128x128xf32> -> vector<128x128xf32>
    %c0_3 = arith.constant 0 : index
    %c0_4 = arith.constant 0 : index
    %3 = vector.load %arg3[%c0_3, %c0_4] : memref<2x128xf32, #tpu.memory_space<vmem>>, vector<2x128xf32>
    %4 = vector.extract_strided_slice %3 {offsets = [0, 0], sizes = [1, 128], strides = [1, 1]} : vector<2x128xf32> to vector<1x128xf32>
    %5 = vector.broadcast %4 : vector<1x128xf32> to vector<128x128xf32>
    %6 = arith.mulf %2, %5 : vector<128x128xf32>
    %7 = vector.extract_strided_slice %3 {offsets = [1, 0], sizes = [1, 128], strides = [1, 1]} : vector<2x128xf32> to vector<1x128xf32>
    %8 = vector.broadcast %7 : vector<1x128xf32> to vector<128x128xf32>
    %9 = arith.addf %6, %8 : vector<128x128xf32>
    %c0_5 = arith.constant 0 : index
    %c0_6 = arith.constant 0 : index
    %10 = vector.load %arg4[%c0_5, %c0_6] : memref<128x128xbf16, #tpu.memory_space<vmem>>, vector<128x128xbf16>
    %11 = arith.extf %10 : vector<128x128xbf16> to vector<128x128xf32>
    %12 = arith.addf %9, %11 : vector<128x128xf32>
    %13 = arith.truncf %12 : vector<128x128xf32> to vector<128x128xbf16>
    %c0_7 = arith.constant 0 : index
    %c0_8 = arith.constant 0 : index
    %14 = vector.load %arg5[%c0_7, %c0_8] : memref<128x128xbf16, #tpu.memory_space<vmem>>, vector<128x128xbf16>
    tpu.vector_store %arg5[%c0_7, %c0_8], %13 {strides = array<i32>} : memref<128x128xbf16, #tpu.memory_space<vmem>>, vector<128x128xbf16>,
    return
  }
  func.func @transform_0(%arg0: i32) -> (i32, i32) {
    %c0_i32 = arith.constant 0 : i32
    %c0_i32_0 = arith.constant 0 : i32
    return %arg0, %c0_i32 : i32, i32
  }
  func.func @transform_1(%arg0: i32) -> (i32, i32) {
    %c0_i32 = arith.constant 0 : i32
    %c0_i32_0 = arith.constant 0 : i32
    %c0_i32_1 = arith.constant 0 : i32
    return %c0_i32, %c0_i32_0 : i32, i32
  }
  func.func @transform_2(%arg0: i32) -> (i32, i32) {
    %c0_i32 = arith.constant 0 : i32
    %c0_i32_0 = arith.constant 0 : i32
    %c0_i32_1 = arith.constant 0 : i32
    return %c0_i32, %c0_i32_0 : i32, i32
  }
  func.func @transform_3(%arg0: i32) -> (i32, i32) {
    %c0_i32 = arith.constant 0 : i32
    %c0_i32_0 = arith.constant 0 : i32
    return %arg0, %c0_i32 : i32, i32
  }
  func.func @transform_4(%arg0: i32) -> (i32, i32) {
    %c0_i32 = arith.constant 0 : i32
    %c0_i32_0 = arith.constant 0 : i32
    return %arg0, %c0_i32 : i32, i32
  }
}

module attributes {stable_mosaic.version = 11 : i64} {
  func.func @kernel(%arg0: i32, %arg1: memref<128x16xbf16, #tpu.memory_space<vmem>>, %arg2: memref<16x128xbf16, #tpu.memory_space<vmem>>, %arg3: memref<2x128xf32, #tpu.memory_space<vmem>>, %arg4: memref<128x128xbf16, #tpu.memory_space<vmem>>) attributes {dimension_semantics = [#tpu.dimension_semantics<parallel>], iteration_bounds = array<i64: 1>, scalar_prefetch = 0 : i64, scratch_operands = 0 : i64, tpu.core_type = #tpu.core_type<tc>, window_params = [{transform_indices = @transform_0, window_bounds = array<i64: 128, 16>}, {pipeline_mode = #tpu.pipeline_mode<synchronous>, transform_indices = @transform_1, window_bounds = array<i64: 16, 128>}, {pipeline_mode = #tpu.pipeline_mode<synchronous>, transform_indices = @transform_2, window_bounds = array<i64: 2, 128>}, {transform_indices = @transform_3, window_bounds = array<i64: 128, 128>}]} {
    %c0 = arith.constant 0 : index
    %c0_0 = arith.constant 0 : index
    %0 = vector.load %arg1[%c0, %c0_0] : memref<128x16xbf16, #tpu.memory_space<vmem>>, vector<128x16xbf16>
    %c0_1 = arith.constant 0 : index
    %c0_2 = arith.constant 0 : index
    %1 = vector.load %arg2[%c0_1, %c0_2] : memref<16x128xbf16, #tpu.memory_space<vmem>>, vector<16x128xbf16>
    %cst = arith.constant dense<0.000000e+00> : vector<128x128xf32>
    %2 = tpu.matmul %0, %1, %cst {dimension_numbers = #tpu.dot_dimension_numbers<[1], [0], [0], [1], [0, 0, 1, 1], [], []>} : vector<128x16xbf16>, vector<16x128xbf16>, vector<128x128xf32> -> vector<128x128xf32>
    %c0_3 = arith.constant 0 : index
    %c0_4 = arith.constant 0 : index
    %3 = vector.load %arg3[%c0_3, %c0_4] : memref<2x128xf32, #tpu.memory_space<vmem>>, vector<2x128xf32>
    %4 = vector.extract_strided_slice %3 {offsets = [0, 0], sizes = [1, 128], strides = [1, 1]} : vector<2x128xf32> to vector<1x128xf32>
    %5 = vector.broadcast %4 : vector<1x128xf32> to vector<128x128xf32>
    %6 = arith.mulf %2, %5 : vector<128x128xf32>
    %7 = vector.extract_strided_slice %3 {offsets = [1, 0], sizes = [1, 128], strides = [1, 1]} : vector<2x128xf32> to vector<1x128xf32>
    %8 = vector.broadcast %7 : vector<1x128xf32> to vector<128x128xf32>
    %9 = arith.addf %6, %8 : vector<128x128xf32>
    %10 = arith.truncf %9 : vector<128x128xf32> to vector<128x128xbf16>
    %c0_5 = arith.constant 0 : index
    %c0_6 = arith.constant 0 : index
    %11 = vector.load %arg4[%c0_5, %c0_6] : memref<128x128xbf16, #tpu.memory_space<vmem>>, vector<128x128xbf16>
    tpu.vector_store %arg4[%c0_5, %c0_6], %10 {strides = array<i32>} : memref<128x128xbf16, #tpu.memory_space<vmem>>, vector<128x128xbf16>,
    return
  }
  func.func @transform_0(%arg0: i32) -> (i32, i32) {
    %c0_i32 = arith.constant 0 : i32
    %c0_i32_0 = arith.constant 0 : i32
    return %arg0, %c0_i32 : i32, i32
  }
  func.func @transform_1(%arg0: i32) -> (i32, i32) {
    %c0_i32 = arith.constant 0 : i32
    %c0_i32_0 = arith.constant 0 : i32
    %c0_i32_1 = arith.constant 0 : i32
    return %c0_i32, %c0_i32_0 : i32, i32
  }
  func.func @transform_2(%arg0: i32) -> (i32, i32) {
    %c0_i32 = arith.constant 0 : i32
    %c0_i32_0 = arith.constant 0 : i32
    %c0_i32_1 = arith.constant 0 : i32
    return %c0_i32, %c0_i32_0 : i32, i32
  }
  func.func @transform_3(%arg0: i32) -> (i32, i32) {
    %c0_i32 = arith.constant 0 : i32
    %c0_i32_0 = arith.constant 0 : i32
    return %arg0, %c0_i32 : i32, i32
  }
}

module attributes {stable_mosaic.version = 11 : i64} {
  func.func @kernel(%arg0: i32, %arg1: memref<16x2048xbf16, #tpu.memory_space<vmem>>, %arg2: memref<2048x512xbf16, #tpu.memory_space<vmem>>, %arg3: memref<2x512xf32, #tpu.memory_space<vmem>>, %arg4: memref<16x512xf32, #tpu.memory_space<vmem>>) attributes {dimension_semantics = [#tpu.dimension_semantics<parallel>], iteration_bounds = array<i64: 1>, scalar_prefetch = 0 : i64, scratch_operands = 0 : i64, tpu.core_type = #tpu.core_type<tc>, window_params = [{transform_indices = @transform_0, window_bounds = array<i64: 16, 2048>}, {pipeline_mode = #tpu.pipeline_mode<synchronous>, transform_indices = @transform_1, window_bounds = array<i64: 2048, 512>}, {pipeline_mode = #tpu.pipeline_mode<synchronous>, transform_indices = @transform_2, window_bounds = array<i64: 2, 512>}, {transform_indices = @transform_3, window_bounds = array<i64: 16, 512>}]} {
    %c0 = arith.constant 0 : index
    %c0_0 = arith.constant 0 : index
    %0 = vector.load %arg1[%c0, %c0_0] : memref<16x2048xbf16, #tpu.memory_space<vmem>>, vector<16x2048xbf16>
    %c0_1 = arith.constant 0 : index
    %c0_2 = arith.constant 0 : index
    %1 = vector.load %arg2[%c0_1, %c0_2] : memref<2048x512xbf16, #tpu.memory_space<vmem>>, vector<2048x512xbf16>
    %cst = arith.constant dense<0.000000e+00> : vector<16x512xf32>
    %2 = tpu.matmul %0, %1, %cst {dimension_numbers = #tpu.dot_dimension_numbers<[1], [0], [0], [1], [0, 0, 1, 1], [], []>} : vector<16x2048xbf16>, vector<2048x512xbf16>, vector<16x512xf32> -> vector<16x512xf32>
    %c0_3 = arith.constant 0 : index
    %c0_4 = arith.constant 0 : index
    %3 = vector.load %arg3[%c0_3, %c0_4] : memref<2x512xf32, #tpu.memory_space<vmem>>, vector<2x512xf32>
    %4 = vector.extract_strided_slice %3 {offsets = [0, 0], sizes = [1, 512], strides = [1, 1]} : vector<2x512xf32> to vector<1x512xf32>
    %5 = vector.broadcast %4 : vector<1x512xf32> to vector<16x512xf32>
    %6 = arith.mulf %2, %5 : vector<16x512xf32>
    %7 = vector.extract_strided_slice %3 {offsets = [1, 0], sizes = [1, 512], strides = [1, 1]} : vector<2x512xf32> to vector<1x512xf32>
    %8 = vector.broadcast %7 : vector<1x512xf32> to vector<16x512xf32>
    %9 = arith.addf %6, %8 : vector<16x512xf32>
    %10 = arith.mulf %9, %9 : vector<16x512xf32>
    %cst_5 = arith.constant dense<0.000000e+00> : vector<16xf32>
    %11 = vector.multi_reduction <add>, %10, %cst_5 [1] : vector<16x512xf32> to vector<16xf32>
    %12 = vector.shape_cast %11 : vector<16xf32> to vector<16x1xf32>
    %cst_6 = arith.constant 1.000000e-24 : f32
    %13 = vector.broadcast %cst_6 : f32 to vector<16x1xf32>
    %14 = arith.maximumf %12, %13 : vector<16x1xf32>
    %15 = math.rsqrt %14 : vector<16x1xf32>
    %16 = vector.broadcast %15 : vector<16x1xf32> to vector<16x512xf32>
    %17 = arith.mulf %9, %16 : vector<16x512xf32>
    %c0_7 = arith.constant 0 : index
    %c0_8 = arith.constant 0 : index
    %18 = vector.load %arg4[%c0_7, %c0_8] : memref<16x512xf32, #tpu.memory_space<vmem>>, vector<16x512xf32>
    tpu.vector_store %arg4[%c0_7, %c0_8], %17 {strides = array<i32>} : memref<16x512xf32, #tpu.memory_space<vmem>>, vector<16x512xf32>,
    return
  }
  func.func @transform_0(%arg0: i32) -> (i32, i32) {
    %c0_i32 = arith.constant 0 : i32
    %c0_i32_0 = arith.constant 0 : i32
    return %arg0, %c0_i32 : i32, i32
  }
  func.func @transform_1(%arg0: i32) -> (i32, i32) {
    %c0_i32 = arith.constant 0 : i32
    %c0_i32_0 = arith.constant 0 : i32
    %c0_i32_1 = arith.constant 0 : i32
    return %c0_i32, %c0_i32_0 : i32, i32
  }
  func.func @transform_2(%arg0: i32) -> (i32, i32) {
    %c0_i32 = arith.constant 0 : i32
    %c0_i32_0 = arith.constant 0 : i32
    %c0_i32_1 = arith.constant 0 : i32
    return %c0_i32, %c0_i32_0 : i32, i32
  }
  func.func @transform_3(%arg0: i32) -> (i32, i32) {
    %c0_i32 = arith.constant 0 : i32
    %c0_i32_0 = arith.constant 0 : i32
    return %arg0, %c0_i32 : i32, i32
  }
}

</mosaic_0001>

<bundles_post_ra>
// kernel: arcface_forward.5
= control target key start
LH: loop header
LB: loop body
LE: loop exit
PB: predicated region body
PF: predicated region fallthrough
CT: control target
= control target key end

     0   :  { %8 = vsyncpa [#allocation3], 0  ;;  %s1375_s12 = smov 0   ;;  %s1717_s0 = inlined_call_operand.vmem [shape: bf16[512,27], index: 0, kind: input, shape index: {}]   ;;  %s1718_s1 = inlined_call_operand.hbm [shape: bf16[27,128], index: 1, kind: input, shape index: {}]   ;;  %s1719_s2 = inlined_call_operand.vmem [shape: f32[5,128], index: 2, kind: input, shape index: {}]   ;;  %s1720_s3 = inlined_call_operand.vmem [shape: bf16[512,128], index: 3, kind: output, shape index: {}]  }
   0x1 LB: > { %s1007_s13 = sadd.s32 4294967295, %s1349_s12   ;;  %p1009_p0 = scmp.ge.s32.totalorder %s1349_s12, 1  ;;  %s1349_s12 = sphi %s1375_s12, %s14_s12  }
   0x2   : > { %p113_p1 = scmp.lt.s32.totalorder %s1349_s12, 3  ;;  %s1351_s14 = smov [#allocation2]  }
   0x3   : > { %s125_s15 = sshll.u32 %s1351_s14, 4  ;;  %p1389_p3 = scmp.eq.s32.totalorder %s1007_s13, 0  ;;  %s126_s15 = int_to_ptr.vmem [resolvable:$true] %s125_s15 }
   0x4   : > { %p1383_p2 = pnand %p1009_p0, %p113_p1  ;;  %s1311_s21 = scalar_lea.hbm %s1718_s1, 256 }
   0x5   : > { %s1725_s17 = scalar_select %p1389_p3, 1, 0 }
   0x6   : > { %s1724_s16 = scalar_select %p1383_p2, 1, 0 }
   0x7   : > { %p1275_p4 = pneg %p1383_p2  ;;  %p1312_p6 = scmp.ne.s32.totalorder %s1718_s1, %s1311_s21 }
   0x8   : > { %p1318_p10 = scmp.lt.u32.totalorder %s1311_s21, %s1718_s1 }
   0x9   : > { %p1397_p5 = pnand %p1389_p3, %p1275_p4 }
   0xb   : > { %p1313_p7 = pneg %p1397_p5 }
   0xd   : > { %p1314_p8 = pnand %p1313_p7, %p1312_p6 }
   0xf   : > { %p1315_p9 = pneg %p1314_p8 }
  0x11   : > { %p1320_p11 = pnand %p1318_p10, %p1315_p9 }
  0x13   : > { %1323 = shalt.err (!%p1320_p11)
}
  0x14   : > { %s1324_s26 = scalar_lea.vmem %s126_s15, 256  ;;  %p1332_p1 = scmp.lt.s32.totalorder %s126_s15, %s126_s15 }
  0x15   : > { %p1325_p12 = scmp.ne.s32.totalorder %s126_s15, %s1324_s26  ;;  %p1333_p4 = scmp.lt.s32.totalorder %s1324_s26, %s1324_s26 }
  0x17   : > { %p1327_p13 = pnand %p1325_p12, %p1313_p7  ;;  %p1334_p3 = por %p1333_p4, %p1332_p1 }
  0x19   : > { %p1328_p0 = pneg %p1327_p13 }
  0x1b   : > { %p1335_p2 = pnand %p1334_p3, %p1328_p0 }
  0x1d   : > { %1338 = shalt.err (!%p1335_p2)
}
  0x1e   : > { %s1352_s27 = smov 64   ;;  %s1353_s28 = smov 4  }
  0x1f   : > { %1278 = dma.hbm_to_vmem [thread:$0]  (!%p1397_p5), %s1718_s1, 256, %s126_s15, [#allocation3], %s1352_s27, %s1352_s27, %s1353_s28  }
  0x20   : > { %p1727_p6 = scmp.ne.s32.totalorder %s1724_s16, 0 }
  0x21   : > { %p1728_p8 = scmp.ne.s32.totalorder (!%p1727_p6), %s1725_s17, 0 }
  0x22   : > { %153 = sbr.rel (%p1727_p6) target bundleno = 332 (0x14c), region = 32 }
  0x29   : > { %1344 = dma.done.wait (%p1728_p8), [#allocation3], 256  }
  0x2a   : > { %1346 = vsyncadd (%p1728_p8), [#allocation3], 4294967040  ;;  %s1014_s4 = sshll.u32 %s1007_s13, 5  ;;  %vm366_vm0 = vcmask 1044480   ;;  %vm367_vm1 = vcmask 1045504   ;;  %v1354_v0 = vmov 65535   ;;  %v535_v22 = vlaneseq }
  0x2b   : > { %p178_p2 = scmp.lt.s32.totalorder %s1014_s4, 63  ;;  %v368_v1 = vsel %vm366_vm0, 4294967295, %v1354_v0  ;;  %vm317_vm2 = vcmask 220160   ;;  %v1293_v2 = vld [vmem:[#allocation2] sm:$0xff]   ;;  %v1294_v4 = vld [vmem:[#allocation2 + $0x8] sm:$0x3f]  }
  0x2c   : > { %v369_v3 = vsel %vm367_vm1, %v368_v1, 0  ;;  %1231 = vmatprep.subr.bf16.mxu0 %v1293_v2  ;;  %1267 = vmatprep.subr.bf16.mxu1 %v1293_v2  ;;  %v536_v23 = vshrl.u32 %v535_v22, 7  ;;  %v534_v25 = vld [vmem:[%s1719_s2] sm:$0x1f] }
  0x2d   : > { %s1730_s4 = smov (!%p178_p2, %s1014_s4), 63  ;;  %1232 = vmatpush3.bf16.msra.mxu0 %v1293_v2  ;;  %1269 = vmatpush3.bf16.msra.mxu1 %v1293_v2  ;;  %v371_v6 = vand.u32 %v1294_v4, %v369_v3 }
  0x2e   : > { %s1015_s5 = sshll.u32 %s1730_s4, 2  ;;  %v537_v24 = vsub.s32 0, %v536_v23  ;;  %v573_v26 = vsub.s32 1, %v536_v23  ;;  %v641_v28 = vsub.s32 2, %v536_v23  ;;  %v709_v29 = vsub.s32 3, %v536_v23 }
  0x2f   : > { %s1433_s8 = scalar_lea.vmem %s1717_s0, %s1015_s5  ;;  %1233 = vmatprep.subr.bf16.mxu0 %v371_v6  ;;  %1268 = vmatprep.subr.bf16.mxu1 %v371_v6  ;;  %v745_v30 = vsub.s32 4, %v536_v23  ;;  %s1525_s14 = scalar_lea.vmem %s1720_s3, %s1015_s5 }
  0x30   : > { %v1295_v5 = vld [vmem:[%s1433_s8] sm:$0xff]   ;;  %v1297_v8 = vld [vmem:[%s1433_s8 + $0x8] sm:$0xff]   ;;  %v1299_v10 = vld [vmem:[%s1433_s8 + $0x10] sm:$0xff]   ;;  %v1470_v27 = vrot.slane %v534_v25, %v537_v24  ;;  %v1472_v31 = vrot.slane %v534_v25, %v573_v26  ;;  %v1475_v35 = vrot.slane %v534_v25, %v641_v28  ;;  %v1478_v39 = vrot.slane %v534_v25, %v709_v29 }
  0x31   : > { %v1296_v7 = vld [vmem:[%s1433_s8 + $0x40] sm:$0xff]   ;;  %1235 = vmatprep.mubr.msk.bf16.mxu0 %vm317_vm2, %v1295_v5  ;;  %v1298_v9 = vld [vmem:[%s1433_s8 + $0x48] sm:$0xff]   ;;  %1234 = vmatpush3.bf16.msra.mxu0 %v371_v6  ;;  %v1300_v11 = vld [vmem:[%s1433_s8 + $0x50] sm:$0xff]   ;;  %v1480_v40 = vrot.slane %v534_v25, %v745_v30 }
  0x32   : > { %1251 = vmatprep.mubr.msk.bf16.mxu1 %vm317_vm2, %v1296_v7  ;;  %1270 = vmatpush3.bf16.msra.mxu1 %v371_v6  ;;  %v1301_v12 = vld [vmem:[%s1433_s8 + $0x18] sm:$0xff]   ;;  %v1303_v14 = vld [vmem:[%s1433_s8 + $0x20] sm:$0xff]   ;;  %v1305_v16 = vld [vmem:[%s1433_s8 + $0x28] sm:$0xff]  }
  0x33   : > { %v1302_v13 = vld [vmem:[%s1433_s8 + $0x58] sm:$0xff]   ;;  %v1304_v15 = vld [vmem:[%s1433_s8 + $0x60] sm:$0xff]   ;;  %v1306_v17 = vld [vmem:[%s1433_s8 + $0x68] sm:$0xff]  }
  0x34   : > { %1236 = vmatmul.mubr.msk.bf16.vlgmr.msra.gmra.mrb[0].mxu0 %vm317_vm2, %v1297_v8  ;;  %v1307_v18 = vld [vmem:[%s1433_s8 + $0x30] sm:$0xff]   ;;  %v1309_v20 = vld [vmem:[%s1433_s8 + $0x38] sm:$0xff]  }
  0x35   : > { %1252 = vmatmul.mubr.msk.bf16.vlgmr.msra.gmra.mrb[0].mxu1 %vm317_vm2, %v1298_v9  ;;  %1239 = vmatprep.mubr.msk.bf16.mxu0 %vm317_vm2, %v1299_v10  ;;  %v1308_v19 = vld [vmem:[%s1433_s8 + $0x70] sm:$0xff]   ;;  %v1310_v21 = vld [vmem:[%s1433_s8 + $0x78] sm:$0xff]  }
  0x36   : > { %1255 = vmatprep.mubr.msk.bf16.mxu1 %vm317_vm2, %v1300_v11 }
  0x3c   : > { %1240 = vmatmul.mubr.msk.bf16.gmra.mrb[4].mxu0 %vm317_vm2, %v1301_v12 }
  0x3d   : > { %1256 = vmatmul.mubr.msk.bf16.gmra.mrb[4].mxu1 %vm317_vm2, %v1302_v13  ;;  %1243 = vmatprep.mubr.msk.bf16.mxu0 %vm317_vm2, %v1303_v14 }
  0x3e   : > { %1259 = vmatprep.mubr.msk.bf16.mxu1 %vm317_vm2, %v1304_v15 }
  0x44   : > { %1244 = vmatmul.mubr.msk.bf16.gmra.mrb[8].mxu0 %vm317_vm2, %v1305_v16 }
  0x45   : > { %1260 = vmatmul.mubr.msk.bf16.gmra.mrb[8].mxu1 %vm317_vm2, %v1306_v17  ;;  %1247 = vmatprep.mubr.msk.bf16.mxu0 %vm317_vm2, %v1307_v18 }
  0x46   : > { %1263 = vmatprep.mubr.msk.bf16.mxu1 %vm317_vm2, %v1308_v19 }
  0x4c   : > { %1248 = vmatmul.mubr.msk.bf16.gmra.mrb[12].mxu0 %vm317_vm2, %v1309_v20 }
  0x4d   : > { %1264 = vmatmul.mubr.msk.bf16.gmra.mrb[12].mxu1 %vm317_vm2, %v1310_v21 }
 0x107   : > { %v1237_v32 = vpop.f32.mrb[0].mxu0 }
 0x108   : > { %v1253_v33 = vpop.f32.mrb[0].mxu1  ;;  %v541_v34 = vmul.f32 %v1237_v32, %v1470_v27  ;;  %v407_v37 = vpop.f32.mrb[1].mxu0 }
 0x109   : > { %v557_v36 = vmul.f32 %v1253_v33, %v1470_v27  ;;  %v471_v38 = vpop.f32.mrb[1].mxu1  ;;  %v539_v41 = vmul.f32 %v1470_v27, %v407_v37  ;;  %v1238_v43 = vpop.f32.mrb[2].mxu0 }
 0x10a   : > { %v555_v42 = vmul.f32 %v1470_v27, %v471_v38  ;;  %v1254_v44 = vpop.f32.mrb[2].mxu1  ;;  %v577_v45 = vadd.f32 %v1472_v31, %v541_v34  ;;  %v542_v47 = vmul.f32 %v1238_v43, %v1470_v27  ;;  %v410_v49 = vpop.f32.mrb[3].mxu0 }
 0x10b   : > { %v593_v46 = vadd.f32 %v1472_v31, %v557_v36  ;;  %v558_v48 = vmul.f32 %v1254_v44, %v1470_v27  ;;  %v474_v50 = vpop.f32.mrb[3].mxu1  ;;  %v575_v51 = vadd.f32 %v1472_v31, %v539_v41  ;;  %v540_v53 = vmul.f32 %v1470_v27, %v410_v49 }
 0x10c   : > { %v591_v52 = vadd.f32 %v1472_v31, %v555_v42  ;;  %v556_v54 = vmul.f32 %v1470_v27, %v474_v50  ;;  %vm609_vm3 = vcmp.ge.f32.partialorder %v577_v45, 0.0  ;;  %v645_v55 = vmul.f32 %v1475_v35, %v577_v45 }
 0x10d   : > { %vm625_vm4 = vcmp.ge.f32.partialorder %v593_v46, 0.0  ;;  %v661_v56 = vmul.f32 %v1475_v35, %v593_v46  ;;  %vm607_vm5 = vcmp.ge.f32.partialorder %v575_v51, 0.0  ;;  %v643_v57 = vmul.f32 %v1475_v35, %v575_v51 }
 0x10e   : > { %vm623_vm6 = vcmp.ge.f32.partialorder %v591_v52, 0.0  ;;  %v659_v58 = vmul.f32 %v1475_v35, %v591_v52  ;;  %v677_v59 = vsel %vm609_vm3, %v577_v45, %v645_v55  ;;  %v578_v61 = vadd.f32 %v1472_v31, %v542_v47 }
 0x10f   : > { %v693_v60 = vsel %vm625_vm4, %v593_v46, %v661_v56  ;;  %v594_v62 = vadd.f32 %v1472_v31, %v558_v48  ;;  %v713_v63 = vmul.f32 %v1478_v39, %v677_v59  ;;  %v675_v1 = vsel %vm607_vm5, %v575_v51, %v643_v57  ;;  %v1241_v3 = vpop.f32.mrb[4].mxu0 }
 0x110   : > { %v729_v0 = vmul.f32 %v1478_v39, %v693_v60  ;;  %v691_v2 = vsel %vm623_vm6, %v591_v52, %v659_v58  ;;  %v1257_v4 = vpop.f32.mrb[4].mxu1  ;;  %v711_v5 = vmul.f32 %v1478_v39, %v675_v1  ;;  %vm610_vm7 = vcmp.ge.f32.partialorder %v578_v61, 0.0  ;;  %v423_v8 = vpop.f32.mrb[5].mxu0 }
 0x111   : > { %v727_v6 = vmul.f32 %v1478_v39, %v691_v2  ;;  %v646_v7 = vmul.f32 %v1475_v35, %v578_v61  ;;  %v487_v9 = vpop.f32.mrb[5].mxu1  ;;  %v749_v10 = vadd.f32 %v1480_v40, %v713_v63  ;;  %vm626_vm8 = vcmp.ge.f32.partialorder %v594_v62, 0.0  ;;  %v1242_v13 = vpop.f32.mrb[6].mxu0 }
 0x112   : > { %v765_v11 = vadd.f32 %v1480_v40, %v729_v0  ;;  %v662_v12 = vmul.f32 %v1475_v35, %v594_v62  ;;  %v1258_v14 = vpop.f32.mrb[6].mxu1  ;;  %v747_v15 = vadd.f32 %v1480_v40, %v711_v5  ;;  %v576_v18 = vadd.f32 %v1472_v31, %v540_v53  ;;  %v426_v19 = vpop.f32.mrb[7].mxu0 }
 0x113   : > { %v763_v16 = vadd.f32 %v1480_v40, %v727_v6  ;;  %v678_v17 = vsel %vm610_vm7, %v578_v61, %v646_v7  ;;  %v1509_v20 = vpop.f32.mrb[7].mxu1  ;;  %v592_v23 = vadd.f32 %v1472_v31, %v556_v54  ;;  %v545_v24 = vmul.f32 %v1241_v3, %v1470_v27 }
 0x114   : > { %v714_v21 = vmul.f32 %v1478_v39, %v678_v17  ;;  %v694_v22 = vsel %vm626_vm8, %v594_v62, %v662_v12  ;;  %vm608_vm9 = vcmp.ge.f32.partialorder %v576_v18, 0.0  ;;  %v644_v26 = vmul.f32 %v1475_v35, %v576_v18 }
 0x115   : > { %v730_v25 = vmul.f32 %v1478_v39, %v694_v22  ;;  %v561_v28 = vmul.f32 %v1257_v4, %v1470_v27  ;;  %vm624_vm10 = vcmp.ge.f32.partialorder %v592_v23, 0.0  ;;  %v660_v30 = vmul.f32 %v1475_v35, %v592_v23 }
 0x116   : > { %v750_v29 = vadd.f32 %v1480_v40, %v714_v21  ;;  %v581_v32 = vadd.f32 %v1472_v31, %v545_v24  ;;  %v676_v34 = vsel %vm608_vm9, %v576_v18, %v644_v26  ;;  %v543_v37 = vmul.f32 %v1470_v27, %v423_v8 }
 0x117   : > { %v766_v33 = vadd.f32 %v1480_v40, %v730_v25  ;;  %v597_v36 = vadd.f32 %v1472_v31, %v561_v28  ;;  %v712_v41 = vmul.f32 %v1478_v39, %v676_v34  ;;  %v692_v42 = vsel %vm624_vm10, %v592_v23, %v660_v30  ;;  %v1245_v43 = vpop.f32.mrb[8].mxu0 }
 0x118   : > { %v1126_v38 = vpack.c.bf16 %v750_v29, %v749_v10  ;;  %vm613_vm11 = vcmp.ge.f32.partialorder %v581_v32, 0.0  ;;  %v1531_v44 = vpop.f32.mrb[8].mxu1  ;;  %v728_v46 = vmul.f32 %v1478_v39, %v692_v42  ;;  %v649_v47 = vmul.f32 %v1475_v35, %v581_v32  ;;  %v1535_v48 = vpop.f32.mrb[9].mxu0 }
 0x119   : > { %v1166_v45 = vpack.c.bf16 %v766_v33, %v765_v11  ;;  %vm629_vm12 = vcmp.ge.f32.partialorder %v597_v36, 0.0  ;;  %v1537_v49 = vpop.f32.mrb[9].mxu1  ;;  %v748_v50 = vadd.f32 %v1480_v40, %v712_v41  ;;  %v665_v51 = vmul.f32 %v1475_v35, %v597_v36  ;;  %v1544_v54 = vpop.f32.mrb[10].mxu0 }
 0x11a   : > { %1198 = vst [vmem:[%s1525_s14 + $0x8] sm:$0xff] %v1126_v38   ;;  %v579_v52 = vadd.f32 %v1472_v31, %v543_v37  ;;  %v559_v53 = vmul.f32 %v1470_v27, %v487_v9  ;;  %v1546_v55 = vpop.f32.mrb[10].mxu1  ;;  %v764_v56 = vadd.f32 %v1480_v40, %v728_v46  ;;  %v681_v57 = vsel %vm613_vm11, %v581_v32, %v649_v47  ;;  %v1553_v60 = vpop.f32.mrb[11].mxu0 }
 0x11b   : > { %1206 = vst [vmem:[%s1525_s14 + $0x48] sm:$0xff] %v1166_v45   ;;  %v546_v58 = vmul.f32 %v1242_v13, %v1470_v27  ;;  %v562_v59 = vmul.f32 %v1258_v14, %v1470_v27  ;;  %v1555_v61 = vpop.f32.mrb[11].mxu1  ;;  %v1121_v62 = vpack.c.bf16 %v748_v50, %v747_v15  ;;  %v717_v63 = vmul.f32 %v1478_v39, %v681_v57 }
 0x11c   : > { %v697_v0 = vsel %vm629_vm12, %v597_v36, %v665_v51  ;;  %vm611_vm13 = vcmp.ge.f32.partialorder %v579_v52, 0.0  ;;  %v1161_v1 = vpack.c.bf16 %v764_v56, %v763_v16  ;;  %v647_v3 = vmul.f32 %v1475_v35, %v579_v52 }
 0x11d   : > { %v733_v2 = vmul.f32 %v1478_v39, %v697_v0  ;;  %v595_v4 = vadd.f32 %v1472_v31, %v559_v53  ;;  %1122 = vst [vmem:[%s1525_s14] sm:$0xff] %v1121_v62   ;;  %v753_v5 = vadd.f32 %v1480_v40, %v717_v63  ;;  %v582_v6 = vadd.f32 %v1472_v31, %v546_v58 }
 0x11e   : > { %v598_v7 = vadd.f32 %v1472_v31, %v562_v59  ;;  %v544_v8 = vmul.f32 %v1470_v27, %v426_v19  ;;  %1205 = vst [vmem:[%s1525_s14 + $0x40] sm:$0xff] %v1161_v1   ;;  %v679_v10 = vsel %vm611_vm13, %v579_v52, %v647_v3  ;;  %v560_v19 = vmul.f32 %v1470_v27, %v1509_v20 }
 0x11f   : > { %v769_v9 = vadd.f32 %v1480_v40, %v733_v2  ;;  %vm627_vm14 = vcmp.ge.f32.partialorder %v595_v4, 0.0  ;;  %v663_v11 = vmul.f32 %v1475_v35, %v595_v4  ;;  %v715_v12 = vmul.f32 %v1478_v39, %v679_v10  ;;  %v1572_v14 = vpop.f32.mrb[12].mxu0 }
 0x120   : > { %vm614_vm15 = vcmp.ge.f32.partialorder %v582_v6, 0.0  ;;  %v650_v13 = vmul.f32 %v1475_v35, %v582_v6  ;;  %vm630_vm0 = vcmp.ge.f32.partialorder %v598_v7, 0.0  ;;  %v1574_v15 = vpop.f32.mrb[12].mxu1  ;;  %v666_v17 = vmul.f32 %v1475_v35, %v598_v7  ;;  %v1580_v21 = vpop.f32.mrb[13].mxu0 }
 0x121   : > { %v695_v16 = vsel %vm627_vm14, %v595_v4, %v663_v11  ;;  %v580_v18 = vadd.f32 %v1472_v31, %v544_v8  ;;  %v1582_v22 = vpop.f32.mrb[13].mxu1  ;;  %v751_v23 = vadd.f32 %v1480_v40, %v715_v12  ;;  %v549_v26 = vmul.f32 %v1245_v43, %v1470_v27  ;;  %v1587_v28 = vpop.f32.mrb[14].mxu0 }
 0x122   : > { %v731_v24 = vmul.f32 %v1478_v39, %v695_v16  ;;  %v682_v25 = vsel %vm614_vm15, %v582_v6, %v650_v13  ;;  %v1589_v29 = vpop.f32.mrb[14].mxu1  ;;  %v698_v32 = vsel %vm630_vm0, %v598_v7, %v666_v17  ;;  %v1594_v33 = vpop.f32.mrb[15].mxu0  ;;  %v596_v38 = vadd.f32 %v1472_v31, %v560_v19 }
 0x123   : > { %v718_v30 = vmul.f32 %v1478_v39, %v682_v25  ;;  %vm612_vm1 = vcmp.ge.f32.partialorder %v580_v18, 0.0  ;;  %v648_v20 = vmul.f32 %v1475_v35, %v580_v18  ;;  %v1596_v34 = vpop.f32.mrb[15].mxu1  ;;  %v734_v37 = vmul.f32 %v1478_v39, %v698_v32 }
 0x124   : > { %v767_v36 = vadd.f32 %v1480_v40, %v731_v24  ;;  %v585_v41 = vadd.f32 %v1472_v31, %v549_v26  ;;  %v565_v45 = vmul.f32 %v1531_v44, %v1470_v27  ;;  %v547_v46 = vmul.f32 %v1470_v27, %v1535_v48 }
 0x125   : > { %v754_v42 = vadd.f32 %v1480_v40, %v718_v30  ;;  %v680_v43 = vsel %vm612_vm1, %v580_v18, %v648_v20  ;;  %v770_v47 = vadd.f32 %v1480_v40, %v734_v37  ;;  %vm628_vm2 = vcmp.ge.f32.partialorder %v596_v38, 0.0 }
 0x126   : > { %v716_v50 = vmul.f32 %v1478_v39, %v680_v43  ;;  %v664_v51 = vmul.f32 %v1475_v35, %v596_v38  ;;  %vm617_vm3 = vcmp.ge.f32.partialorder %v585_v41, 0.0  ;;  %v653_v53 = vmul.f32 %v1475_v35, %v585_v41 }
 0x127   : > { %v1136_v52 = vpack.c.bf16 %v754_v42, %v753_v5  ;;  %v601_v56 = vadd.f32 %v1472_v31, %v565_v45  ;;  %v1176_v57 = vpack.c.bf16 %v770_v47, %v769_v9  ;;  %v583_v48 = vadd.f32 %v1472_v31, %v547_v46 }
 0x128   : > { %v752_v44 = vadd.f32 %v1480_v40, %v716_v50  ;;  %v696_v58 = vsel %vm628_vm2, %v596_v38, %v664_v51  ;;  %v685_v62 = vsel %vm617_vm3, %v585_v41, %v653_v53  ;;  %v563_v5 = vmul.f32 %v1470_v27, %v1537_v49 }
 0x129   : > { %1200 = vst [vmem:[%s1525_s14 + $0x18] sm:$0xff] %v1136_v52   ;;  %v732_v59 = vmul.f32 %v1478_v39, %v696_v58  ;;  %vm633_vm4 = vcmp.ge.f32.partialorder %v601_v56, 0.0  ;;  %v669_v63 = vmul.f32 %v1475_v35, %v601_v56  ;;  %1208 = vst [vmem:[%s1525_s14 + $0x58] sm:$0xff] %v1176_v57   ;;  %v721_v1 = vmul.f32 %v1478_v39, %v685_v62 }
 0x12a   : > { %v1131_v0 = vpack.c.bf16 %v752_v44, %v751_v23  ;;  %vm615_vm5 = vcmp.ge.f32.partialorder %v583_v48, 0.0  ;;  %v651_v2 = vmul.f32 %v1475_v35, %v583_v48  ;;  %v550_v6 = vmul.f32 %v1544_v54, %v1470_v27 }
 0x12b   : > { %v768_v3 = vadd.f32 %v1480_v40, %v732_v59  ;;  %v701_v4 = vsel %vm633_vm4, %v601_v56, %v669_v63  ;;  %v566_v8 = vmul.f32 %v1546_v55, %v1470_v27  ;;  %v757_v10 = vadd.f32 %v1480_v40, %v721_v1 }
 0x12c   : > { %1199 = vst [vmem:[%s1525_s14 + $0x10] sm:$0xff] %v1131_v0   ;;  %v683_v7 = vsel %vm615_vm5, %v583_v48, %v651_v2  ;;  %v599_v11 = vadd.f32 %v1472_v31, %v563_v5  ;;  %v586_v12 = vadd.f32 %v1472_v31, %v550_v6  ;;  %v737_v13 = vmul.f32 %v1478_v39, %v701_v4 }
 0x12d   : > { %v1171_v9 = vpack.c.bf16 %v768_v3, %v767_v36  ;;  %v602_v16 = vadd.f32 %v1472_v31, %v566_v8  ;;  %v548_v49 = vmul.f32 %v1470_v27, %v1553_v60  ;;  %v564_v54 = vmul.f32 %v1470_v27, %v1555_v61 }
 0x12e   : > { %v719_v55 = vmul.f32 %v1478_v39, %v683_v7  ;;  %vm631_vm6 = vcmp.ge.f32.partialorder %v599_v11, 0.0  ;;  %v667_v17 = vmul.f32 %v1475_v35, %v599_v11  ;;  %vm618_vm7 = vcmp.ge.f32.partialorder %v586_v12, 0.0 }
 0x12f   : > { %1207 = vst [vmem:[%s1525_s14 + $0x50] sm:$0xff] %v1171_v9   ;;  %v654_v18 = vmul.f32 %v1475_v35, %v586_v12  ;;  %vm634_vm8 = vcmp.ge.f32.partialorder %v602_v16, 0.0  ;;  %v670_v19 = vmul.f32 %v1475_v35, %v602_v16  ;;  %v584_v23 = vadd.f32 %v1472_v31, %v548_v49 }
 0x130   : > { %v699_v24 = vsel %vm631_vm6, %v599_v11, %v667_v17  ;;  %v600_v60 = vadd.f32 %v1472_v31, %v564_v54  ;;  %v553_v61 = vmul.f32 %v1572_v14, %v1470_v27  ;;  %v569_v25 = vmul.f32 %v1574_v15, %v1470_v27 }
 0x131   : > { %v773_v26 = vadd.f32 %v1480_v40, %v737_v13  ;;  %v686_v30 = vsel %vm618_vm7, %v586_v12, %v654_v18  ;;  %v702_v32 = vsel %vm634_vm8, %v602_v16, %v670_v19  ;;  %vm616_vm9 = vcmp.ge.f32.partialorder %v584_v23, 0.0 }
 0x132   : > { %v722_v20 = vmul.f32 %v1478_v39, %v686_v30  ;;  %v738_v36 = vmul.f32 %v1478_v39, %v702_v32  ;;  %v652_v37 = vmul.f32 %v1475_v35, %v584_v23  ;;  %vm632_vm10 = vcmp.ge.f32.partialorder %v600_v60, 0.0 }
 0x133   : > { %v735_v38 = vmul.f32 %v1478_v39, %v699_v24  ;;  %v668_v41 = vmul.f32 %v1475_v35, %v600_v60  ;;  %v589_v14 = vadd.f32 %v1472_v31, %v553_v61  ;;  %v605_v15 = vadd.f32 %v1472_v31, %v569_v25 }
 0x134   : > { %v758_v42 = vadd.f32 %v1480_v40, %v722_v20  ;;  %v774_v43 = vadd.f32 %v1480_v40, %v738_v36  ;;  %v684_v45 = vsel %vm616_vm9, %v584_v23, %v652_v37  ;;  %v551_v46 = vmul.f32 %v1470_v27, %v1580_v21 }
 0x135   : > { %v720_v47 = vmul.f32 %v1478_v39, %v684_v45  ;;  %v700_v50 = vsel %vm632_vm10, %v600_v60, %v668_v41  ;;  %v657_v51 = vmul.f32 %v1475_v35, %v589_v14  ;;  %vm621_vm11 = vcmp.ge.f32.partialorder %v589_v14, 0.0 }
 0x136   : > { %v1146_v52 = vpack.c.bf16 %v758_v42, %v757_v10  ;;  %v1186_v53 = vpack.c.bf16 %v774_v43, %v773_v26  ;;  %v736_v56 = vmul.f32 %v1478_v39, %v700_v50  ;;  %v755_v57 = vadd.f32 %v1480_v40, %v719_v55 }
 0x137   : > { %v771_v44 = vadd.f32 %v1480_v40, %v735_v38  ;;  %v756_v58 = vadd.f32 %v1480_v40, %v720_v47  ;;  %v587_v48 = vadd.f32 %v1472_v31, %v551_v46  ;;  %v673_v59 = vmul.f32 %v1475_v35, %v605_v15 }
 0x138   : > { %1202 = vst [vmem:[%s1525_s14 + $0x28] sm:$0xff] %v1146_v52   ;;  %1210 = vst [vmem:[%s1525_s14 + $0x68] sm:$0xff] %v1186_v53   ;;  %v772_v21 = vadd.f32 %v1480_v40, %v736_v56  ;;  %v567_v62 = vmul.f32 %v1470_v27, %v1582_v22  ;;  %v554_v63 = vmul.f32 %v1587_v28, %v1470_v27  ;;  %vm637_vm12 = vcmp.ge.f32.partialorder %v605_v15, 0.0 }
 0x139   : > { %v1141_v0 = vpack.c.bf16 %v756_v58, %v755_v57  ;;  %v689_v1 = vsel %vm621_vm11, %v589_v14, %v657_v51  ;;  %v655_v3 = vmul.f32 %v1475_v35, %v587_v48  ;;  %vm619_vm13 = vcmp.ge.f32.partialorder %v587_v48, 0.0 }
 0x13a   : > { %v1181_v2 = vpack.c.bf16 %v772_v21, %v771_v44  ;;  %v603_v4 = vadd.f32 %v1472_v31, %v567_v62  ;;  %v590_v5 = vadd.f32 %v1472_v31, %v554_v63  ;;  %v570_v6 = vmul.f32 %v1589_v29, %v1470_v27 }
 0x13b   : > { %1201 = vst [vmem:[%s1525_s14 + $0x20] sm:$0xff] %v1141_v0   ;;  %v552_v22 = vmul.f32 %v1470_v27, %v1594_v33  ;;  %v725_v28 = vmul.f32 %v1478_v39, %v689_v1  ;;  %v705_v7 = vsel %vm637_vm12, %v605_v15, %v673_v59  ;;  %v687_v12 = vsel %vm619_vm13, %v587_v48, %v655_v3 }
 0x13c   : > { %1209 = vst [vmem:[%s1525_s14 + $0x60] sm:$0xff] %v1181_v2   ;;  %v671_v8 = vmul.f32 %v1475_v35, %v603_v4  ;;  %vm622_vm14 = vcmp.ge.f32.partialorder %v590_v5, 0.0  ;;  %v658_v9 = vmul.f32 %v1475_v35, %v590_v5  ;;  %v606_v10 = vadd.f32 %v1472_v31, %v570_v6 }
 0x13d   : > { %v588_v11 = vadd.f32 %v1472_v31, %v552_v22  ;;  %vm635_vm15 = vcmp.ge.f32.partialorder %v603_v4, 0.0  ;;  %v568_v29 = vmul.f32 %v1470_v27, %v1596_v34  ;;  %v741_v33 = vmul.f32 %v1478_v39, %v705_v7 }
 0x13e   : > { %v690_v13 = vsel %vm622_vm14, %v590_v5, %v658_v9  ;;  %vm638_vm0 = vcmp.ge.f32.partialorder %v606_v10, 0.0  ;;  %v674_v16 = vmul.f32 %v1475_v35, %v606_v10  ;;  %v761_v17 = vadd.f32 %v1480_v40, %v725_v28 }
 0x13f   : > { %v726_v49 = vmul.f32 %v1478_v39, %v690_v13  ;;  %vm620_vm1 = vcmp.ge.f32.partialorder %v588_v11, 0.0  ;;  %v656_v54 = vmul.f32 %v1475_v35, %v588_v11  ;;  %v604_v55 = vadd.f32 %v1472_v31, %v568_v29 }
 0x140   : > { %v723_v18 = vmul.f32 %v1478_v39, %v687_v12  ;;  %v703_v19 = vsel %vm635_vm15, %v603_v4, %v671_v8  ;;  %v706_v27 = vsel %vm638_vm0, %v606_v10, %v674_v16  ;;  %v777_v31 = vadd.f32 %v1480_v40, %v741_v33 }
 0x141   : > { %v762_v34 = vadd.f32 %v1480_v40, %v726_v49  ;;  %v742_v23 = vmul.f32 %v1478_v39, %v706_v27  ;;  %v688_v24 = vsel %vm620_vm1, %v588_v11, %v656_v54  ;;  %vm636_vm2 = vcmp.ge.f32.partialorder %v604_v55, 0.0 }
 0x142   : > { %v724_v60 = vmul.f32 %v1478_v39, %v688_v24  ;;  %v672_v61 = vmul.f32 %v1475_v35, %v604_v55  ;;  %v739_v25 = vmul.f32 %v1478_v39, %v703_v19  ;;  %v759_v32 = vadd.f32 %v1480_v40, %v723_v18 }
 0x143   : > { %v1156_v26 = vpack.c.bf16 %v762_v34, %v761_v17  ;;  %v778_v30 = vadd.f32 %v1480_v40, %v742_v23 }
 0x144   : > { %v760_v20 = vadd.f32 %v1480_v40, %v724_v60  ;;  %v704_v36 = vsel %vm636_vm2, %v604_v55, %v672_v61  ;;  %v775_v35 = vadd.f32 %v1480_v40, %v739_v25 }
 0x145   : > { %1204 = vst [vmem:[%s1525_s14 + $0x38] sm:$0xff] %v1156_v26   ;;  %v1196_v37 = vpack.c.bf16 %v778_v30, %v777_v31  ;;  %v740_v38 = vmul.f32 %v1478_v39, %v704_v36 }
 0x146   : > { %v1151_v41 = vpack.c.bf16 %v760_v20, %v759_v32 }
 0x147   : > { %1212 = vst [vmem:[%s1525_s14 + $0x78] sm:$0xff] %v1196_v37   ;;  %v776_v14 = vadd.f32 %v1480_v40, %v740_v38 }
 0x148   : > { %1203 = vst [vmem:[%s1525_s14 + $0x30] sm:$0xff] %v1151_v41  }
 0x149   : > { %v1191_v15 = vpack.c.bf16 %v776_v14, %v775_v35 }
 0x14b   : > { %1211 = vst [vmem:[%s1525_s14 + $0x70] sm:$0xff] %v1191_v15  }
 0x14c PF: > { %s14_s12 = sadd.s32 1, %s1349_s12  }
 0x14d   : > { %p11_p3 = scmp.ge.s32.totalorder %s14_s12, 4  }
 0x14f   :  { %13 = sbr.rel (!%p11_p3) target bundleno = 1 (0x1), region = 67 }
 0x156   :  { %961 = vsyncpa [#allocation3], 1 }
 0x157   :  { %963 = vsyncpa [#allocation3 + $0x1], 1 }

// kernel: arcface_forward.7
= control target key start
LH: loop header
LB: loop body
LE: loop exit
PB: predicated region body
PF: predicated region fallthrough
CT: control target
= control target key end

     0   :  { %s1367_s12 = smov 0   ;;  %s1588_s0 = inlined_call_operand.vmem [shape: bf16[512,144], index: 0, kind: input, shape index: {}]   ;;  %s1589_s1 = inlined_call_operand.vmem [shape: bf16[144,128], index: 1, kind: input, shape index: {}]   ;;  %s1590_s2 = inlined_call_operand.vmem [shape: f32[3,128], index: 2, kind: input, shape index: {}]   ;;  %s1591_s3 = inlined_call_operand.vmem [shape: bf16[512,128], index: 3, kind: output, shape index: {}]  }
   0x1 LB: > { %s1025_s13 = sadd.s32 4294967295, %s1344_s12   ;;  %p1029_p0 = scmp.ge.s32.totalorder %s1344_s12, 1  ;;  %s1344_s12 = sphi %s1367_s12, %s13_s12  }
   0x2   : > { %p139_p1 = scmp.lt.s32.totalorder %s1344_s12, 3 }
   0x4   : > { %p140_p2 = pnand %p1029_p0, %p139_p1 }
   0x5   : > { %v1281_v0 = vld [vmem:[%s1589_s1] sm:$0xff] (!%p140_p2)   ;;  %v1346_v1 = vmov (!%p140_p2), 0   ;;  %s1030_s16 = sshll.u32 (!%p140_p2), %s1025_s13, 5  ;;  %v1282_v2 = vld [vmem:[%s1589_s1 + $0x8] sm:$0xff] (!%p140_p2)   ;;  %v1283_v3 = vld [vmem:[%s1589_s1 + $0x10] sm:$0xff] (!%p140_p2)   ;;  %vm426_vm0 = vcmask (!%p140_p2), 130048   ;;  %v637_v42 = vlaneseq (!%p140_p2) }
   0x6   : > { %143 = sbr.rel (%p140_p2) target bundleno = 322 (0x142), region = 32  ;;  %475 = vmatprep.subr.bf16.mxu0 (!%p140_p2), %v1346_v1  ;;  %1254 = vmatprep.subr.bf16.mxu1 (!%p140_p2), %v1346_v1  ;;  %p165_p3 = scmp.lt.s32.totalorder (!%p140_p2), %s1030_s16, 63  ;;  %v1284_v4 = vld [vmem:[%s1589_s1 + $0x18] sm:$0xff] (!%p140_p2)   ;;  %v1285_v7 = vld [vmem:[%s1589_s1 + $0x20] sm:$0xff] (!%p140_p2)   ;;  %v1286_v8 = vld [vmem:[%s1589_s1 + $0x28] sm:$0xff] (!%p140_p2)  }
   0x7   : > { %476 = vmatpush1.bf16.msra.mxu0 (!%p140_p2), %v1281_v0  ;;  %1263 = vmatpush1.bf16.msra.mxu1 (!%p140_p2), %v1281_v0  ;;  %v1287_v9 = vld [vmem:[%s1589_s1 + $0x30] sm:$0xff] (!%p140_p2)   ;;  %v1288_v10 = vld [vmem:[%s1589_s1 + $0x38] sm:$0xff] (!%p140_p2)   ;;  %v1289_v11 = vld [vmem:[%s1589_s1 + $0x40] sm:$0xff] (!%p140_p2)   ;;  %v638_v43 = vshrl.u32 (!%p140_p2), %v637_v42, 7 }
   0x8   : > { %477 = vmatprep.subr.bf16.mxu0 (!%p140_p2), %v1346_v1  ;;  %1255 = vmatprep.subr.bf16.mxu1 (!%p140_p2), %v1346_v1  ;;  %v636_v45 = vld [vmem:[%s1590_s2] sm:$0x7] (!%p140_p2) }
   0x9   : > { %v639_v44 = vsub.s32 (!%p140_p2), 0, %v638_v43  ;;  %v675_v46 = vsub.s32 (!%p140_p2), 1, %v638_v43  ;;  %v743_v48 = vsub.s32 (!%p140_p2), 2, %v638_v43 }
   0xb   : > { %478 = vmatpush1.bf16.msra.mxu0 (!%p140_p2), %v1282_v2  ;;  %1264 = vmatpush1.bf16.msra.mxu1 (!%p140_p2), %v1282_v2  ;;  %v1461_v47 = vrot.slane (!%p140_p2), %v636_v45, %v639_v44  ;;  %v1463_v49 = vrot.slane (!%p140_p2), %v636_v45, %v675_v46  ;;  %v1467_v56 = vrot.slane (!%p140_p2), %v636_v45, %v743_v48 }
   0xc   : > { %479 = vmatprep.subr.bf16.mxu0 (!%p140_p2), %v1346_v1  ;;  %1256 = vmatprep.subr.bf16.mxu1 (!%p140_p2), %v1346_v1 }
   0xd   : > { %s1593_s16 = smov (!%p165_p3, %s1030_s16), 63 }
   0xe   : > { %s1126_s21 = sshll.u32 %s1593_s16, 3  ;;  %s1034_s13 = sshll.u32 %s1593_s16, 2 }
   0xf   : > { %s1390_s24 = scalar_lea.vmem %s1588_s0, %s1126_s21  ;;  %480 = vmatpush1.bf16.msra.mxu0 %v1283_v3  ;;  %1265 = vmatpush1.bf16.msra.mxu1 %v1283_v3  ;;  %s1485_s16 = scalar_lea.vmem %s1591_s3, %s1034_s13 }
  0x10   : > { %v1292_v5 = vld [vmem:[%s1390_s24 + $0x4] ss:$8 sps:$4 sm:$0xff]   ;;  %481 = vmatprep.subr.bf16.mxu0 %v1346_v1  ;;  %1257 = vmatprep.subr.bf16.mxu1 %v1346_v1  ;;  %v1290_v12 = vld [vmem:[%s1390_s24] ss:$8 sps:$4 sm:$0xff]   ;;  %v1296_v14 = vld [vmem:[%s1390_s24 + $0x14] ss:$8 sps:$4 sm:$0xff]  }
  0x11   : > { %v1295_v6 = vld [vmem:[%s1390_s24 + $0x84] ss:$8 sps:$4 sm:$0xff]   ;;  %1076 = vmatprep.mubr.msk.bf16.mxu0 %vm426_vm0, %v1292_v5  ;;  %v1293_v13 = vld [vmem:[%s1390_s24 + $0x80] ss:$8 sps:$4 sm:$0xff]   ;;  %v1298_v15 = vld [vmem:[%s1390_s24 + $0x94] ss:$8 sps:$4 sm:$0xff]  }
  0x12   : > { %1084 = vmatprep.mubr.msk.bf16.mxu1 %vm426_vm0, %v1295_v6  ;;  %v1300_v16 = vld [vmem:[%s1390_s24 + $0x10] ss:$8 sps:$4 sm:$0xff]   ;;  %v1302_v18 = vld [vmem:[%s1390_s24 + $0x24] ss:$8 sps:$4 sm:$0xff]   ;;  %v1306_v20 = vld [vmem:[%s1390_s24 + $0x20] ss:$8 sps:$4 sm:$0xff]  }
  0x13   : > { %482 = vmatpush1.bf16.msra.mxu0 %v1284_v4  ;;  %1266 = vmatpush1.bf16.msra.mxu1 %v1284_v4  ;;  %v1301_v17 = vld [vmem:[%s1390_s24 + $0x90] ss:$8 sps:$4 sm:$0xff]   ;;  %v1304_v19 = vld [vmem:[%s1390_s24 + $0xa4] ss:$8 sps:$4 sm:$0xff]   ;;  %v1307_v21 = vld [vmem:[%s1390_s24 + $0xa0] ss:$8 sps:$4 sm:$0xff]  }
  0x14   : > { %483 = vmatprep.subr.bf16.mxu0 %v1346_v1  ;;  %1258 = vmatprep.subr.bf16.mxu1 %v1346_v1  ;;  %v1308_v22 = vld [vmem:[%s1390_s24 + $0x34] ss:$8 sps:$4 sm:$0xff]   ;;  %v1312_v24 = vld [vmem:[%s1390_s24 + $0x30] ss:$8 sps:$4 sm:$0xff]   ;;  %v1314_v26 = vld [vmem:[%s1390_s24 + $0x44] ss:$8 sps:$4 sm:$0xff]  }
  0x15   : > { %v1310_v23 = vld [vmem:[%s1390_s24 + $0xb4] ss:$8 sps:$4 sm:$0xff]   ;;  %v1313_v25 = vld [vmem:[%s1390_s24 + $0xb0] ss:$8 sps:$4 sm:$0xff]   ;;  %v1316_v27 = vld [vmem:[%s1390_s24 + $0xc4] ss:$8 sps:$4 sm:$0xff]  }
  0x16   : > { %v1318_v28 = vld [vmem:[%s1390_s24 + $0x40] ss:$8 sps:$4 sm:$0xff]   ;;  %v1320_v30 = vld [vmem:[%s1390_s24 + $0x54] ss:$8 sps:$4 sm:$0xff]   ;;  %v1324_v32 = vld [vmem:[%s1390_s24 + $0x50] ss:$8 sps:$4 sm:$0xff]  }
  0x17   : > { %484 = vmatpush1.bf16.msra.mxu0 %v1285_v7  ;;  %1267 = vmatpush1.bf16.msra.mxu1 %v1285_v7  ;;  %v1319_v29 = vld [vmem:[%s1390_s24 + $0xc0] ss:$8 sps:$4 sm:$0xff]   ;;  %v1322_v31 = vld [vmem:[%s1390_s24 + $0xd4] ss:$8 sps:$4 sm:$0xff]   ;;  %v1325_v33 = vld [vmem:[%s1390_s24 + $0xd0] ss:$8 sps:$4 sm:$0xff]  }
  0x18   : > { %485 = vmatprep.subr.bf16.mxu0 %v1346_v1  ;;  %1259 = vmatprep.subr.bf16.mxu1 %v1346_v1  ;;  %v1326_v34 = vld [vmem:[%s1390_s24 + $0x64] ss:$8 sps:$4 sm:$0xff]   ;;  %v1330_v36 = vld [vmem:[%s1390_s24 + $0x60] ss:$8 sps:$4 sm:$0xff]   ;;  %v1332_v38 = vld [vmem:[%s1390_s24 + $0x74] ss:$8 sps:$4 sm:$0xff]  }
  0x19   : > { %v1328_v35 = vld [vmem:[%s1390_s24 + $0xe4] ss:$8 sps:$4 sm:$0xff]   ;;  %v1331_v37 = vld [vmem:[%s1390_s24 + $0xe0] ss:$8 sps:$4 sm:$0xff]   ;;  %v1334_v39 = vld [vmem:[%s1390_s24 + $0xf4] ss:$8 sps:$4 sm:$0xff]  }
  0x1a   : > { %v1336_v40 = vld [vmem:[%s1390_s24 + $0x70] ss:$8 sps:$4 sm:$0xff]  }
  0x1b   : > { %486 = vmatpush1.bf16.msra.mxu0 %v1286_v8  ;;  %1268 = vmatpush1.bf16.msra.mxu1 %v1286_v8  ;;  %v1337_v41 = vld [vmem:[%s1390_s24 + $0xf0] ss:$8 sps:$4 sm:$0xff]  }
  0x1c   : > { %487 = vmatprep.subr.bf16.mxu0 %v1346_v1  ;;  %1260 = vmatprep.subr.bf16.mxu1 %v1346_v1 }
  0x1f   : > { %488 = vmatpush1.bf16.msra.mxu0 %v1287_v9  ;;  %1269 = vmatpush1.bf16.msra.mxu1 %v1287_v9 }
  0x20   : > { %489 = vmatprep.subr.bf16.mxu0 %v1346_v1  ;;  %1261 = vmatprep.subr.bf16.mxu1 %v1346_v1 }
  0x23   : > { %490 = vmatpush1.bf16.msra.mxu0 %v1288_v10  ;;  %1270 = vmatpush1.bf16.msra.mxu1 %v1288_v10 }
  0x24   : > { %491 = vmatprep.subr.bf16.mxu0 %v1346_v1  ;;  %1262 = vmatprep.subr.bf16.mxu1 %v1346_v1 }
  0x27   : > { %492 = vmatpush1.bf16.msra.mxu0 %v1289_v11  ;;  %1271 = vmatpush1.bf16.msra.mxu1 %v1289_v11 }
  0x2a   : > { %508 = vmatmul.mubr.bf16.vlgmr.msra.gmra.mrb[0].mxu0 %v1290_v12  ;;  %572 = vmatmul.mubr.bf16.vlgmr.msra.gmra.mrb[0].mxu1 %v1293_v13 }
  0x2b   : > { %1077 = vmatprep.mubr.msk.bf16.mxu0 %vm426_vm0, %v1296_v14  ;;  %1085 = vmatprep.mubr.msk.bf16.mxu1 %vm426_vm0, %v1298_v15 }
  0x32   : > { %516 = vmatmul.mubr.bf16.gmra.mrb[4].mxu0 %v1300_v16  ;;  %580 = vmatmul.mubr.bf16.gmra.mrb[4].mxu1 %v1301_v17 }
  0x33   : > { %1078 = vmatprep.mubr.msk.bf16.mxu0 %vm426_vm0, %v1302_v18  ;;  %1086 = vmatprep.mubr.msk.bf16.mxu1 %vm426_vm0, %v1304_v19 }
  0x3a   : > { %524 = vmatmul.mubr.bf16.gmra.mrb[8].mxu0 %v1306_v20  ;;  %588 = vmatmul.mubr.bf16.gmra.mrb[8].mxu1 %v1307_v21 }
  0x3b   : > { %1079 = vmatprep.mubr.msk.bf16.mxu0 %vm426_vm0, %v1308_v22  ;;  %1087 = vmatprep.mubr.msk.bf16.mxu1 %vm426_vm0, %v1310_v23 }
  0x42   : > { %532 = vmatmul.mubr.bf16.gmra.mrb[12].mxu0 %v1312_v24  ;;  %596 = vmatmul.mubr.bf16.gmra.mrb[12].mxu1 %v1313_v25 }
  0x43   : > { %1080 = vmatprep.mubr.msk.bf16.mxu0 %vm426_vm0, %v1314_v26  ;;  %1088 = vmatprep.mubr.msk.bf16.mxu1 %vm426_vm0, %v1316_v27 }
  0x4a   : > { %540 = vmatmul.mubr.bf16.gmra.mrb[16].mxu0 %v1318_v28  ;;  %604 = vmatmul.mubr.bf16.gmra.mrb[16].mxu1 %v1319_v29 }
  0x4b   : > { %1081 = vmatprep.mubr.msk.bf16.mxu0 %vm426_vm0, %v1320_v30  ;;  %1089 = vmatprep.mubr.msk.bf16.mxu1 %vm426_vm0, %v1322_v31 }
  0x52   : > { %548 = vmatmul.mubr.bf16.gmra.mrb[20].mxu0 %v1324_v32  ;;  %612 = vmatmul.mubr.bf16.gmra.mrb[20].mxu1 %v1325_v33 }
  0x53   : > { %1082 = vmatprep.mubr.msk.bf16.mxu0 %vm426_vm0, %v1326_v34  ;;  %1090 = vmatprep.mubr.msk.bf16.mxu1 %vm426_vm0, %v1328_v35 }
  0x5a   : > { %556 = vmatmul.mubr.bf16.gmra.mrb[24].mxu0 %v1330_v36  ;;  %620 = vmatmul.mubr.bf16.gmra.mrb[24].mxu1 %v1331_v37 }
  0x5b   : > { %1083 = vmatprep.mubr.msk.bf16.mxu0 %vm426_vm0, %v1332_v38  ;;  %1091 = vmatprep.mubr.msk.bf16.mxu1 %vm426_vm0, %v1334_v39 }
  0x62   : > { %564 = vmatmul.mubr.bf16.gmra.mrb[28].mxu0 %v1336_v40  ;;  %628 = vmatmul.mubr.bf16.gmra.mrb[28].mxu1 %v1337_v41 }
  0xfd   : > { %v509_v50 = vpop.f32.mrb[0].mxu0  ;;  %v573_v51 = vpop.f32.mrb[0].mxu1 }
  0xfe   : > { %v641_v52 = vmul.f32 %v1461_v47, %v509_v50  ;;  %v657_v53 = vmul.f32 %v1461_v47, %v573_v51  ;;  %v511_v54 = vpop.f32.mrb[1].mxu0  ;;  %v575_v55 = vpop.f32.mrb[1].mxu1 }
  0xff   : > { %v512_v57 = vpop.f32.mrb[2].mxu0  ;;  %v576_v58 = vpop.f32.mrb[2].mxu1 }
 0x100   : > { %v677_v59 = vadd.f32 %v1463_v49, %v641_v52  ;;  %v693_v60 = vadd.f32 %v1463_v49, %v657_v53  ;;  %v642_v61 = vmul.f32 %v1461_v47, %v512_v57  ;;  %v658_v62 = vmul.f32 %v1461_v47, %v576_v58  ;;  %v514_v63 = vpop.f32.mrb[3].mxu0  ;;  %v578_v0 = vpop.f32.mrb[3].mxu1 }
 0x102   : > { %v745_v1 = vmul.f32 %v1467_v56, %v677_v59  ;;  %v761_v2 = vmul.f32 %v1467_v56, %v693_v60  ;;  %v678_v3 = vadd.f32 %v1463_v49, %v642_v61  ;;  %v694_v4 = vadd.f32 %v1463_v49, %v658_v62 }
 0x103   : > { %vm709_vm1 = vcmp.ge.f32.partialorder %v677_v59, 0.0  ;;  %vm725_vm2 = vcmp.ge.f32.partialorder %v693_v60, 0.0 }
 0x104   : > { %vm710_vm3 = vcmp.ge.f32.partialorder %v678_v3, 0.0  ;;  %v746_v5 = vmul.f32 %v1467_v56, %v678_v3  ;;  %vm726_vm4 = vcmp.ge.f32.partialorder %v694_v4, 0.0  ;;  %v762_v6 = vmul.f32 %v1467_v56, %v694_v4 }
 0x105   : > { %v517_v7 = vpop.f32.mrb[4].mxu0  ;;  %v581_v8 = vpop.f32.mrb[4].mxu1  ;;  %v777_v13 = vsel %vm709_vm1, %v677_v59, %v745_v1  ;;  %v793_v14 = vsel %vm725_vm2, %v693_v60, %v761_v2 }
 0x106   : > { %v643_v9 = vmul.f32 %v1461_v47, %v517_v7  ;;  %v659_v10 = vmul.f32 %v1461_v47, %v581_v8  ;;  %v519_v11 = vpop.f32.mrb[5].mxu0  ;;  %v583_v12 = vpop.f32.mrb[5].mxu1  ;;  %v778_v15 = vsel %vm710_vm3, %v678_v3, %v746_v5  ;;  %v794_v16 = vsel %vm726_vm4, %v694_v4, %v762_v6 }
 0x107   : > { %v520_v17 = vpop.f32.mrb[6].mxu0  ;;  %v584_v18 = vpop.f32.mrb[6].mxu1  ;;  %v1162_v19 = vpack.c.bf16 %v778_v15, %v777_v13  ;;  %v1202_v20 = vpack.c.bf16 %v794_v16, %v793_v14 }
 0x108   : > { %v679_v21 = vadd.f32 %v1463_v49, %v643_v9  ;;  %v695_v22 = vadd.f32 %v1463_v49, %v659_v10  ;;  %v522_v23 = vpop.f32.mrb[7].mxu0  ;;  %v586_v24 = vpop.f32.mrb[7].mxu1  ;;  %v644_v25 = vmul.f32 %v1461_v47, %v520_v17  ;;  %v660_v26 = vmul.f32 %v1461_v47, %v584_v18 }
 0x109   : > { %1163 = vst [vmem:[%s1485_s16] sm:$0xff] %v1162_v19   ;;  %1246 = vst [vmem:[%s1485_s16 + $0x40] sm:$0xff] %v1202_v20  }
 0x10a   : > { %v747_v27 = vmul.f32 %v1467_v56, %v679_v21  ;;  %v763_v28 = vmul.f32 %v1467_v56, %v695_v22  ;;  %v680_v29 = vadd.f32 %v1463_v49, %v644_v25  ;;  %v696_v30 = vadd.f32 %v1463_v49, %v660_v26 }
 0x10b   : > { %vm711_vm5 = vcmp.ge.f32.partialorder %v679_v21, 0.0  ;;  %vm727_vm6 = vcmp.ge.f32.partialorder %v695_v22, 0.0 }
 0x10c   : > { %vm712_vm7 = vcmp.ge.f32.partialorder %v680_v29, 0.0  ;;  %v748_v31 = vmul.f32 %v1467_v56, %v680_v29  ;;  %vm728_vm8 = vcmp.ge.f32.partialorder %v696_v30, 0.0  ;;  %v764_v32 = vmul.f32 %v1467_v56, %v696_v30 }
 0x10d   : > { %v525_v33 = vpop.f32.mrb[8].mxu0  ;;  %v589_v34 = vpop.f32.mrb[8].mxu1  ;;  %v779_v39 = vsel %vm711_vm5, %v679_v21, %v747_v27  ;;  %v795_v40 = vsel %vm727_vm6, %v695_v22, %v763_v28 }
 0x10e   : > { %v645_v35 = vmul.f32 %v1461_v47, %v525_v33  ;;  %v661_v36 = vmul.f32 %v1461_v47, %v589_v34  ;;  %v527_v37 = vpop.f32.mrb[9].mxu0  ;;  %v591_v38 = vpop.f32.mrb[9].mxu1  ;;  %v780_v41 = vsel %vm712_vm7, %v680_v29, %v748_v31  ;;  %v796_v42 = vsel %vm728_vm8, %v696_v30, %v764_v32 }
 0x10f   : > { %v528_v43 = vpop.f32.mrb[10].mxu0  ;;  %v592_v44 = vpop.f32.mrb[10].mxu1  ;;  %v1167_v45 = vpack.c.bf16 %v780_v41, %v779_v39  ;;  %v1207_v46 = vpack.c.bf16 %v796_v42, %v795_v40 }
 0x110   : > { %v681_v48 = vadd.f32 %v1463_v49, %v645_v35  ;;  %v697_v50 = vadd.f32 %v1463_v49, %v661_v36  ;;  %v530_v51 = vpop.f32.mrb[11].mxu0  ;;  %v594_v52 = vpop.f32.mrb[11].mxu1  ;;  %v646_v53 = vmul.f32 %v1461_v47, %v528_v43  ;;  %v662_v54 = vmul.f32 %v1461_v47, %v592_v44 }
 0x111   : > { %1239 = vst [vmem:[%s1485_s16 + $0x8] sm:$0xff] %v1167_v45   ;;  %1247 = vst [vmem:[%s1485_s16 + $0x48] sm:$0xff] %v1207_v46  }
 0x112   : > { %v749_v55 = vmul.f32 %v1467_v56, %v681_v48  ;;  %v765_v57 = vmul.f32 %v1467_v56, %v697_v50  ;;  %v682_v58 = vadd.f32 %v1463_v49, %v646_v53  ;;  %v698_v59 = vadd.f32 %v1463_v49, %v662_v54 }
 0x113   : > { %vm713_vm9 = vcmp.ge.f32.partialorder %v681_v48, 0.0  ;;  %vm729_vm10 = vcmp.ge.f32.partialorder %v697_v50, 0.0 }
 0x114   : > { %vm714_vm11 = vcmp.ge.f32.partialorder %v682_v58, 0.0  ;;  %v750_v60 = vmul.f32 %v1467_v56, %v682_v58  ;;  %vm730_vm12 = vcmp.ge.f32.partialorder %v698_v59, 0.0  ;;  %v766_v61 = vmul.f32 %v1467_v56, %v698_v59 }
 0x115   : > { %v533_v62 = vpop.f32.mrb[12].mxu0  ;;  %v597_v63 = vpop.f32.mrb[12].mxu1  ;;  %v781_v4 = vsel %vm713_vm9, %v681_v48, %v749_v55  ;;  %v797_v5 = vsel %vm729_vm10, %v697_v50, %v765_v57 }
 0x116   : > { %v647_v0 = vmul.f32 %v1461_v47, %v533_v62  ;;  %v663_v1 = vmul.f32 %v1461_v47, %v597_v63  ;;  %v535_v2 = vpop.f32.mrb[13].mxu0  ;;  %v599_v3 = vpop.f32.mrb[13].mxu1  ;;  %v782_v6 = vsel %vm714_vm11, %v682_v58, %v750_v60  ;;  %v798_v7 = vsel %vm730_vm12, %v698_v59, %v766_v61 }
 0x117   : > { %v536_v8 = vpop.f32.mrb[14].mxu0  ;;  %v600_v9 = vpop.f32.mrb[14].mxu1  ;;  %v1172_v10 = vpack.c.bf16 %v782_v6, %v781_v4  ;;  %v1212_v11 = vpack.c.bf16 %v798_v7, %v797_v5 }
 0x118   : > { %v683_v12 = vadd.f32 %v1463_v49, %v647_v0  ;;  %v699_v13 = vadd.f32 %v1463_v49, %v663_v1  ;;  %v538_v14 = vpop.f32.mrb[15].mxu0  ;;  %v602_v15 = vpop.f32.mrb[15].mxu1  ;;  %v648_v16 = vmul.f32 %v1461_v47, %v536_v8  ;;  %v664_v17 = vmul.f32 %v1461_v47, %v600_v9 }
 0x119   : > { %1240 = vst [vmem:[%s1485_s16 + $0x10] sm:$0xff] %v1172_v10   ;;  %1248 = vst [vmem:[%s1485_s16 + $0x50] sm:$0xff] %v1212_v11  }
 0x11a   : > { %v751_v18 = vmul.f32 %v1467_v56, %v683_v12  ;;  %v767_v19 = vmul.f32 %v1467_v56, %v699_v13  ;;  %v684_v20 = vadd.f32 %v1463_v49, %v648_v16  ;;  %v700_v21 = vadd.f32 %v1463_v49, %v664_v17 }
 0x11b   : > { %vm715_vm13 = vcmp.ge.f32.partialorder %v683_v12, 0.0  ;;  %vm731_vm14 = vcmp.ge.f32.partialorder %v699_v13, 0.0 }
 0x11c   : > { %vm716_vm15 = vcmp.ge.f32.partialorder %v684_v20, 0.0  ;;  %v752_v22 = vmul.f32 %v1467_v56, %v684_v20  ;;  %vm732_vm0 = vcmp.ge.f32.partialorder %v700_v21, 0.0  ;;  %v768_v23 = vmul.f32 %v1467_v56, %v700_v21 }
 0x11d   : > { %v541_v24 = vpop.f32.mrb[16].mxu0  ;;  %v605_v25 = vpop.f32.mrb[16].mxu1  ;;  %v783_v30 = vsel %vm715_vm13, %v683_v12, %v751_v18  ;;  %v799_v31 = vsel %vm731_vm14, %v699_v13, %v767_v19 }
 0x11e   : > { %v649_v26 = vmul.f32 %v1461_v47, %v541_v24  ;;  %v665_v27 = vmul.f32 %v1461_v47, %v605_v25  ;;  %v543_v28 = vpop.f32.mrb[17].mxu0  ;;  %v607_v29 = vpop.f32.mrb[17].mxu1  ;;  %v784_v32 = vsel %vm716_vm15, %v684_v20, %v752_v22  ;;  %v800_v33 = vsel %vm732_vm0, %v700_v21, %v768_v23 }
 0x11f   : > { %v544_v34 = vpop.f32.mrb[18].mxu0  ;;  %v608_v35 = vpop.f32.mrb[18].mxu1  ;;  %v1177_v36 = vpack.c.bf16 %v784_v32, %v783_v30  ;;  %v1217_v37 = vpack.c.bf16 %v800_v33, %v799_v31 }
 0x120   : > { %v685_v38 = vadd.f32 %v1463_v49, %v649_v26  ;;  %v701_v39 = vadd.f32 %v1463_v49, %v665_v27  ;;  %v546_v40 = vpop.f32.mrb[19].mxu0  ;;  %v610_v41 = vpop.f32.mrb[19].mxu1  ;;  %v650_v42 = vmul.f32 %v1461_v47, %v544_v34  ;;  %v666_v43 = vmul.f32 %v1461_v47, %v608_v35 }
 0x121   : > { %1241 = vst [vmem:[%s1485_s16 + $0x18] sm:$0xff] %v1177_v36   ;;  %1249 = vst [vmem:[%s1485_s16 + $0x58] sm:$0xff] %v1217_v37  }
 0x122   : > { %v753_v44 = vmul.f32 %v1467_v56, %v685_v38  ;;  %v769_v45 = vmul.f32 %v1467_v56, %v701_v39  ;;  %v686_v46 = vadd.f32 %v1463_v49, %v650_v42  ;;  %v702_v48 = vadd.f32 %v1463_v49, %v666_v43 }
 0x123   : > { %vm717_vm1 = vcmp.ge.f32.partialorder %v685_v38, 0.0  ;;  %vm733_vm2 = vcmp.ge.f32.partialorder %v701_v39, 0.0 }
 0x124   : > { %vm718_vm3 = vcmp.ge.f32.partialorder %v686_v46, 0.0  ;;  %v754_v50 = vmul.f32 %v1467_v56, %v686_v46  ;;  %vm734_vm4 = vcmp.ge.f32.partialorder %v702_v48, 0.0  ;;  %v770_v51 = vmul.f32 %v1467_v56, %v702_v48 }
 0x125   : > { %v549_v52 = vpop.f32.mrb[20].mxu0  ;;  %v613_v53 = vpop.f32.mrb[20].mxu1  ;;  %v785_v59 = vsel %vm717_vm1, %v685_v38, %v753_v44  ;;  %v801_v60 = vsel %vm733_vm2, %v701_v39, %v769_v45 }
 0x126   : > { %v651_v54 = vmul.f32 %v1461_v47, %v549_v52  ;;  %v667_v55 = vmul.f32 %v1461_v47, %v613_v53  ;;  %v551_v57 = vpop.f32.mrb[21].mxu0  ;;  %v615_v58 = vpop.f32.mrb[21].mxu1  ;;  %v786_v61 = vsel %vm718_vm3, %v686_v46, %v754_v50  ;;  %v802_v62 = vsel %vm734_vm4, %v702_v48, %v770_v51 }
 0x127   : > { %v552_v63 = vpop.f32.mrb[22].mxu0  ;;  %v616_v0 = vpop.f32.mrb[22].mxu1  ;;  %v1182_v1 = vpack.c.bf16 %v786_v61, %v785_v59  ;;  %v1222_v2 = vpack.c.bf16 %v802_v62, %v801_v60 }
 0x128   : > { %v687_v3 = vadd.f32 %v1463_v49, %v651_v54  ;;  %v703_v4 = vadd.f32 %v1463_v49, %v667_v55  ;;  %v554_v5 = vpop.f32.mrb[23].mxu0  ;;  %v618_v6 = vpop.f32.mrb[23].mxu1  ;;  %v652_v7 = vmul.f32 %v1461_v47, %v552_v63  ;;  %v668_v8 = vmul.f32 %v1461_v47, %v616_v0 }
 0x129   : > { %1242 = vst [vmem:[%s1485_s16 + $0x20] sm:$0xff] %v1182_v1   ;;  %1250 = vst [vmem:[%s1485_s16 + $0x60] sm:$0xff] %v1222_v2  }
 0x12a   : > { %v755_v9 = vmul.f32 %v1467_v56, %v687_v3  ;;  %v771_v10 = vmul.f32 %v1467_v56, %v703_v4  ;;  %v688_v11 = vadd.f32 %v1463_v49, %v652_v7  ;;  %v704_v12 = vadd.f32 %v1463_v49, %v668_v8 }
 0x12b   : > { %vm719_vm5 = vcmp.ge.f32.partialorder %v687_v3, 0.0  ;;  %vm735_vm6 = vcmp.ge.f32.partialorder %v703_v4, 0.0 }
 0x12c   : > { %vm720_vm7 = vcmp.ge.f32.partialorder %v688_v11, 0.0  ;;  %v756_v13 = vmul.f32 %v1467_v56, %v688_v11  ;;  %vm736_vm8 = vcmp.ge.f32.partialorder %v704_v12, 0.0  ;;  %v772_v14 = vmul.f32 %v1467_v56, %v704_v12 }
 0x12d   : > { %v557_v15 = vpop.f32.mrb[24].mxu0  ;;  %v621_v16 = vpop.f32.mrb[24].mxu1  ;;  %v787_v21 = vsel %vm719_vm5, %v687_v3, %v755_v9  ;;  %v803_v22 = vsel %vm735_vm6, %v703_v4, %v771_v10 }
 0x12e   : > { %v653_v17 = vmul.f32 %v1461_v47, %v557_v15  ;;  %v669_v18 = vmul.f32 %v1461_v47, %v621_v16  ;;  %v559_v19 = vpop.f32.mrb[25].mxu0  ;;  %v623_v20 = vpop.f32.mrb[25].mxu1  ;;  %v788_v23 = vsel %vm720_vm7, %v688_v11, %v756_v13  ;;  %v804_v24 = vsel %vm736_vm8, %v704_v12, %v772_v14 }
 0x12f   : > { %v560_v25 = vpop.f32.mrb[26].mxu0  ;;  %v624_v26 = vpop.f32.mrb[26].mxu1  ;;  %v1187_v27 = vpack.c.bf16 %v788_v23, %v787_v21  ;;  %v1227_v28 = vpack.c.bf16 %v804_v24, %v803_v22 }
 0x130   : > { %v689_v29 = vadd.f32 %v1463_v49, %v653_v17  ;;  %v705_v30 = vadd.f32 %v1463_v49, %v669_v18  ;;  %v562_v31 = vpop.f32.mrb[27].mxu0  ;;  %v626_v32 = vpop.f32.mrb[27].mxu1  ;;  %v654_v33 = vmul.f32 %v1461_v47, %v560_v25  ;;  %v670_v34 = vmul.f32 %v1461_v47, %v624_v26 }
 0x131   : > { %1243 = vst [vmem:[%s1485_s16 + $0x28] sm:$0xff] %v1187_v27   ;;  %1251 = vst [vmem:[%s1485_s16 + $0x68] sm:$0xff] %v1227_v28  }
 0x132   : > { %v757_v35 = vmul.f32 %v1467_v56, %v689_v29  ;;  %v773_v36 = vmul.f32 %v1467_v56, %v705_v30  ;;  %v690_v37 = vadd.f32 %v1463_v49, %v654_v33  ;;  %v706_v38 = vadd.f32 %v1463_v49, %v670_v34 }
 0x133   : > { %vm721_vm9 = vcmp.ge.f32.partialorder %v689_v29, 0.0  ;;  %vm737_vm10 = vcmp.ge.f32.partialorder %v705_v30, 0.0 }
 0x134   : > { %vm722_vm11 = vcmp.ge.f32.partialorder %v690_v37, 0.0  ;;  %v758_v39 = vmul.f32 %v1467_v56, %v690_v37  ;;  %vm738_vm12 = vcmp.ge.f32.partialorder %v706_v38, 0.0  ;;  %v774_v40 = vmul.f32 %v1467_v56, %v706_v38 }
 0x135   : > { %v565_v41 = vpop.f32.mrb[28].mxu0  ;;  %v629_v42 = vpop.f32.mrb[28].mxu1  ;;  %v789_v48 = vsel %vm721_vm9, %v689_v29, %v757_v35  ;;  %v805_v50 = vsel %vm737_vm10, %v705_v30, %v773_v36 }
 0x136   : > { %v655_v43 = vmul.f32 %v1461_v47, %v565_v41  ;;  %v671_v44 = vmul.f32 %v1461_v47, %v629_v42  ;;  %v567_v45 = vpop.f32.mrb[29].mxu0  ;;  %v631_v46 = vpop.f32.mrb[29].mxu1  ;;  %v790_v51 = vsel %vm722_vm11, %v690_v37, %v758_v39  ;;  %v806_v52 = vsel %vm738_vm12, %v706_v38, %v774_v40 }
 0x137   : > { %v568_v53 = vpop.f32.mrb[30].mxu0  ;;  %v632_v54 = vpop.f32.mrb[30].mxu1  ;;  %v1192_v55 = vpack.c.bf16 %v790_v51, %v789_v48  ;;  %v1232_v57 = vpack.c.bf16 %v806_v52, %v805_v50 }
 0x138   : > { %v691_v58 = vadd.f32 %v1463_v49, %v655_v43  ;;  %v707_v59 = vadd.f32 %v1463_v49, %v671_v44  ;;  %v570_v60 = vpop.f32.mrb[31].mxu0  ;;  %v634_v61 = vpop.f32.mrb[31].mxu1  ;;  %v656_v62 = vmul.f32 %v1461_v47, %v568_v53  ;;  %v672_v63 = vmul.f32 %v1461_v47, %v632_v54 }
 0x139   : > { %1244 = vst [vmem:[%s1485_s16 + $0x30] sm:$0xff] %v1192_v55   ;;  %1252 = vst [vmem:[%s1485_s16 + $0x70] sm:$0xff] %v1232_v57  }
 0x13a   : > { %v759_v0 = vmul.f32 %v1467_v56, %v691_v58  ;;  %v775_v1 = vmul.f32 %v1467_v56, %v707_v59  ;;  %v692_v2 = vadd.f32 %v1463_v49, %v656_v62  ;;  %v708_v3 = vadd.f32 %v1463_v49, %v672_v63 }
 0x13b   : > { %vm723_vm13 = vcmp.ge.f32.partialorder %v691_v58, 0.0  ;;  %vm739_vm14 = vcmp.ge.f32.partialorder %v707_v59, 0.0 }
 0x13c   : > { %vm724_vm15 = vcmp.ge.f32.partialorder %v692_v2, 0.0  ;;  %v760_v4 = vmul.f32 %v1467_v56, %v692_v2  ;;  %vm740_vm0 = vcmp.ge.f32.partialorder %v708_v3, 0.0  ;;  %v776_v47 = vmul.f32 %v1467_v56, %v708_v3 }
 0x13d   : > { %v791_v5 = vsel %vm723_vm13, %v691_v58, %v759_v0  ;;  %v807_v6 = vsel %vm739_vm14, %v707_v59, %v775_v1 }
 0x13e   : > { %v792_v7 = vsel %vm724_vm15, %v692_v2, %v760_v4  ;;  %v808_v8 = vsel %vm740_vm0, %v708_v3, %v776_v47 }
 0x13f   : > { %v1197_v9 = vpack.c.bf16 %v792_v7, %v791_v5  ;;  %v1237_v10 = vpack.c.bf16 %v808_v8, %v807_v6 }
 0x141   : > { %1245 = vst [vmem:[%s1485_s16 + $0x38] sm:$0xff] %v1197_v9   ;;  %1253 = vst [vmem:[%s1485_s16 + $0x78] sm:$0xff] %v1237_v10  }
 0x142 PF: > { %s13_s12 = sadd.s32 1, %s1344_s12  }
 0x143   : > { %p10_p4 = scmp.ge.s32.totalorder %s13_s12, 4  }
 0x145   :  { %12 = sbr.rel (!%p10_p4) target bundleno = 1 (0x1), region = 62 }

// kernel: arcface_forward.6
= control target key start
LH: loop header
LB: loop body
LE: loop exit
PB: predicated region body
PF: predicated region fallthrough
CT: control target
= control target key end

     0   :  { %vm79_vm0 = vcmask 130048   ;;  %v202_v9 = vlaneseq  ;;  %s542_s1 = inlined_call_operand.vmem [shape: bf16[16,128], index: 1, kind: input, shape index: {}]   ;;  %s543_s0 = inlined_call_operand.vmem [shape: bf16[128,16], index: 0, kind: input, shape index: {}]   ;;  %s544_s2 = inlined_call_operand.vmem [shape: f32[2,128], index: 2, kind: input, shape index: {}]   ;;  %s545_s3 = inlined_call_operand.vmem [shape: bf16[128,128], index: 3, kind: output, shape index: {}]  }
   0x1   :  { %v451_v0 = vld [vmem:[%s542_s1] sm:$0xff]   ;;  %v454_v3 = vld [vmem:[%s543_s0 + $0x8] sm:$0xff]   ;;  %v456_v5 = vld [vmem:[%s543_s0 + $0x10] sm:$0xff]  }
   0x2   :  { %v452_v1 = vld [vmem:[%s543_s0] sm:$0xff]   ;;  %431 = vmatprep.subr.bf16.mxu0 %v451_v0  ;;  %449 = vmatprep.subr.bf16.mxu1 %v451_v0  ;;  %v455_v4 = vld [vmem:[%s543_s0 + $0x28] sm:$0xff]   ;;  %v457_v6 = vld [vmem:[%s543_s0 + $0x30] sm:$0xff]   ;;  %v203_v10 = vshrl.u32 %v202_v9, 7 }
   0x3   :  { %v453_v2 = vld [vmem:[%s543_s0 + $0x20] sm:$0xff]   ;;  %432 = vmatpush3.bf16.msra.mxu0 %v451_v0  ;;  %450 = vmatpush3.bf16.msra.mxu1 %v451_v0  ;;  %v458_v7 = vld [vmem:[%s543_s0 + $0x18] sm:$0xff]  }
   0x4   :  { %433 = vmatprep.mubr.msk.bf16.mxu0 %vm79_vm0, %v452_v1  ;;  %441 = vmatprep.mubr.msk.bf16.mxu1 %vm79_vm0, %v453_v2  ;;  %v459_v8 = vld [vmem:[%s543_s0 + $0x38] sm:$0xff]   ;;  %v204_v11 = vsub.s32 0, %v203_v10  ;;  %v201_v12 = vld [vmem:[%s544_s2] sm:$0x3]  ;;  %v224_v14 = vsub.s32 1, %v203_v10 }
   0x6   :  { %434 = vmatmul.mubr.msk.bf16.vlgmr.msra.gmra.mrb[0].mxu0 %vm79_vm0, %v454_v3  ;;  %442 = vmatmul.mubr.msk.bf16.vlgmr.msra.gmra.mrb[0].mxu1 %vm79_vm0, %v455_v4  ;;  %v205_v13 = vrot.slane %v201_v12, %v204_v11  ;;  %v225_v18 = vrot.slane %v201_v12, %v224_v14 }
   0x7   :  { %437 = vmatprep.mubr.msk.bf16.mxu0 %vm79_vm0, %v456_v5  ;;  %445 = vmatprep.mubr.msk.bf16.mxu1 %vm79_vm0, %v457_v6 }
   0xe   :  { %438 = vmatmul.mubr.msk.bf16.gmra.mrb[4].mxu0 %vm79_vm0, %v458_v7  ;;  %446 = vmatmul.mubr.msk.bf16.gmra.mrb[4].mxu1 %vm79_vm0, %v459_v8 }
  0xd9   :  { %v435_v15 = vpop.f32.mrb[0].mxu0  ;;  %v443_v16 = vpop.f32.mrb[0].mxu1 }
  0xda   :  { %v208_v17 = vmul.f32 %v435_v15, %v205_v13  ;;  %v216_v19 = vmul.f32 %v443_v16, %v205_v13  ;;  %v138_v20 = vpop.f32.mrb[1].mxu0  ;;  %v170_v21 = vpop.f32.mrb[1].mxu1 }
  0xdb   :  { %v206_v22 = vmul.f32 %v205_v13, %v138_v20  ;;  %v214_v23 = vmul.f32 %v205_v13, %v170_v21  ;;  %v436_v24 = vpop.f32.mrb[2].mxu0  ;;  %v444_v25 = vpop.f32.mrb[2].mxu1 }
  0xdc   :  { %v209_v26 = vmul.f32 %v436_v24, %v205_v13  ;;  %v217_v27 = vmul.f32 %v444_v25, %v205_v13  ;;  %v141_v28 = vpop.f32.mrb[3].mxu0  ;;  %v173_v29 = vpop.f32.mrb[3].mxu1  ;;  %v228_v32 = vadd.f32 %v225_v18, %v208_v17  ;;  %v236_v33 = vadd.f32 %v225_v18, %v216_v19 }
  0xdd   :  { %v207_v30 = vmul.f32 %v205_v13, %v141_v28  ;;  %v215_v31 = vmul.f32 %v205_v13, %v173_v29  ;;  %v226_v36 = vadd.f32 %v225_v18, %v206_v22  ;;  %v234_v37 = vadd.f32 %v225_v18, %v214_v23 }
  0xde   :  { %v229_v34 = vadd.f32 %v225_v18, %v209_v26  ;;  %v237_v35 = vadd.f32 %v225_v18, %v217_v27 }
  0xdf   :  { %v227_v38 = vadd.f32 %v225_v18, %v207_v30  ;;  %v235_v39 = vadd.f32 %v225_v18, %v215_v31 }
  0xe0   :  { %v383_v40 = vpack.c.bf16 %v229_v34, %v228_v32  ;;  %v403_v41 = vpack.c.bf16 %v237_v35, %v236_v33 }
  0xe1   :  { %v378_v42 = vpack.c.bf16 %v227_v38, %v226_v36  ;;  %v398_v43 = vpack.c.bf16 %v235_v39, %v234_v37  ;;  %v439_v44 = vpop.f32.mrb[4].mxu0  ;;  %v447_v45 = vpop.f32.mrb[4].mxu1 }
  0xe2   :  { %415 = vst [vmem:[%s545_s3 + $0x8] sm:$0xff] %v383_v40   ;;  %419 = vst [vmem:[%s545_s3 + $0x28] sm:$0xff] %v403_v41   ;;  %v212_v46 = vmul.f32 %v439_v44, %v205_v13  ;;  %v220_v47 = vmul.f32 %v447_v45, %v205_v13  ;;  %v154_v48 = vpop.f32.mrb[5].mxu0  ;;  %v186_v49 = vpop.f32.mrb[5].mxu1 }
  0xe3   :  { %379 = vst [vmem:[%s545_s3] sm:$0xff] %v378_v42   ;;  %418 = vst [vmem:[%s545_s3 + $0x20] sm:$0xff] %v398_v43   ;;  %v210_v50 = vmul.f32 %v205_v13, %v154_v48  ;;  %v218_v51 = vmul.f32 %v205_v13, %v186_v49  ;;  %v440_v52 = vpop.f32.mrb[6].mxu0  ;;  %v448_v53 = vpop.f32.mrb[6].mxu1 }
  0xe4   :  { %v213_v54 = vmul.f32 %v440_v52, %v205_v13  ;;  %v221_v55 = vmul.f32 %v448_v53, %v205_v13  ;;  %v157_v56 = vpop.f32.mrb[7].mxu0  ;;  %v189_v57 = vpop.f32.mrb[7].mxu1  ;;  %v232_v60 = vadd.f32 %v225_v18, %v212_v46  ;;  %v240_v61 = vadd.f32 %v225_v18, %v220_v47 }
  0xe5   :  { %v211_v58 = vmul.f32 %v205_v13, %v157_v56  ;;  %v219_v59 = vmul.f32 %v205_v13, %v189_v57  ;;  %v230_v0 = vadd.f32 %v225_v18, %v210_v50  ;;  %v238_v1 = vadd.f32 %v225_v18, %v218_v51 }
  0xe6   :  { %v233_v62 = vadd.f32 %v225_v18, %v213_v54  ;;  %v241_v63 = vadd.f32 %v225_v18, %v221_v55 }
  0xe7   :  { %v231_v2 = vadd.f32 %v225_v18, %v211_v58  ;;  %v239_v3 = vadd.f32 %v225_v18, %v219_v59 }
  0xe8   :  { %v393_v4 = vpack.c.bf16 %v233_v62, %v232_v60  ;;  %v413_v5 = vpack.c.bf16 %v241_v63, %v240_v61 }
  0xe9   :  { %v388_v6 = vpack.c.bf16 %v231_v2, %v230_v0  ;;  %v408_v7 = vpack.c.bf16 %v239_v3, %v238_v1 }
  0xea   :  { %417 = vst [vmem:[%s545_s3 + $0x18] sm:$0xff] %v393_v4   ;;  %421 = vst [vmem:[%s545_s3 + $0x38] sm:$0xff] %v413_v5  }
  0xeb   :  { %416 = vst [vmem:[%s545_s3 + $0x10] sm:$0xff] %v388_v6   ;;  %420 = vst [vmem:[%s545_s3 + $0x30] sm:$0xff] %v408_v7  }

// kernel: arcface_forward.8
= control target key start
LH: loop header
LB: loop body
LE: loop exit
PB: predicated region body
PF: predicated region fallthrough
CT: control target
= control target key end

     0   :  { %vm314_vm0 = vcmask 261120   ;;  %v534_v52 = vlaneseq  ;;  %s1292_s1 = inlined_call_operand.vmem [shape: bf16[288,128], index: 1, kind: input, shape index: {}]   ;;  %s1293_s0 = inlined_call_operand.vmem [shape: bf16[128,288], index: 0, kind: input, shape index: {}]   ;;  %s1294_s2 = inlined_call_operand.vmem [shape: f32[2,128], index: 2, kind: input, shape index: {}]   ;;  %s1295_s3 = inlined_call_operand.vmem [shape: bf16[128,128], index: 3, kind: input, shape index: {}]   ;;  %s1296_s4 = inlined_call_operand.vmem [shape: bf16[128,128], index: 4, kind: output, shape index: {}]  }
   0x1   :  { %v984_v0 = vld [vmem:[%s1292_s1 + $0x40] sm:$0xff]   ;;  %v986_v2 = vld [vmem:[%s1292_s1 + $0x48] sm:$0xff]   ;;  %v988_v4 = vld [vmem:[%s1292_s1 + $0x50] sm:$0xff]  }
   0x2   :  { %v985_v1 = vld [vmem:[%s1292_s1] sm:$0xff]   ;;  %874 = vmatprep.subr.bf16.mxu0 %v984_v0  ;;  %968 = vmatprep.subr.bf16.mxu1 %v984_v0  ;;  %v987_v3 = vld [vmem:[%s1292_s1 + $0x8] sm:$0xff]   ;;  %v989_v5 = vld [vmem:[%s1292_s1 + $0x10] sm:$0xff]   ;;  %v535_v55 = vshrl.u32 %v534_v52, 7 }
   0x3   :  { %875 = vmatpush3.bf16.msra.mxu0 %v985_v1  ;;  %976 = vmatpush3.bf16.msra.mxu1 %v985_v1  ;;  %v990_v6 = vld [vmem:[%s1292_s1 + $0x58] sm:$0xff]   ;;  %v992_v8 = vld [vmem:[%s1292_s1 + $0x60] sm:$0xff]   ;;  %v994_v10 = vld [vmem:[%s1292_s1 + $0x68] sm:$0xff]  }
   0x4   :  { %876 = vmatprep.subr.bf16.mxu0 %v986_v2  ;;  %969 = vmatprep.subr.bf16.mxu1 %v986_v2  ;;  %v991_v7 = vld [vmem:[%s1292_s1 + $0x18] sm:$0xff]   ;;  %v993_v9 = vld [vmem:[%s1292_s1 + $0x20] sm:$0xff]   ;;  %v995_v13 = vld [vmem:[%s1292_s1 + $0x28] sm:$0xff]   ;;  %v536_v2 = vsub.s32 0, %v535_v55 }
   0x5   :  { %v1002_v11 = vld [vmem:[%s1293_s0 + $0x4] ss:$12 sps:$4 sm:$0xff]   ;;  %v1005_v12 = vld [vmem:[%s1293_s0 + $0x94] ss:$12 sps:$4 sm:$0xff]   ;;  %v998_v16 = vld [vmem:[%s1292_s1 + $0x78] sm:$0xff]  }
   0x6   :  { %v996_v14 = vld [vmem:[%s1292_s1 + $0x70] sm:$0xff]   ;;  %371 = vmatprep.mubr.bf16.mxu0 %v1002_v11  ;;  %419 = vmatprep.mubr.bf16.mxu1 %v1005_v12  ;;  %v999_v17 = vld [vmem:[%s1292_s1 + $0x38] sm:$0xff]   ;;  %v1000_v18 = vld [vmem:[%s1293_s0] ss:$12 sps:$4 sm:$0xff]  }
   0x7   :  { %877 = vmatpush3.bf16.msra.mxu0 %v987_v3  ;;  %977 = vmatpush3.bf16.msra.mxu1 %v987_v3  ;;  %v997_v15 = vld [vmem:[%s1292_s1 + $0x30] sm:$0xff]   ;;  %v1006_v19 = vld [vmem:[%s1292_s1 + $0x80] sm:$0xff]   ;;  %v1007_v21 = vld [vmem:[%s1293_s0 + $0x1c] ss:$12 sps:$4 sm:$0xff]  }
   0x8   :  { %878 = vmatprep.subr.bf16.mxu0 %v988_v4  ;;  %970 = vmatprep.subr.bf16.mxu1 %v988_v4  ;;  %v1003_v20 = vld [vmem:[%s1293_s0 + $0x90] ss:$12 sps:$4 sm:$0xff]   ;;  %v1009_v22 = vld [vmem:[%s1293_s0 + $0xac] ss:$12 sps:$4 sm:$0xff]   ;;  %v1012_v25 = vld [vmem:[%s1293_s0 + $0xa8] ss:$12 sps:$4 sm:$0xff]  }
   0x9   :  { %v1013_v23 = vld [vmem:[%s1292_s1 + $0x88] sm:$0xff]   ;;  %v1011_v24 = vld [vmem:[%s1293_s0 + $0x18] ss:$12 sps:$4 sm:$0xff]   ;;  %v1014_v26 = vld [vmem:[%s1293_s0 + $0x34] ss:$12 sps:$4 sm:$0xff]  }
   0xa   :  { %v1016_v27 = vld [vmem:[%s1293_s0 + $0x8] ss:$12 sps:$4 sm:$0xff]   ;;  %v1017_v28 = vld [vmem:[%s1293_s0 + $0x30] ss:$12 sps:$4 sm:$0xff]   ;;  %v1018_v29 = vld [vmem:[%s1293_s0 + $0x20] ss:$12 sps:$4 sm:$0xff]  }
   0xb   :  { %879 = vmatpush3.bf16.msra.mxu0 %v989_v5  ;;  %978 = vmatpush3.bf16.msra.mxu1 %v989_v5  ;;  %v1019_v30 = vld [vmem:[%s1293_s0 + $0x4c] ss:$12 sps:$4 sm:$0xff]   ;;  %v1022_v32 = vld [vmem:[%s1293_s0 + $0x48] ss:$12 sps:$4 sm:$0xff]   ;;  %v1023_v33 = vld [vmem:[%s1293_s0 + $0x50] ss:$12 sps:$4 sm:$0xff]  }
   0xc   :  { %880 = vmatprep.subr.bf16.mxu0 %v990_v6  ;;  %971 = vmatprep.subr.bf16.mxu1 %v990_v6  ;;  %v1021_v31 = vld [vmem:[%s1293_s0 + $0x38] ss:$12 sps:$4 sm:$0xff]   ;;  %v1026_v35 = vld [vmem:[%s1293_s0 + $0x68] ss:$12 sps:$4 sm:$0xff]   ;;  %v1027_v36 = vld [vmem:[%s1293_s0 + $0x60] ss:$12 sps:$4 sm:$0xff]  }
   0xd   :  { %v1024_v34 = vld [vmem:[%s1293_s0 + $0x64] ss:$12 sps:$4 sm:$0xff]   ;;  %v1028_v37 = vld [vmem:[%s1293_s0 + $0x80] ss:$12 sps:$4 sm:$0xff]   ;;  %v1029_v38 = vld [vmem:[%s1293_s0 + $0x7c] ss:$12 sps:$4 sm:$0xff]  }
   0xe   :  { %v1031_v39 = vld [vmem:[%s1293_s0 + $0x98] ss:$12 sps:$4 sm:$0xff]   ;;  %v1033_v41 = vld [vmem:[%s1293_s0 + $0xb0] ss:$12 sps:$4 sm:$0xff]   ;;  %v533_v5 = vld [vmem:[%s1294_s2] sm:$0x3] }
   0xf   :  { %881 = vmatpush3.bf16.msra.mxu0 %v991_v7  ;;  %979 = vmatpush3.bf16.msra.mxu1 %v991_v7  ;;  %v1032_v40 = vld [vmem:[%s1293_s0 + $0x78] ss:$12 sps:$4 sm:$0xff]   ;;  %v556_v6 = vsub.s32 1, %v535_v55  ;;  %v1204_v7 = vrot.slane %v533_v5, %v536_v2 }
  0x10   :  { %882 = vmatprep.subr.bf16.mxu0 %v992_v8  ;;  %972 = vmatprep.subr.bf16.mxu1 %v992_v8 }
  0x11   :  { %v1206_v11 = vrot.slane %v533_v5, %v556_v6 }
  0x13   :  { %883 = vmatpush3.bf16.msra.mxu0 %v993_v9  ;;  %980 = vmatpush3.bf16.msra.mxu1 %v993_v9 }
  0x14   :  { %884 = vmatprep.subr.bf16.mxu0 %v994_v10  ;;  %973 = vmatprep.subr.bf16.mxu1 %v994_v10 }
  0x17   :  { %885 = vmatpush3.bf16.msra.mxu0 %v995_v13  ;;  %981 = vmatpush3.bf16.msra.mxu1 %v995_v13 }
  0x18   :  { %886 = vmatprep.subr.bf16.mxu0 %v996_v14  ;;  %974 = vmatprep.subr.bf16.mxu1 %v996_v14  ;;  %v860_v14 = vld [vmem:[%s1295_s3 + $0x8] sm:$0xff]  }
  0x1b   :  { %887 = vmatpush3.bf16.msra.mxu0 %v997_v15  ;;  %982 = vmatpush3.bf16.msra.mxu1 %v997_v15 }
  0x1c   :  { %888 = vmatprep.subr.bf16.mxu0 %v998_v16  ;;  %975 = vmatprep.subr.bf16.mxu1 %v998_v16 }
  0x1f   :  { %889 = vmatpush3.bf16.msra.mxu0 %v999_v17  ;;  %983 = vmatpush3.bf16.msra.mxu1 %v999_v17 }
  0x20   :  { %948 = vmatprep.subr.bf16.mxu1 %v1006_v19 }
  0x22   :  { %372 = vmatmul.mubr.bf16.vlgmr.msra.gmra.mrb[0].mxu0 %v1000_v18  ;;  %420 = vmatmul.mubr.bf16.vlgmr.msra.gmra.mrb[0].mxu1 %v1003_v20  ;;  %v789_v20 = vld [vmem:[%s1295_s3] sm:$0xff]  }
  0x23   :  { %949 = vmatpush3.bf16.msra.mxu1 %v1006_v19  ;;  %379 = vmatprep.mubr.bf16.mxu0 %v1007_v21 }
  0x24   :  { %427 = vmatprep.mubr.bf16.mxu1 %v1009_v22  ;;  %950 = vmatprep.subr.bf16.mxu1 %v1013_v23 }
  0x27   :  { %951 = vmatpush3.bf16.msra.mxu1 %v1013_v23 }
  0x2a   :  { %380 = vmatmul.mubr.bf16.gmra.mrb[4].mxu0 %v1011_v24  ;;  %428 = vmatmul.mubr.bf16.gmra.mrb[4].mxu1 %v1012_v25 }
  0x2b   :  { %387 = vmatprep.mubr.bf16.mxu0 %v1014_v26  ;;  %952 = vmatprep.mubr.msk.bf16.mxu1 %vm314_vm0, %v1016_v27 }
  0x32   :  { %388 = vmatmul.mubr.bf16.gmra.mrb[8].mxu0 %v1017_v28  ;;  %953 = vmatmul.mubr.msk.bf16.vlgmr.msra.gmra.mrb[8].mxu1 %vm314_vm0, %v1018_v29  ;;  %v794_v28 = vunpack.c.l.bf16 %v860_v14 }
  0x33   :  { %395 = vmatprep.mubr.bf16.mxu0 %v1019_v30  ;;  %956 = vmatprep.mubr.msk.bf16.mxu1 %vm314_vm0, %v1021_v31  ;;  %v795_v30 = vunpack.c.h.bf16 %v860_v14 }
  0x3a   :  { %396 = vmatmul.mubr.bf16.gmra.mrb[12].mxu0 %v1022_v32  ;;  %957 = vmatmul.mubr.msk.bf16.gmra.mrb[12].mxu1 %vm314_vm0, %v1023_v33  ;;  %v790_v32 = vunpack.c.l.bf16 %v789_v20 }
  0x3b   :  { %403 = vmatprep.mubr.bf16.mxu0 %v1024_v34  ;;  %960 = vmatprep.mubr.msk.bf16.mxu1 %vm314_vm0, %v1026_v35  ;;  %v791_v34 = vunpack.c.h.bf16 %v789_v20 }
  0x42   :  { %404 = vmatmul.mubr.bf16.gmra.mrb[16].mxu0 %v1027_v36  ;;  %961 = vmatmul.mubr.msk.bf16.gmra.mrb[16].mxu1 %vm314_vm0, %v1028_v37 }
  0x43   :  { %411 = vmatprep.mubr.bf16.mxu0 %v1029_v38  ;;  %964 = vmatprep.mubr.msk.bf16.mxu1 %vm314_vm0, %v1031_v39 }
  0x4a   :  { %412 = vmatmul.mubr.bf16.gmra.mrb[20].mxu0 %v1032_v40  ;;  %965 = vmatmul.mubr.msk.bf16.gmra.mrb[20].mxu1 %vm314_vm0, %v1033_v41 }
  0xf5   :  { %v890_v42 = vpop.f32.mrb[0].mxu0  ;;  %v926_v43 = vpop.f32.mrb[0].mxu1 }
  0xf6   :  { %v891_v44 = vpop.f32.mrb[1].mxu0  ;;  %v927_v45 = vpop.f32.mrb[1].mxu1 }
  0xf7   :  { %v892_v46 = vadd.f32 %v891_v44, %v890_v42  ;;  %v1193_v47 = vadd.f32 %v927_v45, %v926_v43  ;;  %v893_v48 = vpop.f32.mrb[2].mxu0  ;;  %v929_v49 = vpop.f32.mrb[2].mxu1 }
  0xf8   :  { %v894_v50 = vpop.f32.mrb[3].mxu0  ;;  %v930_v51 = vpop.f32.mrb[3].mxu1 }
  0xf9   :  { %v895_v53 = vadd.f32 %v894_v50, %v893_v48  ;;  %v1195_v54 = vadd.f32 %v930_v51, %v929_v49 }
  0xfd   :  { %v896_v56 = vpop.f32.mrb[4].mxu0  ;;  %v932_v57 = vpop.f32.mrb[4].mxu1 }
  0xfe   :  { %v897_v58 = vpop.f32.mrb[5].mxu0  ;;  %v933_v59 = vpop.f32.mrb[5].mxu1 }
  0xff   :  { %v898_v60 = vadd.f32 %v897_v58, %v896_v56  ;;  %v1197_v61 = vadd.f32 %v933_v59, %v932_v57  ;;  %v899_v62 = vpop.f32.mrb[6].mxu0  ;;  %v935_v63 = vpop.f32.mrb[6].mxu1  ;;  %v861_v57 = vld [vmem:[%s1295_s3 + $0x10] sm:$0xff]   ;;  %v862_v59 = vld [vmem:[%s1295_s3 + $0x18] sm:$0xff]  }
 0x100   :  { %v900_v0 = vpop.f32.mrb[7].mxu0  ;;  %v936_v1 = vpop.f32.mrb[7].mxu1  ;;  %v802_v6 = vunpack.c.l.bf16 %v862_v59 }
 0x101   :  { %v901_v3 = vadd.f32 %v900_v0, %v899_v62  ;;  %v1199_v4 = vadd.f32 %v936_v1, %v935_v63  ;;  %v798_v1 = vunpack.c.l.bf16 %v861_v57 }
 0x105   :  { %v902_v8 = vpop.f32.mrb[8].mxu0  ;;  %v954_v9 = vpop.f32.mrb[8].mxu1 }
 0x106   :  { %v479_v10 = vadd.f32 %v954_v9, %v898_v60  ;;  %v903_v12 = vpop.f32.mrb[9].mxu0  ;;  %v470_v13 = vpop.f32.mrb[9].mxu1  ;;  %v803_v9 = vunpack.c.h.bf16 %v862_v59 }
 0x107   :  { %v904_v15 = vadd.f32 %v903_v12, %v902_v8  ;;  %v471_v16 = vadd.f32 %v892_v46, %v470_v13  ;;  %v905_v17 = vpop.f32.mrb[10].mxu0  ;;  %v955_v18 = vpop.f32.mrb[10].mxu1 }
 0x108   :  { %v540_v19 = vmul.f32 %v1204_v7, %v479_v10  ;;  %v482_v21 = vadd.f32 %v955_v18, %v901_v3  ;;  %v906_v22 = vpop.f32.mrb[11].mxu0  ;;  %v473_v23 = vpop.f32.mrb[11].mxu1  ;;  %v799_v3 = vunpack.c.h.bf16 %v861_v57 }
 0x109   :  { %v538_v24 = vmul.f32 %v1204_v7, %v471_v16  ;;  %v907_v25 = vadd.f32 %v906_v22, %v905_v17  ;;  %v474_v26 = vadd.f32 %v895_v53, %v473_v23 }
 0x10a   :  { %v560_v27 = vadd.f32 %v1206_v11, %v540_v19  ;;  %v541_v29 = vmul.f32 %v1204_v7, %v482_v21 }
 0x10b   :  { %v558_v31 = vadd.f32 %v1206_v11, %v538_v24  ;;  %v539_v33 = vmul.f32 %v1204_v7, %v474_v26 }
 0x10c   :  { %v561_v35 = vadd.f32 %v1206_v11, %v541_v29  ;;  %v608_v39 = vadd.f32 %v794_v28, %v560_v27  ;;  %v863_v27 = vld [vmem:[%s1295_s3 + $0x20] sm:$0xff]  }
 0x10d   :  { %v559_v36 = vadd.f32 %v1206_v11, %v539_v33  ;;  %v908_v37 = vpop.f32.mrb[12].mxu0  ;;  %v958_v38 = vpop.f32.mrb[12].mxu1  ;;  %v606_v43 = vadd.f32 %v790_v32, %v558_v31  ;;  %v806_v33 = vunpack.c.l.bf16 %v863_v27 }
 0x10e   :  { %v609_v40 = vadd.f32 %v795_v30, %v561_v35  ;;  %v909_v41 = vpop.f32.mrb[13].mxu0  ;;  %v486_v42 = vpop.f32.mrb[13].mxu1 }
 0x10f   :  { %v607_v44 = vadd.f32 %v791_v34, %v559_v36  ;;  %v910_v45 = vadd.f32 %v909_v41, %v908_v37  ;;  %v487_v46 = vadd.f32 %v904_v15, %v486_v42  ;;  %v911_v48 = vpop.f32.mrb[14].mxu0  ;;  %v959_v49 = vpop.f32.mrb[14].mxu1  ;;  %v807_v36 = vunpack.c.h.bf16 %v863_v27 }
 0x110   :  { %v828_v50 = vpack.c.bf16 %v609_v40, %v608_v39  ;;  %v912_v51 = vpop.f32.mrb[15].mxu0  ;;  %v489_v52 = vpop.f32.mrb[15].mxu1  ;;  %v866_v39 = vld [vmem:[%s1295_s3 + $0x38] sm:$0xff]  }
 0x111   :  { %v823_v53 = vpack.c.bf16 %v607_v44, %v606_v43  ;;  %v495_v55 = vadd.f32 %v958_v38, %v910_v45  ;;  %v542_v56 = vmul.f32 %v1204_v7, %v487_v46  ;;  %v913_v58 = vadd.f32 %v912_v51, %v911_v48 }
 0x112   :  { %867 = vst [vmem:[%s1296_s4 + $0x8] sm:$0xff] %v828_v50   ;;  %v490_v60 = vadd.f32 %v907_v25, %v489_v52  ;;  %v818_v51 = vunpack.c.l.bf16 %v866_v39  ;;  %v865_v52 = vld [vmem:[%s1295_s3 + $0x30] sm:$0xff]  }
 0x113   :  { %824 = vst [vmem:[%s1296_s4] sm:$0xff] %v823_v53   ;;  %v544_v62 = vmul.f32 %v1204_v7, %v495_v55  ;;  %v498_v63 = vadd.f32 %v959_v49, %v913_v58  ;;  %v562_v0 = vadd.f32 %v1206_v11, %v542_v56 }
 0x114   :  { %v543_v2 = vmul.f32 %v1204_v7, %v490_v60  ;;  %v864_v60 = vld [vmem:[%s1295_s3 + $0x28] sm:$0xff]  }
 0x115   :  { %v564_v5 = vadd.f32 %v1206_v11, %v544_v62  ;;  %v545_v8 = vmul.f32 %v1204_v7, %v498_v63  ;;  %v914_v10 = vpop.f32.mrb[16].mxu0  ;;  %v962_v12 = vpop.f32.mrb[16].mxu1  ;;  %v610_v20 = vadd.f32 %v798_v1, %v562_v0  ;;  %v819_v63 = vunpack.c.h.bf16 %v866_v39 }
 0x116   :  { %v563_v13 = vadd.f32 %v1206_v11, %v543_v2  ;;  %v915_v14 = vpop.f32.mrb[17].mxu0  ;;  %v502_v15 = vpop.f32.mrb[17].mxu1  ;;  %v814_v2 = vunpack.c.l.bf16 %v865_v52 }
 0x117   :  { %v565_v16 = vadd.f32 %v1206_v11, %v545_v8  ;;  %v916_v17 = vadd.f32 %v915_v14, %v914_v10  ;;  %v917_v18 = vpop.f32.mrb[18].mxu0  ;;  %v963_v19 = vpop.f32.mrb[18].mxu1  ;;  %v612_v24 = vadd.f32 %v802_v6, %v564_v5 }
 0x118   :  { %v611_v21 = vadd.f32 %v799_v3, %v563_v13  ;;  %v918_v22 = vpop.f32.mrb[19].mxu0  ;;  %v505_v23 = vpop.f32.mrb[19].mxu1  ;;  %v811_v13 = vunpack.c.h.bf16 %v864_v60 }
 0x119   :  { %v613_v25 = vadd.f32 %v803_v9, %v565_v16  ;;  %v503_v26 = vadd.f32 %v916_v17, %v502_v15  ;;  %v919_v28 = vadd.f32 %v918_v22, %v917_v18  ;;  %v815_v9 = vunpack.c.h.bf16 %v865_v52 }
 0x11a   :  { %v833_v29 = vpack.c.bf16 %v611_v21, %v610_v20 }
 0x11b   :  { %v838_v30 = vpack.c.bf16 %v613_v25, %v612_v24  ;;  %v546_v31 = vmul.f32 %v1204_v7, %v503_v26  ;;  %v506_v32 = vadd.f32 %v919_v28, %v505_v23 }
 0x11c   :  { %868 = vst [vmem:[%s1296_s4 + $0x10] sm:$0xff] %v833_v29  }
 0x11d   :  { %869 = vst [vmem:[%s1296_s4 + $0x18] sm:$0xff] %v838_v30   ;;  %v566_v34 = vadd.f32 %v1206_v11, %v546_v31  ;;  %v547_v35 = vmul.f32 %v1204_v7, %v506_v32  ;;  %v920_v37 = vpop.f32.mrb[20].mxu0  ;;  %v966_v38 = vpop.f32.mrb[20].mxu1 }
 0x11e   :  { %v527_v40 = vadd.f32 %v966_v38, %v1197_v61  ;;  %v921_v41 = vpop.f32.mrb[21].mxu0  ;;  %v518_v42 = vpop.f32.mrb[21].mxu1 }
 0x11f   :  { %v567_v43 = vadd.f32 %v1206_v11, %v547_v35  ;;  %v922_v44 = vadd.f32 %v921_v41, %v920_v37  ;;  %v519_v45 = vadd.f32 %v1193_v47, %v518_v42  ;;  %v923_v46 = vpop.f32.mrb[22].mxu0  ;;  %v967_v48 = vpop.f32.mrb[22].mxu1  ;;  %v614_v49 = vadd.f32 %v806_v33, %v566_v34 }
 0x120   :  { %v552_v50 = vmul.f32 %v1204_v7, %v527_v40  ;;  %v530_v53 = vadd.f32 %v967_v48, %v1199_v4  ;;  %v924_v61 = vpop.f32.mrb[23].mxu0  ;;  %v521_v55 = vpop.f32.mrb[23].mxu1 }
 0x121   :  { %v615_v56 = vadd.f32 %v807_v36, %v567_v43  ;;  %v511_v57 = vadd.f32 %v962_v12, %v922_v44  ;;  %v550_v58 = vmul.f32 %v1204_v7, %v519_v45  ;;  %v925_v59 = vadd.f32 %v924_v61, %v923_v46 }
 0x122   :  { %v572_v47 = vadd.f32 %v1206_v11, %v552_v50  ;;  %v553_v62 = vmul.f32 %v1204_v7, %v530_v53  ;;  %v522_v0 = vadd.f32 %v1195_v54, %v521_v55  ;;  %v810_v12 = vunpack.c.l.bf16 %v864_v60 }
 0x123   :  { %v843_v1 = vpack.c.bf16 %v615_v56, %v614_v49  ;;  %v548_v4 = vmul.f32 %v1204_v7, %v511_v57  ;;  %v514_v3 = vadd.f32 %v963_v19, %v925_v59  ;;  %v570_v5 = vadd.f32 %v1206_v11, %v550_v58 }
 0x124   :  { %v573_v6 = vadd.f32 %v1206_v11, %v553_v62  ;;  %v551_v8 = vmul.f32 %v1204_v7, %v522_v0  ;;  %v620_v14 = vadd.f32 %v818_v51, %v572_v47 }
 0x125   :  { %870 = vst [vmem:[%s1296_s4 + $0x20] sm:$0xff] %v843_v1   ;;  %v568_v10 = vadd.f32 %v1206_v11, %v548_v4  ;;  %v549_v54 = vmul.f32 %v1204_v7, %v514_v3  ;;  %v618_v18 = vadd.f32 %v814_v2, %v570_v5 }
 0x126   :  { %v621_v15 = vadd.f32 %v819_v63, %v573_v6  ;;  %v571_v16 = vadd.f32 %v1206_v11, %v551_v8 }
 0x127   :  { %v569_v17 = vadd.f32 %v1206_v11, %v549_v54  ;;  %v616_v21 = vadd.f32 %v810_v12, %v568_v10 }
 0x128   :  { %v858_v19 = vpack.c.bf16 %v621_v15, %v620_v14  ;;  %v619_v20 = vadd.f32 %v815_v9, %v571_v16 }
 0x129   :  { %v617_v22 = vadd.f32 %v811_v13, %v569_v17 }
 0x12a   :  { %873 = vst [vmem:[%s1296_s4 + $0x38] sm:$0xff] %v858_v19   ;;  %v853_v23 = vpack.c.bf16 %v619_v20, %v618_v18 }
 0x12b   :  { %v848_v24 = vpack.c.bf16 %v617_v22, %v616_v21 }
 0x12c   :  { %872 = vst [vmem:[%s1296_s4 + $0x30] sm:$0xff] %v853_v23  }
 0x12d   :  { %871 = vst [vmem:[%s1296_s4 + $0x28] sm:$0xff] %v848_v24  }

// kernel: arcface_forward.9
= control target key start
LH: loop header
LB: loop body
LE: loop exit
PB: predicated region body
PF: predicated region fallthrough
CT: control target
= control target key end

     0   :  { %s7045_s1 = inlined_call_operand.vmem [shape: bf16[2048,512], index: 1, kind: input, shape index: {}]   ;;  %s7046_s0 = inlined_call_operand.vmem [shape: bf16[16,2048], index: 0, kind: input, shape index: {}]   ;;  %s7047_s2 = inlined_call_operand.vmem [shape: f32[2,512], index: 2, kind: input, shape index: {}]   ;;  %s7048_s3 = inlined_call_operand.vmem [shape: f32[16,512], index: 3, kind: output, shape index: {}]  }
   0x1   :  { %v4586_v0 = vld [vmem:[%s7045_s1 + $0x4] ss:$16 sps:$4 sm:$0xff]   ;;  %v4588_v1 = vld [vmem:[%s7045_s1 + $0xc] ss:$16 sps:$4 sm:$0xff]   ;;  %v4590_v2 = vld [vmem:[%s7045_s1] ss:$16 sps:$4 sm:$0xff]  }
   0x2   :  { %3182 = vmatprep.subr.bf16.mxu0 %v4586_v0  ;;  %v4591_v3 = vld [vmem:[%s7045_s1 + $0x8] ss:$16 sps:$4 sm:$0xff]   ;;  %3526 = vmatprep.subr.bf16.mxu1 %v4588_v1  ;;  %v4592_v4 = vld [vmem:[%s7045_s1 + $0x24] ss:$16 sps:$4 sm:$0xff]   ;;  %v4594_v5 = vld [vmem:[%s7045_s1 + $0x2c] ss:$16 sps:$4 sm:$0xff]  }
   0x3   :  { %3183 = vmatpush1.bf16.msra.mxu0 %v4590_v2  ;;  %3527 = vmatpush1.bf16.msra.mxu1 %v4591_v3  ;;  %v4596_v6 = vld [vmem:[%s7045_s1 + $0x20] ss:$16 sps:$4 sm:$0xff]   ;;  %v4597_v7 = vld [vmem:[%s7045_s1 + $0x28] ss:$16 sps:$4 sm:$0xff]   ;;  %v4598_v8 = vld [vmem:[%s7045_s1 + $0x44] ss:$16 sps:$4 sm:$0xff]  }
   0x4   :  { %3184 = vmatprep.subr.bf16.mxu0 %v4592_v4  ;;  %3528 = vmatprep.subr.bf16.mxu1 %v4594_v5  ;;  %v4600_v9 = vld [vmem:[%s7045_s1 + $0x4c] ss:$16 sps:$4 sm:$0xff]   ;;  %v4602_v10 = vld [vmem:[%s7045_s1 + $0x40] ss:$16 sps:$4 sm:$0xff]   ;;  %v4603_v11 = vld [vmem:[%s7045_s1 + $0x48] ss:$16 sps:$4 sm:$0xff]  }
   0x5   :  { %v4604_v12 = vld [vmem:[%s7045_s1 + $0x64] ss:$16 sps:$4 sm:$0xff]   ;;  %v4606_v13 = vld [vmem:[%s7045_s1 + $0x6c] ss:$16 sps:$4 sm:$0xff]   ;;  %v4608_v14 = vld [vmem:[%s7045_s1 + $0x60] ss:$16 sps:$4 sm:$0xff]  }
   0x6   :  { %v4609_v15 = vld [vmem:[%s7045_s1 + $0x68] ss:$16 sps:$4 sm:$0xff]   ;;  %v4610_v16 = vld [vmem:[%s7045_s1 + $0x84] ss:$16 sps:$4 sm:$0xff]   ;;  %v4612_v17 = vld [vmem:[%s7045_s1 + $0x8c] ss:$16 sps:$4 sm:$0xff]  }
   0x7   :  { %3185 = vmatpush1.bf16.msra.mxu0 %v4596_v6  ;;  %3529 = vmatpush1.bf16.msra.mxu1 %v4597_v7  ;;  %v4614_v18 = vld [vmem:[%s7045_s1 + $0x80] ss:$16 sps:$4 sm:$0xff]   ;;  %v4615_v19 = vld [vmem:[%s7045_s1 + $0x88] ss:$16 sps:$4 sm:$0xff]   ;;  %v4616_v20 = vld [vmem:[%s7045_s1 + $0xa4] ss:$16 sps:$4 sm:$0xff]  }
   0x8   :  { %3186 = vmatprep.subr.bf16.mxu0 %v4598_v8  ;;  %3530 = vmatprep.subr.bf16.mxu1 %v4600_v9  ;;  %v4618_v21 = vld [vmem:[%s7045_s1 + $0xac] ss:$16 sps:$4 sm:$0xff]   ;;  %v4620_v22 = vld [vmem:[%s7045_s1 + $0xa0] ss:$16 sps:$4 sm:$0xff]   ;;  %v4621_v23 = vld [vmem:[%s7045_s1 + $0xa8] ss:$16 sps:$4 sm:$0xff]  }
   0x9   :  { %v4622_v24 = vld [vmem:[%s7045_s1 + $0xc4] ss:$16 sps:$4 sm:$0xff]   ;;  %v4624_v25 = vld [vmem:[%s7045_s1 + $0xcc] ss:$16 sps:$4 sm:$0xff]   ;;  %v4626_v26 = vld [vmem:[%s7045_s1 + $0xc0] ss:$16 sps:$4 sm:$0xff]  }
   0xa   :  { %v4627_v27 = vld [vmem:[%s7045_s1 + $0xc8] ss:$16 sps:$4 sm:$0xff]   ;;  %v4628_v28 = vld [vmem:[%s7045_s1 + $0xe4] ss:$16 sps:$4 sm:$0xff]   ;;  %v4630_v29 = vld [vmem:[%s7045_s1 + $0xec] ss:$16 sps:$4 sm:$0xff]  }
   0xb   :  { %3187 = vmatpush1.bf16.msra.mxu0 %v4602_v10  ;;  %3531 = vmatpush1.bf16.msra.mxu1 %v4603_v11  ;;  %v4632_v30 = vld [vmem:[%s7045_s1 + $0xe0] ss:$16 sps:$4 sm:$0xff]   ;;  %v4633_v31 = vld [vmem:[%s7045_s1 + $0xe8] ss:$16 sps:$4 sm:$0xff]   ;;  %v4634_v32 = vld [vmem:[%s7045_s1 + $0x104] ss:$16 sps:$4 sm:$0xff]  }
   0xc   :  { %3188 = vmatprep.subr.bf16.mxu0 %v4604_v12  ;;  %3532 = vmatprep.subr.bf16.mxu1 %v4606_v13  ;;  %v4636_v33 = vld [vmem:[%s7045_s1 + $0x10c] ss:$16 sps:$4 sm:$0xff]   ;;  %v4638_v34 = vld [vmem:[%s7045_s1 + $0x100] ss:$16 sps:$4 sm:$0xff]   ;;  %v4639_v35 = vld [vmem:[%s7045_s1 + $0x108] ss:$16 sps:$4 sm:$0xff]  }
   0xd   :  { %v4640_v36 = vld [vmem:[%s7045_s1 + $0x124] ss:$16 sps:$4 sm:$0xff]   ;;  %v4642_v37 = vld [vmem:[%s7045_s1 + $0x12c] ss:$16 sps:$4 sm:$0xff]   ;;  %v4644_v38 = vld [vmem:[%s7045_s1 + $0x120] ss:$16 sps:$4 sm:$0xff]  }
   0xe   :  { %v4645_v39 = vld [vmem:[%s7045_s1 + $0x128] ss:$16 sps:$4 sm:$0xff]   ;;  %v4646_v40 = vld [vmem:[%s7045_s1 + $0x144] ss:$16 sps:$4 sm:$0xff]   ;;  %v4648_v41 = vld [vmem:[%s7045_s1 + $0x14c] ss:$16 sps:$4 sm:$0xff]  }
   0xf   :  { %3189 = vmatpush1.bf16.msra.mxu0 %v4608_v14  ;;  %3533 = vmatpush1.bf16.msra.mxu1 %v4609_v15  ;;  %v4650_v42 = vld [vmem:[%s7045_s1 + $0x140] ss:$16 sps:$4 sm:$0xff]   ;;  %v4651_v43 = vld [vmem:[%s7045_s1 + $0x148] ss:$16 sps:$4 sm:$0xff]   ;;  %v4652_v44 = vld [vmem:[%s7045_s1 + $0x164] ss:$16 sps:$4 sm:$0xff]  }
  0x10   :  { %3190 = vmatprep.subr.bf16.mxu0 %v4610_v16  ;;  %3534 = vmatprep.subr.bf16.mxu1 %v4612_v17  ;;  %v4654_v45 = vld [vmem:[%s7045_s1 + $0x16c] ss:$16 sps:$4 sm:$0xff]   ;;  %v14_v46 = vld [vmem:[%s7046_s0] sm:$0xff]  ;;  %v4657_v49 = vld [vmem:[%s7045_s1 + $0x168] ss:$16 sps:$4 sm:$0xff]  }
  0x11   :  { %v22_v47 = vld [vmem:[%s7046_s0 + $0x40] sm:$0xff]  ;;  %v4660_v52 = vld [vmem:[%s7045_s1 + $0x18c] ss:$16 sps:$4 sm:$0xff]   ;;  %v4663_v54 = vld [vmem:[%s7045_s1 + $0x188] ss:$16 sps:$4 sm:$0xff]  }
  0x12   :  { %v4656_v48 = vld [vmem:[%s7045_s1 + $0x160] ss:$16 sps:$4 sm:$0xff]   ;;  %v4003_v50 = vcombine.high %v14_v46, %v22_v47  ;;  %v4658_v51 = vld [vmem:[%s7045_s1 + $0x184] ss:$16 sps:$4 sm:$0xff]   ;;  %v4666_v56 = vld [vmem:[%s7045_s1 + $0x1ac] ss:$16 sps:$4 sm:$0xff]   ;;  %v4002_v5 = vcombine.low %v14_v46, %v22_v47 }
  0x13   :  { %3191 = vmatpush1.bf16.msra.mxu0 %v4614_v18  ;;  %3535 = vmatpush1.bf16.msra.mxu1 %v4615_v19  ;;  %v4662_v53 = vld [vmem:[%s7045_s1 + $0x180] ss:$16 sps:$4 sm:$0xff]   ;;  %v4664_v55 = vld [vmem:[%s7045_s1 + $0x1a4] ss:$16 sps:$4 sm:$0xff]   ;;  %v4669_v58 = vld [vmem:[%s7045_s1 + $0x1a8] ss:$16 sps:$4 sm:$0xff]  }
  0x14   :  { %3192 = vmatprep.subr.bf16.mxu0 %v4616_v20  ;;  %3536 = vmatprep.subr.bf16.mxu1 %v4618_v21  ;;  %v4668_v57 = vld [vmem:[%s7045_s1 + $0x1a0] ss:$16 sps:$4 sm:$0xff]   ;;  %v4670_v59 = vld [vmem:[%s7045_s1 + $0x1c4] ss:$16 sps:$4 sm:$0xff]   ;;  %v4672_v60 = vld [vmem:[%s7045_s1 + $0x1cc] ss:$16 sps:$4 sm:$0xff]  }
  0x15   :  { %3214 = vmatprep.mubr.bf16.mxu0 %v4003_v50  ;;  %3558 = vmatprep.mubr.bf16.mxu1 %v4003_v50  ;;  %v4674_v61 = vld [vmem:[%s7045_s1 + $0x1c0] ss:$16 sps:$4 sm:$0xff]   ;;  %v4675_v62 = vld [vmem:[%s7045_s1 + $0x1c8] ss:$16 sps:$4 sm:$0xff]   ;;  %v4676_v63 = vld [vmem:[%s7045_s1 + $0x1e4] ss:$16 sps:$4 sm:$0xff]  }
  0x16   :  { %v4678_v0 = vld [vmem:[%s7045_s1 + $0x1ec] ss:$16 sps:$4 sm:$0xff]   ;;  %v4680_v1 = vld [vmem:[%s7045_s1 + $0x1e0] ss:$16 sps:$4 sm:$0xff]   ;;  %v4681_v2 = vld [vmem:[%s7045_s1 + $0x1e8] ss:$16 sps:$4 sm:$0xff]  }
  0x17   :  { %3193 = vmatpush1.bf16.msra.mxu0 %v4620_v22  ;;  %3537 = vmatpush1.bf16.msra.mxu1 %v4621_v23  ;;  %v4684_v3 = vld [vmem:[%s7045_s1 + $0x204] ss:$16 sps:$4 sm:$0xff]   ;;  %v4687_v4 = vld [vmem:[%s7045_s1 + $0x20c] ss:$16 sps:$4 sm:$0xff]   ;;  %v4682_v6 = vld [vmem:[%s7045_s1 + $0x200] ss:$16 sps:$4 sm:$0xff]  }
  0x18   :  { %3194 = vmatprep.subr.bf16.mxu0 %v4622_v24  ;;  %3538 = vmatprep.subr.bf16.mxu1 %v4624_v25  ;;  %v4685_v7 = vld [vmem:[%s7045_s1 + $0x208] ss:$16 sps:$4 sm:$0xff]   ;;  %v4690_v8 = vld [vmem:[%s7045_s1 + $0x224] ss:$16 sps:$4 sm:$0xff]   ;;  %v4693_v9 = vld [vmem:[%s7045_s1 + $0x22c] ss:$16 sps:$4 sm:$0xff]  }
  0x19   :  { %v4688_v10 = vld [vmem:[%s7045_s1 + $0x220] ss:$16 sps:$4 sm:$0xff]   ;;  %v4691_v11 = vld [vmem:[%s7045_s1 + $0x228] ss:$16 sps:$4 sm:$0xff]   ;;  %v4696_v12 = vld [vmem:[%s7045_s1 + $0x244] ss:$16 sps:$4 sm:$0xff]  }
  0x1a   :  { %v4699_v13 = vld [vmem:[%s7045_s1 + $0x24c] ss:$16 sps:$4 sm:$0xff]   ;;  %v4694_v14 = vld [vmem:[%s7045_s1 + $0x240] ss:$16 sps:$4 sm:$0xff]   ;;  %v4697_v15 = vld [vmem:[%s7045_s1 + $0x248] ss:$16 sps:$4 sm:$0xff]  }
  0x1b   :  { %3195 = vmatpush1.bf16.msra.mxu0 %v4626_v26  ;;  %3539 = vmatpush1.bf16.msra.mxu1 %v4627_v27  ;;  %v4702_v16 = vld [vmem:[%s7045_s1 + $0x264] ss:$16 sps:$4 sm:$0xff]   ;;  %v4705_v17 = vld [vmem:[%s7045_s1 + $0x26c] ss:$16 sps:$4 sm:$0xff]   ;;  %v4700_v18 = vld [vmem:[%s7045_s1 + $0x260] ss:$16 sps:$4 sm:$0xff]  }
  0x1c   :  { %3196 = vmatprep.subr.bf16.mxu0 %v4628_v28  ;;  %3540 = vmatprep.subr.bf16.mxu1 %v4630_v29  ;;  %v4703_v19 = vld [vmem:[%s7045_s1 + $0x268] ss:$16 sps:$4 sm:$0xff]   ;;  %v4708_v20 = vld [vmem:[%s7045_s1 + $0x284] ss:$16 sps:$4 sm:$0xff]   ;;  %v4711_v21 = vld [vmem:[%s7045_s1 + $0x28c] ss:$16 sps:$4 sm:$0xff]  }
  0x1d   :  { %v4706_v22 = vld [vmem:[%s7045_s1 + $0x280] ss:$16 sps:$4 sm:$0xff]   ;;  %v4709_v23 = vld [vmem:[%s7045_s1 + $0x288] ss:$16 sps:$4 sm:$0xff]   ;;  %v4714_v24 = vld [vmem:[%s7045_s1 + $0x2a4] ss:$16 sps:$4 sm:$0xff]  }
  0x1e   :  { %v4717_v25 = vld [vmem:[%s7045_s1 + $0x2ac] ss:$16 sps:$4 sm:$0xff]   ;;  %v4712_v26 = vld [vmem:[%s7045_s1 + $0x2a0] ss:$16 sps:$4 sm:$0xff]   ;;  %v4715_v27 = vld [vmem:[%s7045_s1 + $0x2a8] ss:$16 sps:$4 sm:$0xff]  }
  0x1f   :  { %3197 = vmatpush1.bf16.msra.mxu0 %v4632_v30  ;;  %3541 = vmatpush1.bf16.msra.mxu1 %v4633_v31  ;;  %v4720_v28 = vld [vmem:[%s7045_s1 + $0x2c4] ss:$16 sps:$4 sm:$0xff]   ;;  %v4723_v29 = vld [vmem:[%s7045_s1 + $0x2cc] ss:$16 sps:$4 sm:$0xff]   ;;  %v4739_v46 = vld [vmem:[%s7045_s1 + $0x328] ss:$16 sps:$4 sm:$0xff]  }
  0x20   :  { %3198 = vmatprep.subr.bf16.mxu0 %v4634_v32  ;;  %3542 = vmatprep.subr.bf16.mxu1 %v4636_v33  ;;  %v5657_v30 = vld [vmem:[%s7046_s0 + $0x8] sm:$0xff]  ;;  %v4718_v32 = vld [vmem:[%s7045_s1 + $0x2c0] ss:$16 sps:$4 sm:$0xff]   ;;  %v4744_v47 = vld [vmem:[%s7045_s1 + $0x344] ss:$16 sps:$4 sm:$0xff]  }
  0x21   :  { %v5662_v31 = vld [vmem:[%s7046_s0 + $0x48] sm:$0xff] }
  0x22   :  { %v4721_v33 = vld [vmem:[%s7045_s1 + $0x2c8] ss:$16 sps:$4 sm:$0xff]  }
  0x23   :  { %3199 = vmatpush1.bf16.msra.mxu0 %v4638_v34  ;;  %3543 = vmatpush1.bf16.msra.mxu1 %v4639_v35  ;;  %v4005_v34 = vcombine.high %v5657_v30, %v5662_v31  ;;  %v4726_v35 = vld [vmem:[%s7045_s1 + $0x2e4] ss:$16 sps:$4 sm:$0xff]   ;;  %v4745_v50 = vld [vmem:[%s7045_s1 + $0x348] ss:$16 sps:$4 sm:$0xff]  }
  0x24   :  { %3200 = vmatprep.subr.bf16.mxu0 %v4640_v36  ;;  %3544 = vmatprep.subr.bf16.mxu1 %v4642_v37  ;;  %v4729_v36 = vld [vmem:[%s7045_s1 + $0x2ec] ss:$16 sps:$4 sm:$0xff]   ;;  %v4724_v37 = vld [vmem:[%s7045_s1 + $0x2e0] ss:$16 sps:$4 sm:$0xff]  }
  0x27   :  { %3201 = vmatpush1.bf16.msra.mxu0 %v4644_v38  ;;  %3545 = vmatpush1.bf16.msra.mxu1 %v4645_v39  ;;  %v4727_v38 = vld [vmem:[%s7045_s1 + $0x2e8] ss:$16 sps:$4 sm:$0xff]   ;;  %v4732_v39 = vld [vmem:[%s7045_s1 + $0x304] ss:$16 sps:$4 sm:$0xff]  }
  0x28   :  { %3202 = vmatprep.subr.bf16.mxu0 %v4646_v40  ;;  %3546 = vmatprep.subr.bf16.mxu1 %v4648_v41  ;;  %v4735_v40 = vld [vmem:[%s7045_s1 + $0x30c] ss:$16 sps:$4 sm:$0xff]   ;;  %v4730_v41 = vld [vmem:[%s7045_s1 + $0x300] ss:$16 sps:$4 sm:$0xff]  }
  0x2b   :  { %3203 = vmatpush1.bf16.msra.mxu0 %v4650_v42  ;;  %3547 = vmatpush1.bf16.msra.mxu1 %v4651_v43  ;;  %v4733_v42 = vld [vmem:[%s7045_s1 + $0x308] ss:$16 sps:$4 sm:$0xff]   ;;  %v4738_v43 = vld [vmem:[%s7045_s1 + $0x324] ss:$16 sps:$4 sm:$0xff]  }
  0x2c   :  { %3204 = vmatprep.subr.bf16.mxu0 %v4652_v44  ;;  %3548 = vmatprep.subr.bf16.mxu1 %v4654_v45  ;;  %v4741_v44 = vld [vmem:[%s7045_s1 + $0x32c] ss:$16 sps:$4 sm:$0xff]   ;;  %v4736_v45 = vld [vmem:[%s7045_s1 + $0x320] ss:$16 sps:$4 sm:$0xff]  }
  0x2f   :  { %3205 = vmatpush1.bf16.msra.mxu0 %v4656_v48  ;;  %3549 = vmatpush1.bf16.msra.mxu1 %v4657_v49  ;;  %v4747_v48 = vld [vmem:[%s7045_s1 + $0x34c] ss:$16 sps:$4 sm:$0xff]   ;;  %v4742_v49 = vld [vmem:[%s7045_s1 + $0x340] ss:$16 sps:$4 sm:$0xff]  }
  0x30   :  { %3206 = vmatprep.subr.bf16.mxu0 %v4658_v51  ;;  %3550 = vmatprep.subr.bf16.mxu1 %v4660_v52  ;;  %v4750_v51 = vld [vmem:[%s7045_s1 + $0x364] ss:$16 sps:$4 sm:$0xff]   ;;  %v4753_v52 = vld [vmem:[%s7045_s1 + $0x36c] ss:$16 sps:$4 sm:$0xff]  }
  0x33   :  { %3207 = vmatpush1.bf16.msra.mxu0 %v4662_v53  ;;  %3551 = vmatpush1.bf16.msra.mxu1 %v4663_v54  ;;  %v4748_v53 = vld [vmem:[%s7045_s1 + $0x360] ss:$16 sps:$4 sm:$0xff]   ;;  %v4751_v54 = vld [vmem:[%s7045_s1 + $0x368] ss:$16 sps:$4 sm:$0xff]  }
  0x34   :  { %3208 = vmatprep.subr.bf16.mxu0 %v4664_v55  ;;  %3552 = vmatprep.subr.bf16.mxu1 %v4666_v56  ;;  %v4756_v55 = vld [vmem:[%s7045_s1 + $0x384] ss:$16 sps:$4 sm:$0xff]   ;;  %v4759_v56 = vld [vmem:[%s7045_s1 + $0x38c] ss:$16 sps:$4 sm:$0xff]  }
  0x37   :  { %3209 = vmatpush1.bf16.msra.mxu0 %v4668_v57  ;;  %3553 = vmatpush1.bf16.msra.mxu1 %v4669_v58  ;;  %v4754_v57 = vld [vmem:[%s7045_s1 + $0x380] ss:$16 sps:$4 sm:$0xff]   ;;  %v4757_v58 = vld [vmem:[%s7045_s1 + $0x388] ss:$16 sps:$4 sm:$0xff]  }
  0x38   :  { %3210 = vmatprep.subr.bf16.mxu0 %v4670_v59  ;;  %3554 = vmatprep.subr.bf16.mxu1 %v4672_v60  ;;  %v4762_v59 = vld [vmem:[%s7045_s1 + $0x3a4] ss:$16 sps:$4 sm:$0xff]   ;;  %v4765_v60 = vld [vmem:[%s7045_s1 + $0x3ac] ss:$16 sps:$4 sm:$0xff]  }
  0x3b   :  { %3211 = vmatpush1.bf16.msra.mxu0 %v4674_v61  ;;  %3555 = vmatpush1.bf16.msra.mxu1 %v4675_v62  ;;  %v4760_v61 = vld [vmem:[%s7045_s1 + $0x3a0] ss:$16 sps:$4 sm:$0xff]   ;;  %v4763_v62 = vld [vmem:[%s7045_s1 + $0x3a8] ss:$16 sps:$4 sm:$0xff]  }
  0x3c   :  { %3212 = vmatprep.subr.bf16.mxu0 %v4676_v63  ;;  %3556 = vmatprep.subr.bf16.mxu1 %v4678_v0  ;;  %v4768_v63 = vld [vmem:[%s7045_s1 + $0x3c4] ss:$16 sps:$4 sm:$0xff]   ;;  %v4771_v0 = vld [vmem:[%s7045_s1 + $0x3cc] ss:$16 sps:$4 sm:$0xff]  }
  0x3f   :  { %3213 = vmatpush1.bf16.msra.mxu0 %v4680_v1  ;;  %3557 = vmatpush1.bf16.msra.mxu1 %v4681_v2  ;;  %v4766_v1 = vld [vmem:[%s7045_s1 + $0x3c0] ss:$16 sps:$4 sm:$0xff]   ;;  %v4769_v2 = vld [vmem:[%s7045_s1 + $0x3c8] ss:$16 sps:$4 sm:$0xff]  }
  0x40   :  { %3225 = vmatprep.subr.bf16.mxu0 %v4684_v3  ;;  %3569 = vmatprep.subr.bf16.mxu1 %v4687_v4  ;;  %v4774_v3 = vld [vmem:[%s7045_s1 + $0x3e4] ss:$16 sps:$4 sm:$0xff]   ;;  %v4777_v4 = vld [vmem:[%s7045_s1 + $0x3ec] ss:$16 sps:$4 sm:$0xff]  }
  0x42   :  { %3215 = vmatmul.mubr.bf16.vlgmr.msra.gmra.mrb[0].mxu0 %v4002_v5  ;;  %3559 = vmatmul.mubr.bf16.vlgmr.msra.gmra.mrb[0].mxu1 %v4002_v5  ;;  %v4772_v5 = vld [vmem:[%s7045_s1 + $0x3e0] ss:$16 sps:$4 sm:$0xff]  }
  0x43   :  { %3226 = vmatpush1.bf16.msra.mxu0 %v4682_v6  ;;  %3570 = vmatpush1.bf16.msra.mxu1 %v4685_v7  ;;  %v4775_v6 = vld [vmem:[%s7045_s1 + $0x3e8] ss:$16 sps:$4 sm:$0xff]   ;;  %v4780_v7 = vld [vmem:[%s7045_s1 + $0x404] ss:$16 sps:$4 sm:$0xff]  }
  0x44   :  { %3227 = vmatprep.subr.bf16.mxu0 %v4690_v8  ;;  %3571 = vmatprep.subr.bf16.mxu1 %v4693_v9  ;;  %v4783_v8 = vld [vmem:[%s7045_s1 + $0x40c] ss:$16 sps:$4 sm:$0xff]   ;;  %v4004_v9 = vcombine.low %v5657_v30, %v5662_v31  ;;  %v4805_v30 = vld [vmem:[%s7045_s1 + $0x488] ss:$16 sps:$4 sm:$0xff]   ;;  %v4810_v31 = vld [vmem:[%s7045_s1 + $0x4a4] ss:$16 sps:$4 sm:$0xff]  }
  0x45   :  { %3257 = vmatprep.mubr.bf16.mxu0 %v4005_v34  ;;  %3601 = vmatprep.mubr.bf16.mxu1 %v4005_v34  ;;  %v4811_v34 = vld [vmem:[%s7045_s1 + $0x4a8] ss:$16 sps:$4 sm:$0xff]  }
  0x47   :  { %3228 = vmatpush1.bf16.msra.mxu0 %v4688_v10  ;;  %3572 = vmatpush1.bf16.msra.mxu1 %v4691_v11  ;;  %v4778_v10 = vld [vmem:[%s7045_s1 + $0x400] ss:$16 sps:$4 sm:$0xff]   ;;  %v4781_v11 = vld [vmem:[%s7045_s1 + $0x408] ss:$16 sps:$4 sm:$0xff]  }
  0x48   :  { %3229 = vmatprep.subr.bf16.mxu0 %v4696_v12  ;;  %3573 = vmatprep.subr.bf16.mxu1 %v4699_v13  ;;  %v4786_v12 = vld [vmem:[%s7045_s1 + $0x424] ss:$16 sps:$4 sm:$0xff]   ;;  %v4789_v13 = vld [vmem:[%s7045_s1 + $0x42c] ss:$16 sps:$4 sm:$0xff]  }
  0x4b   :  { %3230 = vmatpush1.bf16.msra.mxu0 %v4694_v14  ;;  %3574 = vmatpush1.bf16.msra.mxu1 %v4697_v15  ;;  %v5803_v14 = vld [vmem:[%s7046_s0 + $0x10] sm:$0xff] }
  0x4c   :  { %3231 = vmatprep.subr.bf16.mxu0 %v4702_v16  ;;  %3575 = vmatprep.subr.bf16.mxu1 %v4705_v17  ;;  %v5808_v15 = vld [vmem:[%s7046_s0 + $0x50] sm:$0xff] }
  0x4d   :  { %v4007_v16 = vcombine.high %v5803_v14, %v5808_v15  ;;  %v4784_v17 = vld [vmem:[%s7045_s1 + $0x420] ss:$16 sps:$4 sm:$0xff]  }
  0x4f   :  { %3232 = vmatpush1.bf16.msra.mxu0 %v4700_v18  ;;  %3576 = vmatpush1.bf16.msra.mxu1 %v4703_v19  ;;  %v4787_v18 = vld [vmem:[%s7045_s1 + $0x428] ss:$16 sps:$4 sm:$0xff]   ;;  %v4792_v19 = vld [vmem:[%s7045_s1 + $0x444] ss:$16 sps:$4 sm:$0xff]  }
  0x50   :  { %3233 = vmatprep.subr.bf16.mxu0 %v4708_v20  ;;  %3577 = vmatprep.subr.bf16.mxu1 %v4711_v21  ;;  %v4795_v20 = vld [vmem:[%s7045_s1 + $0x44c] ss:$16 sps:$4 sm:$0xff]   ;;  %v4790_v21 = vld [vmem:[%s7045_s1 + $0x440] ss:$16 sps:$4 sm:$0xff]  }
  0x53   :  { %3234 = vmatpush1.bf16.msra.mxu0 %v4706_v22  ;;  %3578 = vmatpush1.bf16.msra.mxu1 %v4709_v23  ;;  %v4793_v22 = vld [vmem:[%s7045_s1 + $0x448] ss:$16 sps:$4 sm:$0xff]   ;;  %v4798_v23 = vld [vmem:[%s7045_s1 + $0x464] ss:$16 sps:$4 sm:$0xff]  }
  0x54   :  { %3235 = vmatprep.subr.bf16.mxu0 %v4714_v24  ;;  %3579 = vmatprep.subr.bf16.mxu1 %v4717_v25  ;;  %v4801_v24 = vld [vmem:[%s7045_s1 + $0x46c] ss:$16 sps:$4 sm:$0xff]   ;;  %v4796_v25 = vld [vmem:[%s7045_s1 + $0x460] ss:$16 sps:$4 sm:$0xff]  }
  0x57   :  { %3236 = vmatpush1.bf16.msra.mxu0 %v4712_v26  ;;  %3580 = vmatpush1.bf16.msra.mxu1 %v4715_v27  ;;  %v4799_v26 = vld [vmem:[%s7045_s1 + $0x468] ss:$16 sps:$4 sm:$0xff]   ;;  %v4804_v27 = vld [vmem:[%s7045_s1 + $0x484] ss:$16 sps:$4 sm:$0xff]  }
  0x58   :  { %3237 = vmatprep.subr.bf16.mxu0 %v4720_v28  ;;  %3581 = vmatprep.subr.bf16.mxu1 %v4723_v29  ;;  %v4807_v28 = vld [vmem:[%s7045_s1 + $0x48c] ss:$16 sps:$4 sm:$0xff]   ;;  %v4802_v29 = vld [vmem:[%s7045_s1 + $0x480] ss:$16 sps:$4 sm:$0xff]  }
  0x5b   :  { %3238 = vmatpush1.bf16.msra.mxu0 %v4718_v32  ;;  %3582 = vmatpush1.bf16.msra.mxu1 %v4721_v33  ;;  %v4813_v32 = vld [vmem:[%s7045_s1 + $0x4ac] ss:$16 sps:$4 sm:$0xff]   ;;  %v4808_v33 = vld [vmem:[%s7045_s1 + $0x4a0] ss:$16 sps:$4 sm:$0xff]  }
  0x5c   :  { %3239 = vmatprep.subr.bf16.mxu0 %v4726_v35  ;;  %3583 = vmatprep.subr.bf16.mxu1 %v4729_v36  ;;  %v4816_v35 = vld [vmem:[%s7045_s1 + $0x4c4] ss:$16 sps:$4 sm:$0xff]   ;;  %v4819_v36 = vld [vmem:[%s7045_s1 + $0x4cc] ss:$16 sps:$4 sm:$0xff]  }
  0x5f   :  { %3240 = vmatpush1.bf16.msra.mxu0 %v4724_v37  ;;  %3584 = vmatpush1.bf16.msra.mxu1 %v4727_v38  ;;  %v4814_v37 = vld [vmem:[%s7045_s1 + $0x4c0] ss:$16 sps:$4 sm:$0xff]   ;;  %v4817_v38 = vld [vmem:[%s7045_s1 + $0x4c8] ss:$16 sps:$4 sm:$0xff]  }
  0x60   :  { %3241 = vmatprep.subr.bf16.mxu0 %v4732_v39  ;;  %3585 = vmatprep.subr.bf16.mxu1 %v4735_v40  ;;  %v4822_v39 = vld [vmem:[%s7045_s1 + $0x4e4] ss:$16 sps:$4 sm:$0xff]   ;;  %v4825_v40 = vld [vmem:[%s7045_s1 + $0x4ec] ss:$16 sps:$4 sm:$0xff]  }
  0x63   :  { %3242 = vmatpush1.bf16.msra.mxu0 %v4730_v41  ;;  %3586 = vmatpush1.bf16.msra.mxu1 %v4733_v42  ;;  %v4820_v41 = vld [vmem:[%s7045_s1 + $0x4e0] ss:$16 sps:$4 sm:$0xff]   ;;  %v4823_v42 = vld [vmem:[%s7045_s1 + $0x4e8] ss:$16 sps:$4 sm:$0xff]  }
  0x64   :  { %3243 = vmatprep.subr.bf16.mxu0 %v4738_v43  ;;  %3587 = vmatprep.subr.bf16.mxu1 %v4741_v44  ;;  %v4828_v43 = vld [vmem:[%s7045_s1 + $0x504] ss:$16 sps:$4 sm:$0xff]   ;;  %v4831_v44 = vld [vmem:[%s7045_s1 + $0x50c] ss:$16 sps:$4 sm:$0xff]  }
  0x67   :  { %3244 = vmatpush1.bf16.msra.mxu0 %v4736_v45  ;;  %3588 = vmatpush1.bf16.msra.mxu1 %v4739_v46  ;;  %v4826_v45 = vld [vmem:[%s7045_s1 + $0x500] ss:$16 sps:$4 sm:$0xff]   ;;  %v4829_v46 = vld [vmem:[%s7045_s1 + $0x508] ss:$16 sps:$4 sm:$0xff]  }
  0x68   :  { %3245 = vmatprep.subr.bf16.mxu0 %v4744_v47  ;;  %3589 = vmatprep.subr.bf16.mxu1 %v4747_v48  ;;  %v4834_v47 = vld [vmem:[%s7045_s1 + $0x524] ss:$16 sps:$4 sm:$0xff]   ;;  %v4837_v48 = vld [vmem:[%s7045_s1 + $0x52c] ss:$16 sps:$4 sm:$0xff]  }
  0x6b   :  { %3246 = vmatpush1.bf16.msra.mxu0 %v4742_v49  ;;  %3590 = vmatpush1.bf16.msra.mxu1 %v4745_v50  ;;  %v4832_v49 = vld [vmem:[%s7045_s1 + $0x520] ss:$16 sps:$4 sm:$0xff]   ;;  %v4835_v50 = vld [vmem:[%s7045_s1 + $0x528] ss:$16 sps:$4 sm:$0xff]  }
  0x6c   :  { %3247 = vmatprep.subr.bf16.mxu0 %v4750_v51  ;;  %3591 = vmatprep.subr.bf16.mxu1 %v4753_v52  ;;  %v4840_v51 = vld [vmem:[%s7045_s1 + $0x544] ss:$16 sps:$4 sm:$0xff]   ;;  %v4843_v52 = vld [vmem:[%s7045_s1 + $0x54c] ss:$16 sps:$4 sm:$0xff]  }
  0x6f   :  { %3248 = vmatpush1.bf16.msra.mxu0 %v4748_v53  ;;  %3592 = vmatpush1.bf16.msra.mxu1 %v4751_v54  ;;  %v4838_v53 = vld [vmem:[%s7045_s1 + $0x540] ss:$16 sps:$4 sm:$0xff]   ;;  %v4841_v54 = vld [vmem:[%s7045_s1 + $0x548] ss:$16 sps:$4 sm:$0xff]  }
  0x70   :  { %3249 = vmatprep.subr.bf16.mxu0 %v4756_v55  ;;  %3593 = vmatprep.subr.bf16.mxu1 %v4759_v56  ;;  %v4846_v55 = vld [vmem:[%s7045_s1 + $0x564] ss:$16 sps:$4 sm:$0xff]   ;;  %v4849_v56 = vld [vmem:[%s7045_s1 + $0x56c] ss:$16 sps:$4 sm:$0xff]  }
  0x73   :  { %3250 = vmatpush1.bf16.msra.mxu0 %v4754_v57  ;;  %3594 = vmatpush1.bf16.msra.mxu1 %v4757_v58  ;;  %v4844_v57 = vld [vmem:[%s7045_s1 + $0x560] ss:$16 sps:$4 sm:$0xff]   ;;  %v4847_v58 = vld [vmem:[%s7045_s1 + $0x568] ss:$16 sps:$4 sm:$0xff]  }
  0x74   :  { %3251 = vmatprep.subr.bf16.mxu0 %v4762_v59  ;;  %3595 = vmatprep.subr.bf16.mxu1 %v4765_v60  ;;  %v4852_v59 = vld [vmem:[%s7045_s1 + $0x584] ss:$16 sps:$4 sm:$0xff]   ;;  %v4855_v60 = vld [vmem:[%s7045_s1 + $0x58c] ss:$16 sps:$4 sm:$0xff]  }
  0x77   :  { %3252 = vmatpush1.bf16.msra.mxu0 %v4760_v61  ;;  %3596 = vmatpush1.bf16.msra.mxu1 %v4763_v62  ;;  %v4850_v61 = vld [vmem:[%s7045_s1 + $0x580] ss:$16 sps:$4 sm:$0xff]   ;;  %v4853_v62 = vld [vmem:[%s7045_s1 + $0x588] ss:$16 sps:$4 sm:$0xff]  }
  0x78   :  { %3253 = vmatprep.subr.bf16.mxu0 %v4768_v63  ;;  %3597 = vmatprep.subr.bf16.mxu1 %v4771_v0  ;;  %v4858_v63 = vld [vmem:[%s7045_s1 + $0x5a4] ss:$16 sps:$4 sm:$0xff]   ;;  %v4861_v0 = vld [vmem:[%s7045_s1 + $0x5ac] ss:$16 sps:$4 sm:$0xff]  }
  0x7b   :  { %3254 = vmatpush1.bf16.msra.mxu0 %v4766_v1  ;;  %3598 = vmatpush1.bf16.msra.mxu1 %v4769_v2  ;;  %v4856_v1 = vld [vmem:[%s7045_s1 + $0x5a0] ss:$16 sps:$4 sm:$0xff]   ;;  %v4859_v2 = vld [vmem:[%s7045_s1 + $0x5a8] ss:$16 sps:$4 sm:$0xff]  }
  0x7c   :  { %3255 = vmatprep.subr.bf16.mxu0 %v4774_v3  ;;  %3599 = vmatprep.subr.bf16.mxu1 %v4777_v4  ;;  %v4864_v3 = vld [vmem:[%s7045_s1 + $0x5c4] ss:$16 sps:$4 sm:$0xff]   ;;  %v4867_v4 = vld [vmem:[%s7045_s1 + $0x5cc] ss:$16 sps:$4 sm:$0xff]  }
  0x7f   :  { %3256 = vmatpush1.bf16.msra.mxu0 %v4772_v5  ;;  %3600 = vmatpush1.bf16.msra.mxu1 %v4775_v6  ;;  %v4862_v5 = vld [vmem:[%s7045_s1 + $0x5c0] ss:$16 sps:$4 sm:$0xff]   ;;  %v4865_v6 = vld [vmem:[%s7045_s1 + $0x5c8] ss:$16 sps:$4 sm:$0xff]  }
  0x80   :  { %3268 = vmatprep.subr.bf16.mxu0 %v4780_v7  ;;  %3612 = vmatprep.subr.bf16.mxu1 %v4783_v8  ;;  %v4870_v7 = vld [vmem:[%s7045_s1 + $0x5e4] ss:$16 sps:$4 sm:$0xff]   ;;  %v4873_v8 = vld [vmem:[%s7045_s1 + $0x5ec] ss:$16 sps:$4 sm:$0xff]  }
  0x82   :  { %3258 = vmatmul.mubr.bf16.vlgmr.msra.gmra.mrb[0].mxu0 %v4004_v9  ;;  %3602 = vmatmul.mubr.bf16.vlgmr.msra.gmra.mrb[0].mxu1 %v4004_v9  ;;  %v4868_v9 = vld [vmem:[%s7045_s1 + $0x5e0] ss:$16 sps:$4 sm:$0xff]  }
  0x83   :  { %3269 = vmatpush1.bf16.msra.mxu0 %v4778_v10  ;;  %3613 = vmatpush1.bf16.msra.mxu1 %v4781_v11  ;;  %v4871_v10 = vld [vmem:[%s7045_s1 + $0x5e8] ss:$16 sps:$4 sm:$0xff]   ;;  %v4876_v11 = vld [vmem:[%s7045_s1 + $0x604] ss:$16 sps:$4 sm:$0xff]  }
  0x84   :  { %3270 = vmatprep.subr.bf16.mxu0 %v4786_v12  ;;  %3614 = vmatprep.subr.bf16.mxu1 %v4789_v13  ;;  %v4879_v12 = vld [vmem:[%s7045_s1 + $0x60c] ss:$16 sps:$4 sm:$0xff]   ;;  %v4874_v13 = vld [vmem:[%s7045_s1 + $0x600] ss:$16 sps:$4 sm:$0xff]  }
  0x85   :  { %3300 = vmatprep.mubr.bf16.mxu0 %v4007_v16  ;;  %3644 = vmatprep.mubr.bf16.mxu1 %v4007_v16  ;;  %v4877_v16 = vld [vmem:[%s7045_s1 + $0x608] ss:$16 sps:$4 sm:$0xff]  }
  0x87   :  { %3271 = vmatpush1.bf16.msra.mxu0 %v4784_v17  ;;  %3615 = vmatpush1.bf16.msra.mxu1 %v4787_v18  ;;  %v4006_v17 = vcombine.low %v5803_v14, %v5808_v15  ;;  %v6003_v18 = vld [vmem:[%s7046_s0 + $0x18] sm:$0xff] }
  0x88   :  { %3272 = vmatprep.subr.bf16.mxu0 %v4792_v19  ;;  %3616 = vmatprep.subr.bf16.mxu1 %v4795_v20  ;;  %v6008_v19 = vld [vmem:[%s7046_s0 + $0x58] sm:$0xff]  ;;  %v4882_v20 = vld [vmem:[%s7045_s1 + $0x624] ss:$16 sps:$4 sm:$0xff]  }
  0x89   :  { %v4885_v14 = vld [vmem:[%s7045_s1 + $0x62c] ss:$16 sps:$4 sm:$0xff]   ;;  %v4009_v15 = vcombine.high %v6003_v18, %v6008_v19 }
  0x8b   :  { %3273 = vmatpush1.bf16.msra.mxu0 %v4790_v21  ;;  %3617 = vmatpush1.bf16.msra.mxu1 %v4793_v22  ;;  %v4880_v21 = vld [vmem:[%s7045_s1 + $0x620] ss:$16 sps:$4 sm:$0xff]   ;;  %v4883_v22 = vld [vmem:[%s7045_s1 + $0x628] ss:$16 sps:$4 sm:$0xff]  }
  0x8c   :  { %3274 = vmatprep.subr.bf16.mxu0 %v4798_v23  ;;  %3618 = vmatprep.subr.bf16.mxu1 %v4801_v24  ;;  %v4888_v23 = vld [vmem:[%s7045_s1 + $0x644] ss:$16 sps:$4 sm:$0xff]   ;;  %v4891_v24 = vld [vmem:[%s7045_s1 + $0x64c] ss:$16 sps:$4 sm:$0xff]  }
  0x8f   :  { %3275 = vmatpush1.bf16.msra.mxu0 %v4796_v25  ;;  %3619 = vmatpush1.bf16.msra.mxu1 %v4799_v26  ;;  %v4886_v25 = vld [vmem:[%s7045_s1 + $0x640] ss:$16 sps:$4 sm:$0xff]   ;;  %v4889_v26 = vld [vmem:[%s7045_s1 + $0x648] ss:$16 sps:$4 sm:$0xff]  }
  0x90   :  { %3276 = vmatprep.subr.bf16.mxu0 %v4804_v27  ;;  %3620 = vmatprep.subr.bf16.mxu1 %v4807_v28  ;;  %v4894_v27 = vld [vmem:[%s7045_s1 + $0x664] ss:$16 sps:$4 sm:$0xff]   ;;  %v4897_v28 = vld [vmem:[%s7045_s1 + $0x66c] ss:$16 sps:$4 sm:$0xff]  }
  0x93   :  { %3277 = vmatpush1.bf16.msra.mxu0 %v4802_v29  ;;  %3621 = vmatpush1.bf16.msra.mxu1 %v4805_v30  ;;  %v4892_v29 = vld [vmem:[%s7045_s1 + $0x660] ss:$16 sps:$4 sm:$0xff]   ;;  %v4895_v30 = vld [vmem:[%s7045_s1 + $0x668] ss:$16 sps:$4 sm:$0xff]  }
  0x94   :  { %3278 = vmatprep.subr.bf16.mxu0 %v4810_v31  ;;  %3622 = vmatprep.subr.bf16.mxu1 %v4813_v32  ;;  %v4900_v31 = vld [vmem:[%s7045_s1 + $0x684] ss:$16 sps:$4 sm:$0xff]   ;;  %v4903_v32 = vld [vmem:[%s7045_s1 + $0x68c] ss:$16 sps:$4 sm:$0xff]  }
  0x97   :  { %3279 = vmatpush1.bf16.msra.mxu0 %v4808_v33  ;;  %3623 = vmatpush1.bf16.msra.mxu1 %v4811_v34  ;;  %v4898_v33 = vld [vmem:[%s7045_s1 + $0x680] ss:$16 sps:$4 sm:$0xff]   ;;  %v4901_v34 = vld [vmem:[%s7045_s1 + $0x688] ss:$16 sps:$4 sm:$0xff]  }
  0x98   :  { %3280 = vmatprep.subr.bf16.mxu0 %v4816_v35  ;;  %3624 = vmatprep.subr.bf16.mxu1 %v4819_v36  ;;  %v4906_v35 = vld [vmem:[%s7045_s1 + $0x6a4] ss:$16 sps:$4 sm:$0xff]   ;;  %v4909_v36 = vld [vmem:[%s7045_s1 + $0x6ac] ss:$16 sps:$4 sm:$0xff]  }
  0x9b   :  { %3281 = vmatpush1.bf16.msra.mxu0 %v4814_v37  ;;  %3625 = vmatpush1.bf16.msra.mxu1 %v4817_v38  ;;  %v4904_v37 = vld [vmem:[%s7045_s1 + $0x6a0] ss:$16 sps:$4 sm:$0xff]   ;;  %v4907_v38 = vld [vmem:[%s7045_s1 + $0x6a8] ss:$16 sps:$4 sm:$0xff]  }
  0x9c   :  { %3282 = vmatprep.subr.bf16.mxu0 %v4822_v39  ;;  %3626 = vmatprep.subr.bf16.mxu1 %v4825_v40  ;;  %v4912_v39 = vld [vmem:[%s7045_s1 + $0x6c4] ss:$16 sps:$4 sm:$0xff]   ;;  %v4915_v40 = vld [vmem:[%s7045_s1 + $0x6cc] ss:$16 sps:$4 sm:$0xff]  }
  0x9f   :  { %3283 = vmatpush1.bf16.msra.mxu0 %v4820_v41  ;;  %3627 = vmatpush1.bf16.msra.mxu1 %v4823_v42  ;;  %v4910_v41 = vld [vmem:[%s7045_s1 + $0x6c0] ss:$16 sps:$4 sm:$0xff]   ;;  %v4913_v42 = vld [vmem:[%s7045_s1 + $0x6c8] ss:$16 sps:$4 sm:$0xff]  }
  0xa0   :  { %3284 = vmatprep.subr.bf16.mxu0 %v4828_v43  ;;  %3628 = vmatprep.subr.bf16.mxu1 %v4831_v44  ;;  %v4918_v43 = vld [vmem:[%s7045_s1 + $0x6e4] ss:$16 sps:$4 sm:$0xff]   ;;  %v4921_v44 = vld [vmem:[%s7045_s1 + $0x6ec] ss:$16 sps:$4 sm:$0xff]  }
  0xa3   :  { %3285 = vmatpush1.bf16.msra.mxu0 %v4826_v45  ;;  %3629 = vmatpush1.bf16.msra.mxu1 %v4829_v46  ;;  %v4916_v45 = vld [vmem:[%s7045_s1 + $0x6e0] ss:$16 sps:$4 sm:$0xff]   ;;  %v4919_v46 = vld [vmem:[%s7045_s1 + $0x6e8] ss:$16 sps:$4 sm:$0xff]  }
  0xa4   :  { %3286 = vmatprep.subr.bf16.mxu0 %v4834_v47  ;;  %3630 = vmatprep.subr.bf16.mxu1 %v4837_v48  ;;  %v4924_v47 = vld [vmem:[%s7045_s1 + $0x704] ss:$16 sps:$4 sm:$0xff]   ;;  %v4927_v48 = vld [vmem:[%s7045_s1 + $0x70c] ss:$16 sps:$4 sm:$0xff]  }
  0xa7   :  { %3287 = vmatpush1.bf16.msra.mxu0 %v4832_v49  ;;  %3631 = vmatpush1.bf16.msra.mxu1 %v4835_v50  ;;  %v4922_v49 = vld [vmem:[%s7045_s1 + $0x700] ss:$16 sps:$4 sm:$0xff]   ;;  %v4925_v50 = vld [vmem:[%s7045_s1 + $0x708] ss:$16 sps:$4 sm:$0xff]  }
  0xa8   :  { %3288 = vmatprep.subr.bf16.mxu0 %v4840_v51  ;;  %3632 = vmatprep.subr.bf16.mxu1 %v4843_v52  ;;  %v4930_v51 = vld [vmem:[%s7045_s1 + $0x724] ss:$16 sps:$4 sm:$0xff]   ;;  %v4933_v52 = vld [vmem:[%s7045_s1 + $0x72c] ss:$16 sps:$4 sm:$0xff]  }
  0xab   :  { %3289 = vmatpush1.bf16.msra.mxu0 %v4838_v53  ;;  %3633 = vmatpush1.bf16.msra.mxu1 %v4841_v54  ;;  %v4928_v53 = vld [vmem:[%s7045_s1 + $0x720] ss:$16 sps:$4 sm:$0xff]   ;;  %v4931_v54 = vld [vmem:[%s7045_s1 + $0x728] ss:$16 sps:$4 sm:$0xff]  }
  0xac   :  { %3290 = vmatprep.subr.bf16.mxu0 %v4846_v55  ;;  %3634 = vmatprep.subr.bf16.mxu1 %v4849_v56  ;;  %v4936_v55 = vld [vmem:[%s7045_s1 + $0x744] ss:$16 sps:$4 sm:$0xff]   ;;  %v4939_v56 = vld [vmem:[%s7045_s1 + $0x74c] ss:$16 sps:$4 sm:$0xff]  }
  0xaf   :  { %3291 = vmatpush1.bf16.msra.mxu0 %v4844_v57  ;;  %3635 = vmatpush1.bf16.msra.mxu1 %v4847_v58  ;;  %v4934_v57 = vld [vmem:[%s7045_s1 + $0x740] ss:$16 sps:$4 sm:$0xff]   ;;  %v4937_v58 = vld [vmem:[%s7045_s1 + $0x748] ss:$16 sps:$4 sm:$0xff]  }
  0xb0   :  { %3292 = vmatprep.subr.bf16.mxu0 %v4852_v59  ;;  %3636 = vmatprep.subr.bf16.mxu1 %v4855_v60  ;;  %v4942_v59 = vld [vmem:[%s7045_s1 + $0x764] ss:$16 sps:$4 sm:$0xff]   ;;  %v4945_v60 = vld [vmem:[%s7045_s1 + $0x76c] ss:$16 sps:$4 sm:$0xff]  }
  0xb3   :  { %3293 = vmatpush1.bf16.msra.mxu0 %v4850_v61  ;;  %3637 = vmatpush1.bf16.msra.mxu1 %v4853_v62  ;;  %v4940_v61 = vld [vmem:[%s7045_s1 + $0x760] ss:$16 sps:$4 sm:$0xff]   ;;  %v4943_v62 = vld [vmem:[%s7045_s1 + $0x768] ss:$16 sps:$4 sm:$0xff]  }
  0xb4   :  { %3294 = vmatprep.subr.bf16.mxu0 %v4858_v63  ;;  %3638 = vmatprep.subr.bf16.mxu1 %v4861_v0  ;;  %v4948_v63 = vld [vmem:[%s7045_s1 + $0x784] ss:$16 sps:$4 sm:$0xff]   ;;  %v4951_v0 = vld [vmem:[%s7045_s1 + $0x78c] ss:$16 sps:$4 sm:$0xff]  }
  0xb7   :  { %3295 = vmatpush1.bf16.msra.mxu0 %v4856_v1  ;;  %3639 = vmatpush1.bf16.msra.mxu1 %v4859_v2  ;;  %v4946_v1 = vld [vmem:[%s7045_s1 + $0x780] ss:$16 sps:$4 sm:$0xff]   ;;  %v4949_v2 = vld [vmem:[%s7045_s1 + $0x788] ss:$16 sps:$4 sm:$0xff]  }
  0xb8   :  { %3296 = vmatprep.subr.bf16.mxu0 %v4864_v3  ;;  %3640 = vmatprep.subr.bf16.mxu1 %v4867_v4  ;;  %v4954_v3 = vld [vmem:[%s7045_s1 + $0x7a4] ss:$16 sps:$4 sm:$0xff]   ;;  %v4957_v4 = vld [vmem:[%s7045_s1 + $0x7ac] ss:$16 sps:$4 sm:$0xff]  }
  0xbb   :  { %3297 = vmatpush1.bf16.msra.mxu0 %v4862_v5  ;;  %3641 = vmatpush1.bf16.msra.mxu1 %v4865_v6  ;;  %v4952_v5 = vld [vmem:[%s7045_s1 + $0x7a0] ss:$16 sps:$4 sm:$0xff]   ;;  %v4955_v6 = vld [vmem:[%s7045_s1 + $0x7a8] ss:$16 sps:$4 sm:$0xff]  }
  0xbc   :  { %3298 = vmatprep.subr.bf16.mxu0 %v4870_v7  ;;  %3642 = vmatprep.subr.bf16.mxu1 %v4873_v8  ;;  %v4960_v7 = vld [vmem:[%s7045_s1 + $0x7c4] ss:$16 sps:$4 sm:$0xff]   ;;  %v4963_v8 = vld [vmem:[%s7045_s1 + $0x7cc] ss:$16 sps:$4 sm:$0xff]  }
  0xbf   :  { %3299 = vmatpush1.bf16.msra.mxu0 %v4868_v9  ;;  %3643 = vmatpush1.bf16.msra.mxu1 %v4871_v10  ;;  %v4958_v9 = vld [vmem:[%s7045_s1 + $0x7c0] ss:$16 sps:$4 sm:$0xff]   ;;  %v4961_v10 = vld [vmem:[%s7045_s1 + $0x7c8] ss:$16 sps:$4 sm:$0xff]  }
  0xc0   :  { %3311 = vmatprep.subr.bf16.mxu0 %v4876_v11  ;;  %3655 = vmatprep.subr.bf16.mxu1 %v4879_v12  ;;  %v4966_v11 = vld [vmem:[%s7045_s1 + $0x7e4] ss:$16 sps:$4 sm:$0xff]   ;;  %v4969_v12 = vld [vmem:[%s7045_s1 + $0x7ec] ss:$16 sps:$4 sm:$0xff]  }
  0xc2   :  { %3301 = vmatmul.mubr.bf16.vlgmr.msra.gmra.mrb[0].mxu0 %v4006_v17  ;;  %3645 = vmatmul.mubr.bf16.vlgmr.msra.gmra.mrb[0].mxu1 %v4006_v17  ;;  %v4972_v17 = vld [vmem:[%s7045_s1 + $0x804] ss:$16 sps:$4 sm:$0xff]  }
  0xc3   :  { %3312 = vmatpush1.bf16.msra.mxu0 %v4874_v13  ;;  %3656 = vmatpush1.bf16.msra.mxu1 %v4877_v16  ;;  %v4964_v13 = vld [vmem:[%s7045_s1 + $0x7e0] ss:$16 sps:$4 sm:$0xff]   ;;  %v4967_v16 = vld [vmem:[%s7045_s1 + $0x7e8] ss:$16 sps:$4 sm:$0xff]  }
  0xc4   :  { %3313 = vmatprep.subr.bf16.mxu0 %v4882_v20  ;;  %3657 = vmatprep.subr.bf16.mxu1 %v4885_v14  ;;  %v4975_v20 = vld [vmem:[%s7045_s1 + $0x80c] ss:$16 sps:$4 sm:$0xff]   ;;  %v6201_v14 = vld [vmem:[%s7046_s0 + $0x20] sm:$0xff] }
  0xc5   :  { %3343 = vmatprep.mubr.bf16.mxu0 %v4009_v15  ;;  %3687 = vmatprep.mubr.bf16.mxu1 %v4009_v15  ;;  %v4008_v15 = vcombine.low %v6003_v18, %v6008_v19  ;;  %v4978_v18 = vld [vmem:[%s7045_s1 + $0x824] ss:$16 sps:$4 sm:$0xff]   ;;  %v4981_v19 = vld [vmem:[%s7045_s1 + $0x82c] ss:$16 sps:$4 sm:$0xff]  }
  0xc7   :  { %3314 = vmatpush1.bf16.msra.mxu0 %v4880_v21  ;;  %3658 = vmatpush1.bf16.msra.mxu1 %v4883_v22  ;;  %v6208_v21 = vld [vmem:[%s7046_s0 + $0x60] sm:$0xff] }
  0xc8   :  { %3315 = vmatprep.subr.bf16.mxu0 %v4888_v23  ;;  %3659 = vmatprep.subr.bf16.mxu1 %v4891_v24  ;;  %v4970_v22 = vld [vmem:[%s7045_s1 + $0x800] ss:$16 sps:$4 sm:$0xff]   ;;  %v4973_v23 = vld [vmem:[%s7045_s1 + $0x808] ss:$16 sps:$4 sm:$0xff]   ;;  %v4011_v24 = vcombine.high %v6201_v14, %v6208_v21 }
  0xcb   :  { %3316 = vmatpush1.bf16.msra.mxu0 %v4886_v25  ;;  %3660 = vmatpush1.bf16.msra.mxu1 %v4889_v26  ;;  %v4976_v25 = vld [vmem:[%s7045_s1 + $0x820] ss:$16 sps:$4 sm:$0xff]   ;;  %v4979_v26 = vld [vmem:[%s7045_s1 + $0x828] ss:$16 sps:$4 sm:$0xff]  }
  0xcc   :  { %3317 = vmatprep.subr.bf16.mxu0 %v4894_v27  ;;  %3661 = vmatprep.subr.bf16.mxu1 %v4897_v28  ;;  %v4984_v27 = vld [vmem:[%s7045_s1 + $0x844] ss:$16 sps:$4 sm:$0xff]   ;;  %v4987_v28 = vld [vmem:[%s7045_s1 + $0x84c] ss:$16 sps:$4 sm:$0xff]  }
  0xcf   :  { %3318 = vmatpush1.bf16.msra.mxu0 %v4892_v29  ;;  %3662 = vmatpush1.bf16.msra.mxu1 %v4895_v30  ;;  %v4982_v29 = vld [vmem:[%s7045_s1 + $0x840] ss:$16 sps:$4 sm:$0xff]   ;;  %v4985_v30 = vld [vmem:[%s7045_s1 + $0x848] ss:$16 sps:$4 sm:$0xff]  }
  0xd0   :  { %3319 = vmatprep.subr.bf16.mxu0 %v4900_v31  ;;  %3663 = vmatprep.subr.bf16.mxu1 %v4903_v32  ;;  %v4990_v31 = vld [vmem:[%s7045_s1 + $0x864] ss:$16 sps:$4 sm:$0xff]   ;;  %v4993_v32 = vld [vmem:[%s7045_s1 + $0x86c] ss:$16 sps:$4 sm:$0xff]  }
  0xd3   :  { %3320 = vmatpush1.bf16.msra.mxu0 %v4898_v33  ;;  %3664 = vmatpush1.bf16.msra.mxu1 %v4901_v34  ;;  %v4988_v33 = vld [vmem:[%s7045_s1 + $0x860] ss:$16 sps:$4 sm:$0xff]   ;;  %v4991_v34 = vld [vmem:[%s7045_s1 + $0x868] ss:$16 sps:$4 sm:$0xff]  }
  0xd4   :  { %3321 = vmatprep.subr.bf16.mxu0 %v4906_v35  ;;  %3665 = vmatprep.subr.bf16.mxu1 %v4909_v36  ;;  %v4996_v35 = vld [vmem:[%s7045_s1 + $0x884] ss:$16 sps:$4 sm:$0xff]   ;;  %v4999_v36 = vld [vmem:[%s7045_s1 + $0x88c] ss:$16 sps:$4 sm:$0xff]  }
  0xd7   :  { %3322 = vmatpush1.bf16.msra.mxu0 %v4904_v37  ;;  %3666 = vmatpush1.bf16.msra.mxu1 %v4907_v38  ;;  %v4994_v37 = vld [vmem:[%s7045_s1 + $0x880] ss:$16 sps:$4 sm:$0xff]   ;;  %v4997_v38 = vld [vmem:[%s7045_s1 + $0x888] ss:$16 sps:$4 sm:$0xff]  }
  0xd8   :  { %3323 = vmatprep.subr.bf16.mxu0 %v4912_v39  ;;  %3667 = vmatprep.subr.bf16.mxu1 %v4915_v40  ;;  %v5002_v39 = vld [vmem:[%s7045_s1 + $0x8a4] ss:$16 sps:$4 sm:$0xff]   ;;  %v5005_v40 = vld [vmem:[%s7045_s1 + $0x8ac] ss:$16 sps:$4 sm:$0xff]  }
  0xdb   :  { %3324 = vmatpush1.bf16.msra.mxu0 %v4910_v41  ;;  %3668 = vmatpush1.bf16.msra.mxu1 %v4913_v42  ;;  %v5000_v41 = vld [vmem:[%s7045_s1 + $0x8a0] ss:$16 sps:$4 sm:$0xff]   ;;  %v5003_v42 = vld [vmem:[%s7045_s1 + $0x8a8] ss:$16 sps:$4 sm:$0xff]  }
  0xdc   :  { %3325 = vmatprep.subr.bf16.mxu0 %v4918_v43  ;;  %3669 = vmatprep.subr.bf16.mxu1 %v4921_v44  ;;  %v5008_v43 = vld [vmem:[%s7045_s1 + $0x8c4] ss:$16 sps:$4 sm:$0xff]   ;;  %v5011_v44 = vld [vmem:[%s7045_s1 + $0x8cc] ss:$16 sps:$4 sm:$0xff]  }
  0xdf   :  { %3326 = vmatpush1.bf16.msra.mxu0 %v4916_v45  ;;  %3670 = vmatpush1.bf16.msra.mxu1 %v4919_v46  ;;  %v5006_v45 = vld [vmem:[%s7045_s1 + $0x8c0] ss:$16 sps:$4 sm:$0xff]   ;;  %v5009_v46 = vld [vmem:[%s7045_s1 + $0x8c8] ss:$16 sps:$4 sm:$0xff]  }
  0xe0   :  { %3327 = vmatprep.subr.bf16.mxu0 %v4924_v47  ;;  %3671 = vmatprep.subr.bf16.mxu1 %v4927_v48  ;;  %v5014_v47 = vld [vmem:[%s7045_s1 + $0x8e4] ss:$16 sps:$4 sm:$0xff]   ;;  %v5017_v48 = vld [vmem:[%s7045_s1 + $0x8ec] ss:$16 sps:$4 sm:$0xff]  }
  0xe3   :  { %3328 = vmatpush1.bf16.msra.mxu0 %v4922_v49  ;;  %3672 = vmatpush1.bf16.msra.mxu1 %v4925_v50  ;;  %v5012_v49 = vld [vmem:[%s7045_s1 + $0x8e0] ss:$16 sps:$4 sm:$0xff]   ;;  %v5015_v50 = vld [vmem:[%s7045_s1 + $0x8e8] ss:$16 sps:$4 sm:$0xff]  }
  0xe4   :  { %3329 = vmatprep.subr.bf16.mxu0 %v4930_v51  ;;  %3673 = vmatprep.subr.bf16.mxu1 %v4933_v52  ;;  %v5020_v51 = vld [vmem:[%s7045_s1 + $0x904] ss:$16 sps:$4 sm:$0xff]   ;;  %v5023_v52 = vld [vmem:[%s7045_s1 + $0x90c] ss:$16 sps:$4 sm:$0xff]  }
  0xe7   :  { %3330 = vmatpush1.bf16.msra.mxu0 %v4928_v53  ;;  %3674 = vmatpush1.bf16.msra.mxu1 %v4931_v54  ;;  %v5018_v53 = vld [vmem:[%s7045_s1 + $0x900] ss:$16 sps:$4 sm:$0xff]   ;;  %v5021_v54 = vld [vmem:[%s7045_s1 + $0x908] ss:$16 sps:$4 sm:$0xff]  }
  0xe8   :  { %3331 = vmatprep.subr.bf16.mxu0 %v4936_v55  ;;  %3675 = vmatprep.subr.bf16.mxu1 %v4939_v56  ;;  %v5026_v55 = vld [vmem:[%s7045_s1 + $0x924] ss:$16 sps:$4 sm:$0xff]   ;;  %v5029_v56 = vld [vmem:[%s7045_s1 + $0x92c] ss:$16 sps:$4 sm:$0xff]  }
  0xeb   :  { %3332 = vmatpush1.bf16.msra.mxu0 %v4934_v57  ;;  %3676 = vmatpush1.bf16.msra.mxu1 %v4937_v58  ;;  %v5024_v57 = vld [vmem:[%s7045_s1 + $0x920] ss:$16 sps:$4 sm:$0xff]   ;;  %v5027_v58 = vld [vmem:[%s7045_s1 + $0x928] ss:$16 sps:$4 sm:$0xff]  }
  0xec   :  { %3333 = vmatprep.subr.bf16.mxu0 %v4942_v59  ;;  %3677 = vmatprep.subr.bf16.mxu1 %v4945_v60  ;;  %v5032_v59 = vld [vmem:[%s7045_s1 + $0x944] ss:$16 sps:$4 sm:$0xff]   ;;  %v5035_v60 = vld [vmem:[%s7045_s1 + $0x94c] ss:$16 sps:$4 sm:$0xff]  }
  0xef   :  { %3334 = vmatpush1.bf16.msra.mxu0 %v4940_v61  ;;  %3678 = vmatpush1.bf16.msra.mxu1 %v4943_v62  ;;  %v5030_v61 = vld [vmem:[%s7045_s1 + $0x940] ss:$16 sps:$4 sm:$0xff]   ;;  %v5033_v62 = vld [vmem:[%s7045_s1 + $0x948] ss:$16 sps:$4 sm:$0xff]  }
  0xf0   :  { %3335 = vmatprep.subr.bf16.mxu0 %v4948_v63  ;;  %3679 = vmatprep.subr.bf16.mxu1 %v4951_v0  ;;  %v5038_v63 = vld [vmem:[%s7045_s1 + $0x964] ss:$16 sps:$4 sm:$0xff]   ;;  %v5041_v0 = vld [vmem:[%s7045_s1 + $0x96c] ss:$16 sps:$4 sm:$0xff]  }
  0xf3   :  { %3336 = vmatpush1.bf16.msra.mxu0 %v4946_v1  ;;  %3680 = vmatpush1.bf16.msra.mxu1 %v4949_v2  ;;  %v5036_v1 = vld [vmem:[%s7045_s1 + $0x960] ss:$16 sps:$4 sm:$0xff]   ;;  %v5039_v2 = vld [vmem:[%s7045_s1 + $0x968] ss:$16 sps:$4 sm:$0xff]  }
  0xf4   :  { %3337 = vmatprep.subr.bf16.mxu0 %v4954_v3  ;;  %3681 = vmatprep.subr.bf16.mxu1 %v4957_v4  ;;  %v5044_v3 = vld [vmem:[%s7045_s1 + $0x984] ss:$16 sps:$4 sm:$0xff]   ;;  %v5047_v4 = vld [vmem:[%s7045_s1 + $0x98c] ss:$16 sps:$4 sm:$0xff]  }
  0xf7   :  { %3338 = vmatpush1.bf16.msra.mxu0 %v4952_v5  ;;  %3682 = vmatpush1.bf16.msra.mxu1 %v4955_v6  ;;  %v5042_v5 = vld [vmem:[%s7045_s1 + $0x980] ss:$16 sps:$4 sm:$0xff]   ;;  %v5045_v6 = vld [vmem:[%s7045_s1 + $0x988] ss:$16 sps:$4 sm:$0xff]  }
  0xf8   :  { %3339 = vmatprep.subr.bf16.mxu0 %v4960_v7  ;;  %3683 = vmatprep.subr.bf16.mxu1 %v4963_v8  ;;  %v5050_v7 = vld [vmem:[%s7045_s1 + $0x9a4] ss:$16 sps:$4 sm:$0xff]   ;;  %v5053_v8 = vld [vmem:[%s7045_s1 + $0x9ac] ss:$16 sps:$4 sm:$0xff]  }
  0xfb   :  { %3340 = vmatpush1.bf16.msra.mxu0 %v4958_v9  ;;  %3684 = vmatpush1.bf16.msra.mxu1 %v4961_v10  ;;  %v5048_v9 = vld [vmem:[%s7045_s1 + $0x9a0] ss:$16 sps:$4 sm:$0xff]   ;;  %v5051_v10 = vld [vmem:[%s7045_s1 + $0x9a8] ss:$16 sps:$4 sm:$0xff]  }
  0xfc   :  { %3341 = vmatprep.subr.bf16.mxu0 %v4966_v11  ;;  %3685 = vmatprep.subr.bf16.mxu1 %v4969_v12  ;;  %v5056_v11 = vld [vmem:[%s7045_s1 + $0x9c4] ss:$16 sps:$4 sm:$0xff]   ;;  %v5059_v12 = vld [vmem:[%s7045_s1 + $0x9cc] ss:$16 sps:$4 sm:$0xff]  }
  0xff   :  { %3342 = vmatpush1.bf16.msra.mxu0 %v4964_v13  ;;  %3686 = vmatpush1.bf16.msra.mxu1 %v4967_v16  ;;  %v5054_v13 = vld [vmem:[%s7045_s1 + $0x9c0] ss:$16 sps:$4 sm:$0xff]   ;;  %v5057_v16 = vld [vmem:[%s7045_s1 + $0x9c8] ss:$16 sps:$4 sm:$0xff]  }
 0x100   :  { %3354 = vmatprep.subr.bf16.mxu0 %v4972_v17  ;;  %3698 = vmatprep.subr.bf16.mxu1 %v4975_v20  ;;  %v5062_v17 = vld [vmem:[%s7045_s1 + $0x9e4] ss:$16 sps:$4 sm:$0xff]   ;;  %v5065_v20 = vld [vmem:[%s7045_s1 + $0x9ec] ss:$16 sps:$4 sm:$0xff]  }
 0x102   :  { %3344 = vmatmul.mubr.bf16.vlgmr.msra.gmra.mrb[0].mxu0 %v4008_v15  ;;  %3688 = vmatmul.mubr.bf16.vlgmr.msra.gmra.mrb[0].mxu1 %v4008_v15  ;;  %v5060_v15 = vld [vmem:[%s7045_s1 + $0x9e0] ss:$16 sps:$4 sm:$0xff]  }
 0x103   :  { %3355 = vmatpush1.bf16.msra.mxu0 %v4970_v22  ;;  %3699 = vmatpush1.bf16.msra.mxu1 %v4973_v23  ;;  %v5063_v22 = vld [vmem:[%s7045_s1 + $0x9e8] ss:$16 sps:$4 sm:$0xff]   ;;  %v5068_v23 = vld [vmem:[%s7045_s1 + $0xa04] ss:$16 sps:$4 sm:$0xff]  }
 0x104   :  { %3356 = vmatprep.subr.bf16.mxu0 %v4978_v18  ;;  %3700 = vmatprep.subr.bf16.mxu1 %v4981_v19  ;;  %v5071_v18 = vld [vmem:[%s7045_s1 + $0xa0c] ss:$16 sps:$4 sm:$0xff]  }
 0x105   :  { %3386 = vmatprep.mubr.bf16.mxu0 %v4011_v24  ;;  %3730 = vmatprep.mubr.bf16.mxu1 %v4011_v24  ;;  %v6407_v19 = vld [vmem:[%s7046_s0 + $0x28] sm:$0xff] }
 0x106   :  { %v6412_v24 = vld [vmem:[%s7046_s0 + $0x68] sm:$0xff] }
 0x107   :  { %3357 = vmatpush1.bf16.msra.mxu0 %v4976_v25  ;;  %3701 = vmatpush1.bf16.msra.mxu1 %v4979_v26  ;;  %v4010_v25 = vcombine.low %v6201_v14, %v6208_v21  ;;  %v5066_v26 = vld [vmem:[%s7045_s1 + $0xa00] ss:$16 sps:$4 sm:$0xff]   ;;  %v5077_v14 = vld [vmem:[%s7045_s1 + $0xa2c] ss:$16 sps:$4 sm:$0xff]   ;;  %v4013_v21 = vcombine.high %v6407_v19, %v6412_v24 }
 0x108   :  { %3358 = vmatprep.subr.bf16.mxu0 %v4984_v27  ;;  %3702 = vmatprep.subr.bf16.mxu1 %v4987_v28  ;;  %v5069_v27 = vld [vmem:[%s7045_s1 + $0xa08] ss:$16 sps:$4 sm:$0xff]   ;;  %v5074_v28 = vld [vmem:[%s7045_s1 + $0xa24] ss:$16 sps:$4 sm:$0xff]  }
 0x10b   :  { %3359 = vmatpush1.bf16.msra.mxu0 %v4982_v29  ;;  %3703 = vmatpush1.bf16.msra.mxu1 %v4985_v30  ;;  %v5072_v29 = vld [vmem:[%s7045_s1 + $0xa20] ss:$16 sps:$4 sm:$0xff]   ;;  %v5075_v30 = vld [vmem:[%s7045_s1 + $0xa28] ss:$16 sps:$4 sm:$0xff]  }
 0x10c   :  { %3360 = vmatprep.subr.bf16.mxu0 %v4990_v31  ;;  %3704 = vmatprep.subr.bf16.mxu1 %v4993_v32  ;;  %v5080_v31 = vld [vmem:[%s7045_s1 + $0xa44] ss:$16 sps:$4 sm:$0xff]   ;;  %v5083_v32 = vld [vmem:[%s7045_s1 + $0xa4c] ss:$16 sps:$4 sm:$0xff]  }
 0x10f   :  { %3361 = vmatpush1.bf16.msra.mxu0 %v4988_v33  ;;  %3705 = vmatpush1.bf16.msra.mxu1 %v4991_v34  ;;  %v5078_v33 = vld [vmem:[%s7045_s1 + $0xa40] ss:$16 sps:$4 sm:$0xff]   ;;  %v5081_v34 = vld [vmem:[%s7045_s1 + $0xa48] ss:$16 sps:$4 sm:$0xff]  }
 0x110   :  { %3362 = vmatprep.subr.bf16.mxu0 %v4996_v35  ;;  %3706 = vmatprep.subr.bf16.mxu1 %v4999_v36  ;;  %v5086_v35 = vld [vmem:[%s7045_s1 + $0xa64] ss:$16 sps:$4 sm:$0xff]   ;;  %v5089_v36 = vld [vmem:[%s7045_s1 + $0xa6c] ss:$16 sps:$4 sm:$0xff]  }
 0x113   :  { %3363 = vmatpush1.bf16.msra.mxu0 %v4994_v37  ;;  %3707 = vmatpush1.bf16.msra.mxu1 %v4997_v38  ;;  %v5084_v37 = vld [vmem:[%s7045_s1 + $0xa60] ss:$16 sps:$4 sm:$0xff]   ;;  %v5087_v38 = vld [vmem:[%s7045_s1 + $0xa68] ss:$16 sps:$4 sm:$0xff]  }
 0x114   :  { %3364 = vmatprep.subr.bf16.mxu0 %v5002_v39  ;;  %3708 = vmatprep.subr.bf16.mxu1 %v5005_v40  ;;  %v5092_v39 = vld [vmem:[%s7045_s1 + $0xa84] ss:$16 sps:$4 sm:$0xff]   ;;  %v5095_v40 = vld [vmem:[%s7045_s1 + $0xa8c] ss:$16 sps:$4 sm:$0xff]  }
 0x117   :  { %3365 = vmatpush1.bf16.msra.mxu0 %v5000_v41  ;;  %3709 = vmatpush1.bf16.msra.mxu1 %v5003_v42  ;;  %v5090_v41 = vld [vmem:[%s7045_s1 + $0xa80] ss:$16 sps:$4 sm:$0xff]   ;;  %v5093_v42 = vld [vmem:[%s7045_s1 + $0xa88] ss:$16 sps:$4 sm:$0xff]  }
 0x118   :  { %3366 = vmatprep.subr.bf16.mxu0 %v5008_v43  ;;  %3710 = vmatprep.subr.bf16.mxu1 %v5011_v44  ;;  %v5098_v43 = vld [vmem:[%s7045_s1 + $0xaa4] ss:$16 sps:$4 sm:$0xff]   ;;  %v5101_v44 = vld [vmem:[%s7045_s1 + $0xaac] ss:$16 sps:$4 sm:$0xff]  }
 0x11b   :  { %3367 = vmatpush1.bf16.msra.mxu0 %v5006_v45  ;;  %3711 = vmatpush1.bf16.msra.mxu1 %v5009_v46  ;;  %v5096_v45 = vld [vmem:[%s7045_s1 + $0xaa0] ss:$16 sps:$4 sm:$0xff]   ;;  %v5099_v46 = vld [vmem:[%s7045_s1 + $0xaa8] ss:$16 sps:$4 sm:$0xff]  }
 0x11c   :  { %3368 = vmatprep.subr.bf16.mxu0 %v5014_v47  ;;  %3712 = vmatprep.subr.bf16.mxu1 %v5017_v48  ;;  %v5104_v47 = vld [vmem:[%s7045_s1 + $0xac4] ss:$16 sps:$4 sm:$0xff]   ;;  %v5107_v48 = vld [vmem:[%s7045_s1 + $0xacc] ss:$16 sps:$4 sm:$0xff]  }
 0x11f   :  { %3369 = vmatpush1.bf16.msra.mxu0 %v5012_v49  ;;  %3713 = vmatpush1.bf16.msra.mxu1 %v5015_v50  ;;  %v5102_v49 = vld [vmem:[%s7045_s1 + $0xac0] ss:$16 sps:$4 sm:$0xff]   ;;  %v5105_v50 = vld [vmem:[%s7045_s1 + $0xac8] ss:$16 sps:$4 sm:$0xff]  }
 0x120   :  { %3370 = vmatprep.subr.bf16.mxu0 %v5020_v51  ;;  %3714 = vmatprep.subr.bf16.mxu1 %v5023_v52  ;;  %v5110_v51 = vld [vmem:[%s7045_s1 + $0xae4] ss:$16 sps:$4 sm:$0xff]   ;;  %v5113_v52 = vld [vmem:[%s7045_s1 + $0xaec] ss:$16 sps:$4 sm:$0xff]  }
 0x123   :  { %3371 = vmatpush1.bf16.msra.mxu0 %v5018_v53  ;;  %3715 = vmatpush1.bf16.msra.mxu1 %v5021_v54  ;;  %v5108_v53 = vld [vmem:[%s7045_s1 + $0xae0] ss:$16 sps:$4 sm:$0xff]   ;;  %v5111_v54 = vld [vmem:[%s7045_s1 + $0xae8] ss:$16 sps:$4 sm:$0xff]  }
 0x124   :  { %3372 = vmatprep.subr.bf16.mxu0 %v5026_v55  ;;  %3716 = vmatprep.subr.bf16.mxu1 %v5029_v56  ;;  %v5116_v55 = vld [vmem:[%s7045_s1 + $0xb04] ss:$16 sps:$4 sm:$0xff]   ;;  %v5119_v56 = vld [vmem:[%s7045_s1 + $0xb0c] ss:$16 sps:$4 sm:$0xff]  }
 0x127   :  { %3373 = vmatpush1.bf16.msra.mxu0 %v5024_v57  ;;  %3717 = vmatpush1.bf16.msra.mxu1 %v5027_v58  ;;  %v5114_v57 = vld [vmem:[%s7045_s1 + $0xb00] ss:$16 sps:$4 sm:$0xff]   ;;  %v5117_v58 = vld [vmem:[%s7045_s1 + $0xb08] ss:$16 sps:$4 sm:$0xff]  }
 0x128   :  { %3374 = vmatprep.subr.bf16.mxu0 %v5032_v59  ;;  %3718 = vmatprep.subr.bf16.mxu1 %v5035_v60  ;;  %v5122_v59 = vld [vmem:[%s7045_s1 + $0xb24] ss:$16 sps:$4 sm:$0xff]   ;;  %v5125_v60 = vld [vmem:[%s7045_s1 + $0xb2c] ss:$16 sps:$4 sm:$0xff]  }
 0x12b   :  { %3375 = vmatpush1.bf16.msra.mxu0 %v5030_v61  ;;  %3719 = vmatpush1.bf16.msra.mxu1 %v5033_v62  ;;  %v5120_v61 = vld [vmem:[%s7045_s1 + $0xb20] ss:$16 sps:$4 sm:$0xff]   ;;  %v5123_v62 = vld [vmem:[%s7045_s1 + $0xb28] ss:$16 sps:$4 sm:$0xff]  }
 0x12c   :  { %3376 = vmatprep.subr.bf16.mxu0 %v5038_v63  ;;  %3720 = vmatprep.subr.bf16.mxu1 %v5041_v0  ;;  %v5128_v63 = vld [vmem:[%s7045_s1 + $0xb44] ss:$16 sps:$4 sm:$0xff]   ;;  %v5131_v0 = vld [vmem:[%s7045_s1 + $0xb4c] ss:$16 sps:$4 sm:$0xff]  }
 0x12f   :  { %3377 = vmatpush1.bf16.msra.mxu0 %v5036_v1  ;;  %3721 = vmatpush1.bf16.msra.mxu1 %v5039_v2  ;;  %v5126_v1 = vld [vmem:[%s7045_s1 + $0xb40] ss:$16 sps:$4 sm:$0xff]   ;;  %v5129_v2 = vld [vmem:[%s7045_s1 + $0xb48] ss:$16 sps:$4 sm:$0xff]  }
 0x130   :  { %3378 = vmatprep.subr.bf16.mxu0 %v5044_v3  ;;  %3722 = vmatprep.subr.bf16.mxu1 %v5047_v4  ;;  %v5134_v3 = vld [vmem:[%s7045_s1 + $0xb64] ss:$16 sps:$4 sm:$0xff]   ;;  %v5137_v4 = vld [vmem:[%s7045_s1 + $0xb6c] ss:$16 sps:$4 sm:$0xff]  }
 0x133   :  { %3379 = vmatpush1.bf16.msra.mxu0 %v5042_v5  ;;  %3723 = vmatpush1.bf16.msra.mxu1 %v5045_v6  ;;  %v5132_v5 = vld [vmem:[%s7045_s1 + $0xb60] ss:$16 sps:$4 sm:$0xff]   ;;  %v5135_v6 = vld [vmem:[%s7045_s1 + $0xb68] ss:$16 sps:$4 sm:$0xff]  }
 0x134   :  { %3380 = vmatprep.subr.bf16.mxu0 %v5050_v7  ;;  %3724 = vmatprep.subr.bf16.mxu1 %v5053_v8  ;;  %v5140_v7 = vld [vmem:[%s7045_s1 + $0xb84] ss:$16 sps:$4 sm:$0xff]   ;;  %v5143_v8 = vld [vmem:[%s7045_s1 + $0xb8c] ss:$16 sps:$4 sm:$0xff]  }
 0x137   :  { %3381 = vmatpush1.bf16.msra.mxu0 %v5048_v9  ;;  %3725 = vmatpush1.bf16.msra.mxu1 %v5051_v10  ;;  %v5138_v9 = vld [vmem:[%s7045_s1 + $0xb80] ss:$16 sps:$4 sm:$0xff]   ;;  %v5141_v10 = vld [vmem:[%s7045_s1 + $0xb88] ss:$16 sps:$4 sm:$0xff]  }
 0x138   :  { %3382 = vmatprep.subr.bf16.mxu0 %v5056_v11  ;;  %3726 = vmatprep.subr.bf16.mxu1 %v5059_v12  ;;  %v5146_v11 = vld [vmem:[%s7045_s1 + $0xba4] ss:$16 sps:$4 sm:$0xff]   ;;  %v5149_v12 = vld [vmem:[%s7045_s1 + $0xbac] ss:$16 sps:$4 sm:$0xff]  }
 0x13b   :  { %3383 = vmatpush1.bf16.msra.mxu0 %v5054_v13  ;;  %3727 = vmatpush1.bf16.msra.mxu1 %v5057_v16  ;;  %v5144_v13 = vld [vmem:[%s7045_s1 + $0xba0] ss:$16 sps:$4 sm:$0xff]   ;;  %v5147_v16 = vld [vmem:[%s7045_s1 + $0xba8] ss:$16 sps:$4 sm:$0xff]  }
 0x13c   :  { %3384 = vmatprep.subr.bf16.mxu0 %v5062_v17  ;;  %3728 = vmatprep.subr.bf16.mxu1 %v5065_v20  ;;  %v5152_v17 = vld [vmem:[%s7045_s1 + $0xbc4] ss:$16 sps:$4 sm:$0xff]   ;;  %v5155_v20 = vld [vmem:[%s7045_s1 + $0xbcc] ss:$16 sps:$4 sm:$0xff]  }
 0x13f   :  { %3385 = vmatpush1.bf16.msra.mxu0 %v5060_v15  ;;  %3729 = vmatpush1.bf16.msra.mxu1 %v5063_v22  ;;  %v5150_v15 = vld [vmem:[%s7045_s1 + $0xbc0] ss:$16 sps:$4 sm:$0xff]   ;;  %v5153_v22 = vld [vmem:[%s7045_s1 + $0xbc8] ss:$16 sps:$4 sm:$0xff]  }
 0x140   :  { %3397 = vmatprep.subr.bf16.mxu0 %v5068_v23  ;;  %3741 = vmatprep.subr.bf16.mxu1 %v5071_v18  ;;  %v5158_v23 = vld [vmem:[%s7045_s1 + $0xbe4] ss:$16 sps:$4 sm:$0xff]   ;;  %v5161_v18 = vld [vmem:[%s7045_s1 + $0xbec] ss:$16 sps:$4 sm:$0xff]  }
 0x142   :  { %3387 = vmatmul.mubr.bf16.vlgmr.msra.gmra.mrb[0].mxu0 %v4010_v25  ;;  %3731 = vmatmul.mubr.bf16.vlgmr.msra.gmra.mrb[0].mxu1 %v4010_v25  ;;  %v5156_v25 = vld [vmem:[%s7045_s1 + $0xbe0] ss:$16 sps:$4 sm:$0xff]  }
 0x143   :  { %3398 = vmatpush1.bf16.msra.mxu0 %v5066_v26  ;;  %3742 = vmatpush1.bf16.msra.mxu1 %v5069_v27  ;;  %v5159_v26 = vld [vmem:[%s7045_s1 + $0xbe8] ss:$16 sps:$4 sm:$0xff]   ;;  %v5164_v27 = vld [vmem:[%s7045_s1 + $0xc04] ss:$16 sps:$4 sm:$0xff]  }
 0x144   :  { %3399 = vmatprep.subr.bf16.mxu0 %v5074_v28  ;;  %3743 = vmatprep.subr.bf16.mxu1 %v5077_v14  ;;  %v5167_v28 = vld [vmem:[%s7045_s1 + $0xc0c] ss:$16 sps:$4 sm:$0xff]   ;;  %v4012_v14 = vcombine.low %v6407_v19, %v6412_v24  ;;  %v5165_v19 = vld [vmem:[%s7045_s1 + $0xc08] ss:$16 sps:$4 sm:$0xff]   ;;  %v5170_v24 = vld [vmem:[%s7045_s1 + $0xc24] ss:$16 sps:$4 sm:$0xff]  }
 0x145   :  { %3429 = vmatprep.mubr.bf16.mxu0 %v4013_v21  ;;  %3773 = vmatprep.mubr.bf16.mxu1 %v4013_v21  ;;  %v6615_v21 = vld [vmem:[%s7046_s0 + $0x30] sm:$0xff] }
 0x147   :  { %3400 = vmatpush1.bf16.msra.mxu0 %v5072_v29  ;;  %3744 = vmatpush1.bf16.msra.mxu1 %v5075_v30  ;;  %v6620_v29 = vld [vmem:[%s7046_s0 + $0x70] sm:$0xff] }
 0x148   :  { %3401 = vmatprep.subr.bf16.mxu0 %v5080_v31  ;;  %3745 = vmatprep.subr.bf16.mxu1 %v5083_v32  ;;  %v5162_v30 = vld [vmem:[%s7045_s1 + $0xc00] ss:$16 sps:$4 sm:$0xff]   ;;  %v5173_v31 = vld [vmem:[%s7045_s1 + $0xc2c] ss:$16 sps:$4 sm:$0xff]   ;;  %v4015_v32 = vcombine.high %v6615_v21, %v6620_v29 }
 0x14b   :  { %3402 = vmatpush1.bf16.msra.mxu0 %v5078_v33  ;;  %3746 = vmatpush1.bf16.msra.mxu1 %v5081_v34  ;;  %v5168_v33 = vld [vmem:[%s7045_s1 + $0xc20] ss:$16 sps:$4 sm:$0xff]   ;;  %v5171_v34 = vld [vmem:[%s7045_s1 + $0xc28] ss:$16 sps:$4 sm:$0xff]  }
 0x14c   :  { %3403 = vmatprep.subr.bf16.mxu0 %v5086_v35  ;;  %3747 = vmatprep.subr.bf16.mxu1 %v5089_v36  ;;  %v5176_v35 = vld [vmem:[%s7045_s1 + $0xc44] ss:$16 sps:$4 sm:$0xff]   ;;  %v5179_v36 = vld [vmem:[%s7045_s1 + $0xc4c] ss:$16 sps:$4 sm:$0xff]  }
 0x14f   :  { %3404 = vmatpush1.bf16.msra.mxu0 %v5084_v37  ;;  %3748 = vmatpush1.bf16.msra.mxu1 %v5087_v38  ;;  %v5174_v37 = vld [vmem:[%s7045_s1 + $0xc40] ss:$16 sps:$4 sm:$0xff]   ;;  %v5177_v38 = vld [vmem:[%s7045_s1 + $0xc48] ss:$16 sps:$4 sm:$0xff]  }
 0x150   :  { %3405 = vmatprep.subr.bf16.mxu0 %v5092_v39  ;;  %3749 = vmatprep.subr.bf16.mxu1 %v5095_v40  ;;  %v5182_v39 = vld [vmem:[%s7045_s1 + $0xc64] ss:$16 sps:$4 sm:$0xff]   ;;  %v5185_v40 = vld [vmem:[%s7045_s1 + $0xc6c] ss:$16 sps:$4 sm:$0xff]  }
 0x153   :  { %3406 = vmatpush1.bf16.msra.mxu0 %v5090_v41  ;;  %3750 = vmatpush1.bf16.msra.mxu1 %v5093_v42  ;;  %v5180_v41 = vld [vmem:[%s7045_s1 + $0xc60] ss:$16 sps:$4 sm:$0xff]   ;;  %v5183_v42 = vld [vmem:[%s7045_s1 + $0xc68] ss:$16 sps:$4 sm:$0xff]  }
 0x154   :  { %3407 = vmatprep.subr.bf16.mxu0 %v5098_v43  ;;  %3751 = vmatprep.subr.bf16.mxu1 %v5101_v44  ;;  %v5188_v43 = vld [vmem:[%s7045_s1 + $0xc84] ss:$16 sps:$4 sm:$0xff]   ;;  %v5191_v44 = vld [vmem:[%s7045_s1 + $0xc8c] ss:$16 sps:$4 sm:$0xff]  }
 0x157   :  { %3408 = vmatpush1.bf16.msra.mxu0 %v5096_v45  ;;  %3752 = vmatpush1.bf16.msra.mxu1 %v5099_v46  ;;  %v5186_v45 = vld [vmem:[%s7045_s1 + $0xc80] ss:$16 sps:$4 sm:$0xff]   ;;  %v5189_v46 = vld [vmem:[%s7045_s1 + $0xc88] ss:$16 sps:$4 sm:$0xff]  }
 0x158   :  { %3409 = vmatprep.subr.bf16.mxu0 %v5104_v47  ;;  %3753 = vmatprep.subr.bf16.mxu1 %v5107_v48  ;;  %v5194_v47 = vld [vmem:[%s7045_s1 + $0xca4] ss:$16 sps:$4 sm:$0xff]   ;;  %v5197_v48 = vld [vmem:[%s7045_s1 + $0xcac] ss:$16 sps:$4 sm:$0xff]  }
 0x15b   :  { %3410 = vmatpush1.bf16.msra.mxu0 %v5102_v49  ;;  %3754 = vmatpush1.bf16.msra.mxu1 %v5105_v50  ;;  %v5192_v49 = vld [vmem:[%s7045_s1 + $0xca0] ss:$16 sps:$4 sm:$0xff]   ;;  %v5195_v50 = vld [vmem:[%s7045_s1 + $0xca8] ss:$16 sps:$4 sm:$0xff]  }
 0x15c   :  { %3411 = vmatprep.subr.bf16.mxu0 %v5110_v51  ;;  %3755 = vmatprep.subr.bf16.mxu1 %v5113_v52  ;;  %v5200_v51 = vld [vmem:[%s7045_s1 + $0xcc4] ss:$16 sps:$4 sm:$0xff]   ;;  %v5203_v52 = vld [vmem:[%s7045_s1 + $0xccc] ss:$16 sps:$4 sm:$0xff]  }
 0x15f   :  { %3412 = vmatpush1.bf16.msra.mxu0 %v5108_v53  ;;  %3756 = vmatpush1.bf16.msra.mxu1 %v5111_v54  ;;  %v5198_v53 = vld [vmem:[%s7045_s1 + $0xcc0] ss:$16 sps:$4 sm:$0xff]   ;;  %v5201_v54 = vld [vmem:[%s7045_s1 + $0xcc8] ss:$16 sps:$4 sm:$0xff]  }
 0x160   :  { %3413 = vmatprep.subr.bf16.mxu0 %v5116_v55  ;;  %3757 = vmatprep.subr.bf16.mxu1 %v5119_v56  ;;  %v5206_v55 = vld [vmem:[%s7045_s1 + $0xce4] ss:$16 sps:$4 sm:$0xff]   ;;  %v5209_v56 = vld [vmem:[%s7045_s1 + $0xcec] ss:$16 sps:$4 sm:$0xff]  }
 0x163   :  { %3414 = vmatpush1.bf16.msra.mxu0 %v5114_v57  ;;  %3758 = vmatpush1.bf16.msra.mxu1 %v5117_v58  ;;  %v5204_v57 = vld [vmem:[%s7045_s1 + $0xce0] ss:$16 sps:$4 sm:$0xff]   ;;  %v5207_v58 = vld [vmem:[%s7045_s1 + $0xce8] ss:$16 sps:$4 sm:$0xff]  }
 0x164   :  { %3415 = vmatprep.subr.bf16.mxu0 %v5122_v59  ;;  %3759 = vmatprep.subr.bf16.mxu1 %v5125_v60  ;;  %v5212_v59 = vld [vmem:[%s7045_s1 + $0xd04] ss:$16 sps:$4 sm:$0xff]   ;;  %v5215_v60 = vld [vmem:[%s7045_s1 + $0xd0c] ss:$16 sps:$4 sm:$0xff]  }
 0x167   :  { %3416 = vmatpush1.bf16.msra.mxu0 %v5120_v61  ;;  %3760 = vmatpush1.bf16.msra.mxu1 %v5123_v62  ;;  %v5210_v61 = vld [vmem:[%s7045_s1 + $0xd00] ss:$16 sps:$4 sm:$0xff]   ;;  %v5213_v62 = vld [vmem:[%s7045_s1 + $0xd08] ss:$16 sps:$4 sm:$0xff]  }
 0x168   :  { %3417 = vmatprep.subr.bf16.mxu0 %v5128_v63  ;;  %3761 = vmatprep.subr.bf16.mxu1 %v5131_v0  ;;  %v5218_v63 = vld [vmem:[%s7045_s1 + $0xd24] ss:$16 sps:$4 sm:$0xff]   ;;  %v5221_v0 = vld [vmem:[%s7045_s1 + $0xd2c] ss:$16 sps:$4 sm:$0xff]  }
 0x16b   :  { %3418 = vmatpush1.bf16.msra.mxu0 %v5126_v1  ;;  %3762 = vmatpush1.bf16.msra.mxu1 %v5129_v2  ;;  %v5216_v1 = vld [vmem:[%s7045_s1 + $0xd20] ss:$16 sps:$4 sm:$0xff]   ;;  %v5219_v2 = vld [vmem:[%s7045_s1 + $0xd28] ss:$16 sps:$4 sm:$0xff]  }
 0x16c   :  { %3419 = vmatprep.subr.bf16.mxu0 %v5134_v3  ;;  %3763 = vmatprep.subr.bf16.mxu1 %v5137_v4  ;;  %v5224_v3 = vld [vmem:[%s7045_s1 + $0xd44] ss:$16 sps:$4 sm:$0xff]   ;;  %v5227_v4 = vld [vmem:[%s7045_s1 + $0xd4c] ss:$16 sps:$4 sm:$0xff]  }
 0x16f   :  { %3420 = vmatpush1.bf16.msra.mxu0 %v5132_v5  ;;  %3764 = vmatpush1.bf16.msra.mxu1 %v5135_v6  ;;  %v5222_v5 = vld [vmem:[%s7045_s1 + $0xd40] ss:$16 sps:$4 sm:$0xff]   ;;  %v5225_v6 = vld [vmem:[%s7045_s1 + $0xd48] ss:$16 sps:$4 sm:$0xff]  }
 0x170   :  { %3421 = vmatprep.subr.bf16.mxu0 %v5140_v7  ;;  %3765 = vmatprep.subr.bf16.mxu1 %v5143_v8  ;;  %v5230_v7 = vld [vmem:[%s7045_s1 + $0xd64] ss:$16 sps:$4 sm:$0xff]   ;;  %v5233_v8 = vld [vmem:[%s7045_s1 + $0xd6c] ss:$16 sps:$4 sm:$0xff]  }
 0x173   :  { %3422 = vmatpush1.bf16.msra.mxu0 %v5138_v9  ;;  %3766 = vmatpush1.bf16.msra.mxu1 %v5141_v10  ;;  %v5228_v9 = vld [vmem:[%s7045_s1 + $0xd60] ss:$16 sps:$4 sm:$0xff]   ;;  %v5231_v10 = vld [vmem:[%s7045_s1 + $0xd68] ss:$16 sps:$4 sm:$0xff]  }
 0x174   :  { %3423 = vmatprep.subr.bf16.mxu0 %v5146_v11  ;;  %3767 = vmatprep.subr.bf16.mxu1 %v5149_v12  ;;  %v5236_v11 = vld [vmem:[%s7045_s1 + $0xd84] ss:$16 sps:$4 sm:$0xff]   ;;  %v5239_v12 = vld [vmem:[%s7045_s1 + $0xd8c] ss:$16 sps:$4 sm:$0xff]  }
 0x177   :  { %3424 = vmatpush1.bf16.msra.mxu0 %v5144_v13  ;;  %3768 = vmatpush1.bf16.msra.mxu1 %v5147_v16  ;;  %v5234_v13 = vld [vmem:[%s7045_s1 + $0xd80] ss:$16 sps:$4 sm:$0xff]   ;;  %v5237_v16 = vld [vmem:[%s7045_s1 + $0xd88] ss:$16 sps:$4 sm:$0xff]  }
 0x178   :  { %3425 = vmatprep.subr.bf16.mxu0 %v5152_v17  ;;  %3769 = vmatprep.subr.bf16.mxu1 %v5155_v20  ;;  %v5242_v17 = vld [vmem:[%s7045_s1 + $0xda4] ss:$16 sps:$4 sm:$0xff]   ;;  %v5245_v20 = vld [vmem:[%s7045_s1 + $0xdac] ss:$16 sps:$4 sm:$0xff]  }
 0x17b   :  { %3426 = vmatpush1.bf16.msra.mxu0 %v5150_v15  ;;  %3770 = vmatpush1.bf16.msra.mxu1 %v5153_v22  ;;  %v5240_v15 = vld [vmem:[%s7045_s1 + $0xda0] ss:$16 sps:$4 sm:$0xff]   ;;  %v5243_v22 = vld [vmem:[%s7045_s1 + $0xda8] ss:$16 sps:$4 sm:$0xff]  }
 0x17c   :  { %3427 = vmatprep.subr.bf16.mxu0 %v5158_v23  ;;  %3771 = vmatprep.subr.bf16.mxu1 %v5161_v18  ;;  %v5248_v23 = vld [vmem:[%s7045_s1 + $0xdc4] ss:$16 sps:$4 sm:$0xff]   ;;  %v5251_v18 = vld [vmem:[%s7045_s1 + $0xdcc] ss:$16 sps:$4 sm:$0xff]  }
 0x17f   :  { %3428 = vmatpush1.bf16.msra.mxu0 %v5156_v25  ;;  %3772 = vmatpush1.bf16.msra.mxu1 %v5159_v26  ;;  %v5246_v25 = vld [vmem:[%s7045_s1 + $0xdc0] ss:$16 sps:$4 sm:$0xff]   ;;  %v5249_v26 = vld [vmem:[%s7045_s1 + $0xdc8] ss:$16 sps:$4 sm:$0xff]  }
 0x180   :  { %3440 = vmatprep.subr.bf16.mxu0 %v5164_v27  ;;  %3784 = vmatprep.subr.bf16.mxu1 %v5167_v28  ;;  %v5254_v27 = vld [vmem:[%s7045_s1 + $0xde4] ss:$16 sps:$4 sm:$0xff]   ;;  %v5257_v28 = vld [vmem:[%s7045_s1 + $0xdec] ss:$16 sps:$4 sm:$0xff]  }
 0x182   :  { %3430 = vmatmul.mubr.bf16.vlgmr.msra.gmra.mrb[0].mxu0 %v4012_v14  ;;  %3774 = vmatmul.mubr.bf16.vlgmr.msra.gmra.mrb[0].mxu1 %v4012_v14  ;;  %v5252_v14 = vld [vmem:[%s7045_s1 + $0xde0] ss:$16 sps:$4 sm:$0xff]  }
 0x183   :  { %3441 = vmatpush1.bf16.msra.mxu0 %v5162_v30  ;;  %3785 = vmatpush1.bf16.msra.mxu1 %v5165_v19  ;;  %v5255_v30 = vld [vmem:[%s7045_s1 + $0xde8] ss:$16 sps:$4 sm:$0xff]   ;;  %v5260_v19 = vld [vmem:[%s7045_s1 + $0xe04] ss:$16 sps:$4 sm:$0xff]  }
 0x184   :  { %3442 = vmatprep.subr.bf16.mxu0 %v5170_v24  ;;  %3786 = vmatprep.subr.bf16.mxu1 %v5173_v31  ;;  %v5263_v24 = vld [vmem:[%s7045_s1 + $0xe0c] ss:$16 sps:$4 sm:$0xff]   ;;  %v4014_v31 = vcombine.low %v6615_v21, %v6620_v29  ;;  %v5261_v21 = vld [vmem:[%s7045_s1 + $0xe08] ss:$16 sps:$4 sm:$0xff]   ;;  %v5266_v29 = vld [vmem:[%s7045_s1 + $0xe24] ss:$16 sps:$4 sm:$0xff]  }
 0x185   :  { %3472 = vmatprep.mubr.bf16.mxu0 %v4015_v32  ;;  %3816 = vmatprep.mubr.bf16.mxu1 %v4015_v32  ;;  %v6821_v32 = vld [vmem:[%s7046_s0 + $0x38] sm:$0xff] }
 0x187   :  { %3443 = vmatpush1.bf16.msra.mxu0 %v5168_v33  ;;  %3787 = vmatpush1.bf16.msra.mxu1 %v5171_v34  ;;  %v6826_v33 = vld [vmem:[%s7046_s0 + $0x78] sm:$0xff]  ;;  %v5258_v34 = vld [vmem:[%s7045_s1 + $0xe00] ss:$16 sps:$4 sm:$0xff]  }
 0x188   :  { %3444 = vmatprep.subr.bf16.mxu0 %v5176_v35  ;;  %3788 = vmatprep.subr.bf16.mxu1 %v5179_v36  ;;  %v5269_v35 = vld [vmem:[%s7045_s1 + $0xe2c] ss:$16 sps:$4 sm:$0xff]   ;;  %v4017_v36 = vcombine.high %v6821_v32, %v6826_v33 }
 0x18b   :  { %3445 = vmatpush1.bf16.msra.mxu0 %v5174_v37  ;;  %3789 = vmatpush1.bf16.msra.mxu1 %v5177_v38  ;;  %v5264_v37 = vld [vmem:[%s7045_s1 + $0xe20] ss:$16 sps:$4 sm:$0xff]   ;;  %v5267_v38 = vld [vmem:[%s7045_s1 + $0xe28] ss:$16 sps:$4 sm:$0xff]  }
 0x18c   :  { %3446 = vmatprep.subr.bf16.mxu0 %v5182_v39  ;;  %3790 = vmatprep.subr.bf16.mxu1 %v5185_v40  ;;  %v5272_v39 = vld [vmem:[%s7045_s1 + $0xe44] ss:$16 sps:$4 sm:$0xff]   ;;  %v5275_v40 = vld [vmem:[%s7045_s1 + $0xe4c] ss:$16 sps:$4 sm:$0xff]  }
 0x18f   :  { %3447 = vmatpush1.bf16.msra.mxu0 %v5180_v41  ;;  %3791 = vmatpush1.bf16.msra.mxu1 %v5183_v42  ;;  %v5270_v41 = vld [vmem:[%s7045_s1 + $0xe40] ss:$16 sps:$4 sm:$0xff]   ;;  %v5273_v42 = vld [vmem:[%s7045_s1 + $0xe48] ss:$16 sps:$4 sm:$0xff]  }
 0x190   :  { %3448 = vmatprep.subr.bf16.mxu0 %v5188_v43  ;;  %3792 = vmatprep.subr.bf16.mxu1 %v5191_v44  ;;  %v5278_v43 = vld [vmem:[%s7045_s1 + $0xe64] ss:$16 sps:$4 sm:$0xff]   ;;  %v5281_v44 = vld [vmem:[%s7045_s1 + $0xe6c] ss:$16 sps:$4 sm:$0xff]  }
 0x193   :  { %3449 = vmatpush1.bf16.msra.mxu0 %v5186_v45  ;;  %3793 = vmatpush1.bf16.msra.mxu1 %v5189_v46  ;;  %v5276_v45 = vld [vmem:[%s7045_s1 + $0xe60] ss:$16 sps:$4 sm:$0xff]   ;;  %v5279_v46 = vld [vmem:[%s7045_s1 + $0xe68] ss:$16 sps:$4 sm:$0xff]  }
 0x194   :  { %3450 = vmatprep.subr.bf16.mxu0 %v5194_v47  ;;  %3794 = vmatprep.subr.bf16.mxu1 %v5197_v48  ;;  %v5284_v47 = vld [vmem:[%s7045_s1 + $0xe84] ss:$16 sps:$4 sm:$0xff]   ;;  %v5287_v48 = vld [vmem:[%s7045_s1 + $0xe8c] ss:$16 sps:$4 sm:$0xff]  }
 0x197   :  { %3451 = vmatpush1.bf16.msra.mxu0 %v5192_v49  ;;  %3795 = vmatpush1.bf16.msra.mxu1 %v5195_v50  ;;  %v5282_v49 = vld [vmem:[%s7045_s1 + $0xe80] ss:$16 sps:$4 sm:$0xff]   ;;  %v5285_v50 = vld [vmem:[%s7045_s1 + $0xe88] ss:$16 sps:$4 sm:$0xff]  }
 0x198   :  { %3452 = vmatprep.subr.bf16.mxu0 %v5200_v51  ;;  %3796 = vmatprep.subr.bf16.mxu1 %v5203_v52  ;;  %v5290_v51 = vld [vmem:[%s7045_s1 + $0xea4] ss:$16 sps:$4 sm:$0xff]   ;;  %v5293_v52 = vld [vmem:[%s7045_s1 + $0xeac] ss:$16 sps:$4 sm:$0xff]  }
 0x19b   :  { %3453 = vmatpush1.bf16.msra.mxu0 %v5198_v53  ;;  %3797 = vmatpush1.bf16.msra.mxu1 %v5201_v54  ;;  %v5288_v53 = vld [vmem:[%s7045_s1 + $0xea0] ss:$16 sps:$4 sm:$0xff]   ;;  %v5291_v54 = vld [vmem:[%s7045_s1 + $0xea8] ss:$16 sps:$4 sm:$0xff]  }
 0x19c   :  { %3454 = vmatprep.subr.bf16.mxu0 %v5206_v55  ;;  %3798 = vmatprep.subr.bf16.mxu1 %v5209_v56  ;;  %v5296_v55 = vld [vmem:[%s7045_s1 + $0xec4] ss:$16 sps:$4 sm:$0xff]   ;;  %v5299_v56 = vld [vmem:[%s7045_s1 + $0xecc] ss:$16 sps:$4 sm:$0xff]  }
 0x19f   :  { %3455 = vmatpush1.bf16.msra.mxu0 %v5204_v57  ;;  %3799 = vmatpush1.bf16.msra.mxu1 %v5207_v58  ;;  %v5294_v57 = vld [vmem:[%s7045_s1 + $0xec0] ss:$16 sps:$4 sm:$0xff]   ;;  %v5297_v58 = vld [vmem:[%s7045_s1 + $0xec8] ss:$16 sps:$4 sm:$0xff]  }
 0x1a0   :  { %3456 = vmatprep.subr.bf16.mxu0 %v5212_v59  ;;  %3800 = vmatprep.subr.bf16.mxu1 %v5215_v60  ;;  %v5302_v59 = vld [vmem:[%s7045_s1 + $0xee4] ss:$16 sps:$4 sm:$0xff]   ;;  %v5305_v60 = vld [vmem:[%s7045_s1 + $0xeec] ss:$16 sps:$4 sm:$0xff]  }
 0x1a3   :  { %3457 = vmatpush1.bf16.msra.mxu0 %v5210_v61  ;;  %3801 = vmatpush1.bf16.msra.mxu1 %v5213_v62  ;;  %v5300_v61 = vld [vmem:[%s7045_s1 + $0xee0] ss:$16 sps:$4 sm:$0xff]   ;;  %v5303_v62 = vld [vmem:[%s7045_s1 + $0xee8] ss:$16 sps:$4 sm:$0xff]  }
 0x1a4   :  { %3458 = vmatprep.subr.bf16.mxu0 %v5218_v63  ;;  %3802 = vmatprep.subr.bf16.mxu1 %v5221_v0  ;;  %v5308_v63 = vld [vmem:[%s7045_s1 + $0xf04] ss:$16 sps:$4 sm:$0xff]   ;;  %v5311_v0 = vld [vmem:[%s7045_s1 + $0xf0c] ss:$16 sps:$4 sm:$0xff]  }
 0x1a7   :  { %3459 = vmatpush1.bf16.msra.mxu0 %v5216_v1  ;;  %3803 = vmatpush1.bf16.msra.mxu1 %v5219_v2  ;;  %v5306_v1 = vld [vmem:[%s7045_s1 + $0xf00] ss:$16 sps:$4 sm:$0xff]   ;;  %v5309_v2 = vld [vmem:[%s7045_s1 + $0xf08] ss:$16 sps:$4 sm:$0xff]  }
 0x1a8   :  { %3460 = vmatprep.subr.bf16.mxu0 %v5224_v3  ;;  %3804 = vmatprep.subr.bf16.mxu1 %v5227_v4  ;;  %v5314_v3 = vld [vmem:[%s7045_s1 + $0xf24] ss:$16 sps:$4 sm:$0xff]   ;;  %v5317_v4 = vld [vmem:[%s7045_s1 + $0xf2c] ss:$16 sps:$4 sm:$0xff]  }
 0x1ab   :  { %3461 = vmatpush1.bf16.msra.mxu0 %v5222_v5  ;;  %3805 = vmatpush1.bf16.msra.mxu1 %v5225_v6  ;;  %v5312_v5 = vld [vmem:[%s7045_s1 + $0xf20] ss:$16 sps:$4 sm:$0xff]   ;;  %v5315_v6 = vld [vmem:[%s7045_s1 + $0xf28] ss:$16 sps:$4 sm:$0xff]  }
 0x1ac   :  { %3462 = vmatprep.subr.bf16.mxu0 %v5230_v7  ;;  %3806 = vmatprep.subr.bf16.mxu1 %v5233_v8  ;;  %v5320_v7 = vld [vmem:[%s7045_s1 + $0xf44] ss:$16 sps:$4 sm:$0xff]   ;;  %v5323_v8 = vld [vmem:[%s7045_s1 + $0xf4c] ss:$16 sps:$4 sm:$0xff]  }
 0x1af   :  { %3463 = vmatpush1.bf16.msra.mxu0 %v5228_v9  ;;  %3807 = vmatpush1.bf16.msra.mxu1 %v5231_v10  ;;  %v5318_v9 = vld [vmem:[%s7045_s1 + $0xf40] ss:$16 sps:$4 sm:$0xff]   ;;  %v5321_v10 = vld [vmem:[%s7045_s1 + $0xf48] ss:$16 sps:$4 sm:$0xff]  }
 0x1b0   :  { %3464 = vmatprep.subr.bf16.mxu0 %v5236_v11  ;;  %3808 = vmatprep.subr.bf16.mxu1 %v5239_v12  ;;  %v5326_v11 = vld [vmem:[%s7045_s1 + $0xf64] ss:$16 sps:$4 sm:$0xff]   ;;  %v5329_v12 = vld [vmem:[%s7045_s1 + $0xf6c] ss:$16 sps:$4 sm:$0xff]  }
 0x1b3   :  { %3465 = vmatpush1.bf16.msra.mxu0 %v5234_v13  ;;  %3809 = vmatpush1.bf16.msra.mxu1 %v5237_v16  ;;  %v5324_v13 = vld [vmem:[%s7045_s1 + $0xf60] ss:$16 sps:$4 sm:$0xff]   ;;  %v5327_v16 = vld [vmem:[%s7045_s1 + $0xf68] ss:$16 sps:$4 sm:$0xff]  }
 0x1b4   :  { %3466 = vmatprep.subr.bf16.mxu0 %v5242_v17  ;;  %3810 = vmatprep.subr.bf16.mxu1 %v5245_v20  ;;  %v5332_v17 = vld [vmem:[%s7045_s1 + $0xf84] ss:$16 sps:$4 sm:$0xff]   ;;  %v5335_v20 = vld [vmem:[%s7045_s1 + $0xf8c] ss:$16 sps:$4 sm:$0xff]  }
 0x1b7   :  { %3467 = vmatpush1.bf16.msra.mxu0 %v5240_v15  ;;  %3811 = vmatpush1.bf16.msra.mxu1 %v5243_v22  ;;  %v5330_v15 = vld [vmem:[%s7045_s1 + $0xf80] ss:$16 sps:$4 sm:$0xff]   ;;  %v5333_v22 = vld [vmem:[%s7045_s1 + $0xf88] ss:$16 sps:$4 sm:$0xff]  }
 0x1b8   :  { %3468 = vmatprep.subr.bf16.mxu0 %v5248_v23  ;;  %3812 = vmatprep.subr.bf16.mxu1 %v5251_v18  ;;  %v5338_v23 = vld [vmem:[%s7045_s1 + $0xfa4] ss:$16 sps:$4 sm:$0xff]   ;;  %v5341_v18 = vld [vmem:[%s7045_s1 + $0xfac] ss:$16 sps:$4 sm:$0xff]  }
 0x1bb   :  { %3469 = vmatpush1.bf16.msra.mxu0 %v5246_v25  ;;  %3813 = vmatpush1.bf16.msra.mxu1 %v5249_v26  ;;  %v5336_v25 = vld [vmem:[%s7045_s1 + $0xfa0] ss:$16 sps:$4 sm:$0xff]   ;;  %v5339_v26 = vld [vmem:[%s7045_s1 + $0xfa8] ss:$16 sps:$4 sm:$0xff]  }
 0x1bc   :  { %3470 = vmatprep.subr.bf16.mxu0 %v5254_v27  ;;  %3814 = vmatprep.subr.bf16.mxu1 %v5257_v28  ;;  %v5344_v27 = vld [vmem:[%s7045_s1 + $0xfc4] ss:$16 sps:$4 sm:$0xff]   ;;  %v5347_v28 = vld [vmem:[%s7045_s1 + $0xfcc] ss:$16 sps:$4 sm:$0xff]  }
 0x1bf   :  { %3471 = vmatpush1.bf16.msra.mxu0 %v5252_v14  ;;  %3815 = vmatpush1.bf16.msra.mxu1 %v5255_v30  ;;  %v5342_v14 = vld [vmem:[%s7045_s1 + $0xfc0] ss:$16 sps:$4 sm:$0xff]   ;;  %v5345_v30 = vld [vmem:[%s7045_s1 + $0xfc8] ss:$16 sps:$4 sm:$0xff]  }
 0x1c0   :  { %3483 = vmatprep.subr.bf16.mxu0 %v5260_v19  ;;  %3827 = vmatprep.subr.bf16.mxu1 %v5263_v24  ;;  %v5350_v19 = vld [vmem:[%s7045_s1 + $0xfe4] ss:$16 sps:$4 sm:$0xff]   ;;  %v5353_v24 = vld [vmem:[%s7045_s1 + $0xfec] ss:$16 sps:$4 sm:$0xff]  }
 0x1c2   :  { %3473 = vmatmul.mubr.bf16.vlgmr.msra.gmra.mrb[0].mxu0 %v4014_v31  ;;  %3817 = vmatmul.mubr.bf16.vlgmr.msra.gmra.mrb[0].mxu1 %v4014_v31  ;;  %v5348_v31 = vld [vmem:[%s7045_s1 + $0xfe0] ss:$16 sps:$4 sm:$0xff]  }
 0x1c3   :  { %3484 = vmatpush1.bf16.msra.mxu0 %v5258_v34  ;;  %3828 = vmatpush1.bf16.msra.mxu1 %v5261_v21  ;;  %v5351_v34 = vld [vmem:[%s7045_s1 + $0xfe8] ss:$16 sps:$4 sm:$0xff]   ;;  %v4016_v21 = vcombine.low %v6821_v32, %v6826_v33 }
 0x1c4   :  { %3485 = vmatprep.subr.bf16.mxu0 %v5266_v29  ;;  %3829 = vmatprep.subr.bf16.mxu1 %v5269_v35  ;;  %v3872_v29 = vlaneseq }
 0x1c5   :  { %3515 = vmatprep.mubr.bf16.mxu0 %v4017_v36  ;;  %3859 = vmatprep.mubr.bf16.mxu1 %v4017_v36 }
 0x1c6   :  { %v3873_v35 = vshrl.u32 %v3872_v29, 7 }
 0x1c7   :  { %3486 = vmatpush1.bf16.msra.mxu0 %v5264_v37  ;;  %3830 = vmatpush1.bf16.msra.mxu1 %v5267_v38  ;;  %v3870_v38 = vld [vmem:[%s7047_s2] sm:$0xff] }
 0x1c8   :  { %3487 = vmatprep.subr.bf16.mxu0 %v5272_v39  ;;  %3831 = vmatprep.subr.bf16.mxu1 %v5275_v40  ;;  %v3874_v36 = vsub.s32 0, %v3873_v35  ;;  %v3882_v37 = vsub.s32 4, %v3873_v35  ;;  %v3878_v39 = vsub.s32 2, %v3873_v35  ;;  %v3886_v40 = vsub.s32 6, %v3873_v35 }
 0x1ca   :  { %v3879_v32 = vrot.slane %v3870_v38, %v3878_v39  ;;  %v3887_v33 = vrot.slane %v3870_v38, %v3886_v40 }
 0x1cb   :  { %3488 = vmatpush1.bf16.msra.mxu0 %v5270_v41  ;;  %3832 = vmatpush1.bf16.msra.mxu1 %v5273_v42  ;;  %v3918_v41 = vsub.s32 1, %v3873_v35  ;;  %v3926_v42 = vsub.s32 5, %v3873_v35 }
 0x1cc   :  { %3489 = vmatprep.subr.bf16.mxu0 %v5278_v43  ;;  %3833 = vmatprep.subr.bf16.mxu1 %v5281_v44  ;;  %v3922_v43 = vsub.s32 3, %v3873_v35  ;;  %v3875_v44 = vrot.slane %v3870_v38, %v3874_v36 }
 0x1cf   :  { %3490 = vmatpush1.bf16.msra.mxu0 %v5276_v45  ;;  %3834 = vmatpush1.bf16.msra.mxu1 %v5279_v46  ;;  %v3883_v45 = vrot.slane %v3870_v38, %v3882_v37  ;;  %v3930_v46 = vsub.s32 7, %v3873_v35 }
 0x1d0   :  { %3491 = vmatprep.subr.bf16.mxu0 %v5284_v47  ;;  %3835 = vmatprep.subr.bf16.mxu1 %v5287_v48  ;;  %v3919_v47 = vrot.slane %v3870_v38, %v3918_v41  ;;  %v3927_v48 = vrot.slane %v3870_v38, %v3926_v42 }
 0x1d3   :  { %3492 = vmatpush1.bf16.msra.mxu0 %v5282_v49  ;;  %3836 = vmatpush1.bf16.msra.mxu1 %v5285_v50  ;;  %v3923_v49 = vrot.slane %v3870_v38, %v3922_v43  ;;  %v3895_v50 = vrot.slane %v3875_v44, %v3874_v36 }
 0x1d4   :  { %3493 = vmatprep.subr.bf16.mxu0 %v5290_v51  ;;  %3837 = vmatprep.subr.bf16.mxu1 %v5293_v52  ;;  %v3903_v51 = vrot.slane %v3883_v45, %v3874_v36  ;;  %v3899_v52 = vrot.slane %v3879_v32, %v3874_v36 }
 0x1d7   :  { %3494 = vmatpush1.bf16.msra.mxu0 %v5288_v53  ;;  %3838 = vmatpush1.bf16.msra.mxu1 %v5291_v54  ;;  %v3907_v53 = vrot.slane %v3887_v33, %v3874_v36  ;;  %v3931_v54 = vrot.slane %v3870_v38, %v3930_v46 }
 0x1d8   :  { %3495 = vmatprep.subr.bf16.mxu0 %v5296_v55  ;;  %3839 = vmatprep.subr.bf16.mxu1 %v5299_v56  ;;  %v3939_v55 = vrot.slane %v3919_v47, %v3918_v41 }
 0x1db   :  { %3496 = vmatpush1.bf16.msra.mxu0 %v5294_v57  ;;  %3840 = vmatpush1.bf16.msra.mxu1 %v5297_v58  ;;  %v3947_v58 = vrot.slane %v3927_v48, %v3918_v41 }
 0x1dc   :  { %3497 = vmatprep.subr.bf16.mxu0 %v5302_v59  ;;  %3841 = vmatprep.subr.bf16.mxu1 %v5305_v60  ;;  %v3943_v59 = vrot.slane %v3923_v49, %v3918_v41 }
 0x1df   :  { %3498 = vmatpush1.bf16.msra.mxu0 %v5300_v61  ;;  %3842 = vmatpush1.bf16.msra.mxu1 %v5303_v62 }
 0x1e0   :  { %3499 = vmatprep.subr.bf16.mxu0 %v5308_v63  ;;  %3843 = vmatprep.subr.bf16.mxu1 %v5311_v0 }
 0x1e3   :  { %3500 = vmatpush1.bf16.msra.mxu0 %v5306_v1  ;;  %3844 = vmatpush1.bf16.msra.mxu1 %v5309_v2  ;;  %v3951_v2 = vrot.slane %v3931_v54, %v3918_v41 }
 0x1e4   :  { %3501 = vmatprep.subr.bf16.mxu0 %v5314_v3  ;;  %3845 = vmatprep.subr.bf16.mxu1 %v5317_v4 }
 0x1e7   :  { %3502 = vmatpush1.bf16.msra.mxu0 %v5312_v5  ;;  %3846 = vmatpush1.bf16.msra.mxu1 %v5315_v6 }
 0x1e8   :  { %3503 = vmatprep.subr.bf16.mxu0 %v5320_v7  ;;  %3847 = vmatprep.subr.bf16.mxu1 %v5323_v8 }
 0x1eb   :  { %3504 = vmatpush1.bf16.msra.mxu0 %v5318_v9  ;;  %3848 = vmatpush1.bf16.msra.mxu1 %v5321_v10 }
 0x1ec   :  { %3505 = vmatprep.subr.bf16.mxu0 %v5326_v11  ;;  %3849 = vmatprep.subr.bf16.mxu1 %v5329_v12 }
 0x1ef   :  { %3506 = vmatpush1.bf16.msra.mxu0 %v5324_v13  ;;  %3850 = vmatpush1.bf16.msra.mxu1 %v5327_v16 }
 0x1f0   :  { %3507 = vmatprep.subr.bf16.mxu0 %v5332_v17  ;;  %3851 = vmatprep.subr.bf16.mxu1 %v5335_v20 }
 0x1f3   :  { %3508 = vmatpush1.bf16.msra.mxu0 %v5330_v15  ;;  %3852 = vmatpush1.bf16.msra.mxu1 %v5333_v22 }
 0x1f4   :  { %3509 = vmatprep.subr.bf16.mxu0 %v5338_v23  ;;  %3853 = vmatprep.subr.bf16.mxu1 %v5341_v18 }
 0x1f7   :  { %3510 = vmatpush1.bf16.msra.mxu0 %v5336_v25  ;;  %3854 = vmatpush1.bf16.msra.mxu1 %v5339_v26 }
 0x1f8   :  { %3511 = vmatprep.subr.bf16.mxu0 %v5344_v27  ;;  %3855 = vmatprep.subr.bf16.mxu1 %v5347_v28 }
 0x1fb   :  { %3512 = vmatpush1.bf16.msra.mxu0 %v5342_v14  ;;  %3856 = vmatpush1.bf16.msra.mxu1 %v5345_v30 }
 0x1fc   :  { %3513 = vmatprep.subr.bf16.mxu0 %v5350_v19  ;;  %3857 = vmatprep.subr.bf16.mxu1 %v5353_v24 }
 0x1ff   :  { %3514 = vmatpush1.bf16.msra.mxu0 %v5348_v31  ;;  %3858 = vmatpush1.bf16.msra.mxu1 %v5351_v34 }
 0x202   :  { %3516 = vmatmul.mubr.bf16.vlgmr.msra.gmra.mrb[0].mxu0 %v4016_v21  ;;  %3860 = vmatmul.mubr.bf16.vlgmr.msra.gmra.mrb[0].mxu1 %v4016_v21 }
 0x2d5   :  { %v3517_v56 = vpop.f32.mrb[0].mxu0  ;;  %v3861_v57 = vpop.f32.mrb[0].mxu1 }
 0x2d6   :  { %v3908_v60 = vmul.f32 %v3895_v50, %v3517_v56  ;;  %v3910_v61 = vmul.f32 %v3903_v51, %v3861_v57  ;;  %v3519_v62 = vpop.f32.mrb[1].mxu0  ;;  %v3863_v63 = vpop.f32.mrb[1].mxu1 }
 0x2d7   :  { %v3909_v0 = vmul.f32 %v3899_v52, %v3519_v62  ;;  %v3911_v1 = vmul.f32 %v3907_v53, %v3863_v63  ;;  %v3521_v3 = vpop.f32.mrb[2].mxu0  ;;  %v3865_v4 = vpop.f32.mrb[2].mxu1 }
 0x2d8   :  { %v3952_v5 = vadd.f32 %v3939_v55, %v3908_v60  ;;  %v3912_v6 = vmul.f32 %v3895_v50, %v3521_v3  ;;  %v3914_v7 = vmul.f32 %v3903_v51, %v3865_v4  ;;  %v3523_v8 = vpop.f32.mrb[3].mxu0  ;;  %v3867_v9 = vpop.f32.mrb[3].mxu1  ;;  %v3954_v10 = vadd.f32 %v3947_v58, %v3910_v61 }
 0x2d9   :  { %v3953_v11 = vadd.f32 %v3943_v59, %v3909_v0  ;;  %v3913_v12 = vmul.f32 %v3899_v52, %v3523_v8  ;;  %v3915_v17 = vmul.f32 %v3907_v53, %v3867_v9  ;;  %v3955_v15 = vadd.f32 %v3951_v2, %v3911_v1 }
 0x2da   :  { %v3960_v13 = vmul.f32 %v3952_v5, %v3952_v5  ;;  %v3956_v16 = vadd.f32 %v3939_v55, %v3912_v6  ;;  %v3958_v22 = vadd.f32 %v3947_v58, %v3914_v7  ;;  %v3962_v26 = vmul.f32 %v3954_v10, %v3954_v10 }
 0x2db   :  { %v3961_v20 = vmul.f32 %v3953_v11, %v3953_v11  ;;  %v3957_v23 = vadd.f32 %v3943_v59, %v3913_v12  ;;  %v3959_v28 = vadd.f32 %v3951_v2, %v3915_v17  ;;  %v3963_v30 = vmul.f32 %v3955_v15, %v3955_v15 }
 0x2dc   :  { %v3964_v18 = vmul.f32 %v3956_v16, %v3956_v16  ;;  %v3966_v14 = vmul.f32 %v3958_v22, %v3958_v22 }
 0x2dd   :  { %v3965_v25 = vmul.f32 %v3957_v23, %v3957_v23  ;;  %v3968_v27 = vadd.f32 %v3961_v20, %v3960_v13  ;;  %v3967_v21 = vmul.f32 %v3959_v28, %v3959_v28 }
 0x2df   :  { %v3969_v19 = vadd.f32 %v3968_v27, %v3962_v26  ;;  %v3973_v24 = vadd.f32 %v3965_v25, %v3964_v18 }
 0x2e1   :  { %v3970_v31 = vadd.f32 %v3969_v19, %v3963_v30  ;;  %v3974_v34 = vadd.f32 %v3973_v24, %v3966_v14 }
 0x2e3   :  { %3971 = vadd.xlane.f32.xlu0 %v3970_v31  ;;  %v3975_v29 = vadd.f32 %v3974_v34, %v3967_v21 }
 0x2e7   :  { %3976 = vadd.xlane.f32.xlu0 %v3975_v29 }
 0x370   :  { %v3972_v35 = vpop.xlane.xlu0 %3971 }
 0x371   :  { %v3978_v36 = vmax.f32 %v3972_v35, 1e-24 }
 0x373   :  { %5354 = vrsqrt.f32 %v3978_v36 }
 0x374   :  { %v3977_v37 = vpop.xlane.xlu0 %3976 }
 0x375   :  { %v3979_v38 = vmax.f32 %v3977_v37, 1e-24 }
 0x377   :  { %5356 = vrsqrt.f32 %v3979_v38 }
 0x37d   :  { %v5355_v39 = vpop.eup %5354 }
 0x37e   :  { %v3982_v40 = vmul.f32 %v5355_v39, %v3952_v5  ;;  %v3983_v41 = vmul.f32 %v5355_v39, %v3953_v11  ;;  %v3984_v42 = vmul.f32 %v5355_v39, %v3954_v10  ;;  %v3985_v43 = vmul.f32 %v5355_v39, %v3955_v15 }
 0x380   :  { %3990 = vst [vmem:[%s7048_s3] sm:$0xff] %v3982_v40  ;;  %3991 = vst [vmem:[%s7048_s3 + $0x8] sm:$0xff] %v3983_v41 }
 0x381   :  { %3992 = vst [vmem:[%s7048_s3 + $0x10] sm:$0xff] %v3984_v42  ;;  %3993 = vst [vmem:[%s7048_s3 + $0x18] sm:$0xff] %v3985_v43  ;;  %v5357_v44 = vpop.eup %5356 }
 0x382   :  { %v3986_v45 = vmul.f32 %v5357_v44, %v3956_v16  ;;  %v3987_v32 = vmul.f32 %v5357_v44, %v3957_v23  ;;  %v3988_v33 = vmul.f32 %v5357_v44, %v3958_v22  ;;  %v3989_v46 = vmul.f32 %v5357_v44, %v3959_v28 }
 0x384   :  { %3994 = vst [vmem:[%s7048_s3 + $0x20] sm:$0xff] %v3986_v45  ;;  %3995 = vst [vmem:[%s7048_s3 + $0x28] sm:$0xff] %v3987_v32 }
 0x385   :  { %3996 = vst [vmem:[%s7048_s3 + $0x30] sm:$0xff] %v3988_v33  ;;  %3997 = vst [vmem:[%s7048_s3 + $0x38] sm:$0xff] %v3989_v46 }

</bundles_post_ra>
